<compile_context>
chip_gen: v7x
topology: tpu7x:2x2x1
jax: 0.10.0
libtpu: 0.0.40
codegen_flags: <defaults>
</compile_context>

<pallas_src>
import functools
import math

import jax
import jax.numpy as jnp
from jax.experimental import pallas as pl
from jax.experimental.pallas import tpu as pltpu


def _round_up(n, m):
    return -(-n // m) * m


def _vmem_limit_bytes():
    """Explicit scoped-VMEM limit (generation-aware, with headroom)."""
    try:
        cap = int(pltpu.get_tpu_info().vmem_capacity_bytes)
    except Exception:
        cap = 64 * 1024 * 1024            # v7x-safe fallback
    return max(16 << 20, min(cap - (8 << 20), 120 << 20))


def _pick_tb(BN, S, D, H, F, n_heads, w_bytes, vmem_budget):
    """Sequences per grid step: fit the per-step working set in VMEM, keep the
    grid >= 2 (v7x has two TensorCores), target <= ~1024 rows per step."""
    # single-buffered weights resident for the whole grid
    weights = (D * 3 * H + H * H + (D * H if D != H else 0) + 2 * H * F) * w_bytes
    weights += (7 * H + F + 2 * D) * 4
    # per-sequence working set (f32 intermediates dominate)
    per_seq = S * (D + 3 * H + 4 * H + F) * 4            # xn/qkv/h1/f slabs
    per_seq += n_heads * S * S * 4 * 2                   # scores + probs
    per_seq += S * (D + H) * w_bytes * 2                 # dbl-buffered in/out blocks
    budget = max(vmem_budget - weights - (4 << 20), per_seq)
    tb = max(1, int(budget // per_seq))
    tb = min(tb, max(1, 1024 // S))
    if BN >= 2:
        tb = min(tb, BN // 2)
    return max(1, min(tb, BN))


# ----------------------------------------------------------------------------
# Pallas kernel: one full TransformerLayer (optionally + fused readout)
# ----------------------------------------------------------------------------
def _transformer_layer_kernel(x_ref, *refs, n_heads, causal, eps,
                              has_skip_proj, has_readout, valid_s):
    refs = list(refs)
    o_ref = refs.pop()
    ln1w_ref, ln1b_ref, wqkv_ref, bqkv_ref, wo_ref, bo_ref = refs[:6]
    idx = 6
    if has_skip_proj:
        wskip_ref, bskip_ref = refs[idx], refs[idx + 1]
        idx += 2
    ln2w_ref, ln2b_ref, wm1_ref, bm1_ref, wm2_ref, bm2_ref = refs[idx:idx + 6]
    idx += 6
    if has_readout:
        wro_ref, bro_ref = refs[idx], refs[idx + 1]

    TB, S, D = x_ref.shape
    H = wo_ref.shape[1]
    hd = H // n_heads
    cdt = wqkv_ref.dtype            # MXU input dtype (bf16 on the fast path)

    # Flatten the TB independent sequences into one (TB*S, D) slab for all
    # row-wise ops. S is padded to a multiple of 8, so this reshape is free.
    x2 = x_ref[...].reshape(TB * S, D)
    xf = x2.astype(jnp.float32)

    # ---- norm1: tsl LayerNorm (x-mean)/(std+eps)*w + b, biased std (f32) ----
    mean = jnp.mean(xf, axis=-1, keepdims=True)
    var = jnp.mean((xf - mean) ** 2, axis=-1, keepdims=True)
    inv = pl.reciprocal(jnp.sqrt(var) + eps, approx=True)
    xn = ((xf - mean) * inv * ln1w_ref[...] + ln1b_ref[...]).astype(cdt)

    # ---- fused q/k/v projection (1/sqrt(hd) already folded into Wq/bq) -----
    qkv = jnp.dot(xn, wqkv_ref[...],
                  preferred_element_type=jnp.float32) + bqkv_ref[...]
    q = qkv[:, :H].reshape(TB, S, H).astype(cdt)
    k = qkv[:, H:2 * H].reshape(TB, S, H).astype(cdt)
    v = qkv[:, 2 * H:].reshape(TB, S, H).astype(cdt)

    mask = None
    if causal or valid_s < S:
        row = jax.lax.broadcasted_iota(jnp.int32, (S, S), 0)
        col = jax.lax.broadcasted_iota(jnp.int32, (S, S), 1)
        mask = (col <= row) if causal else (col < valid_s)
        if causal and valid_s < S:
            mask = jnp.logical_and(mask, col < valid_s)

    # TODO(synk): for very large S, tile over the KV axis (flash-style online
    # softmax) so the (TB, S, S) score slab stays bounded on v7x's 64 MiB VMEM.
    head_outs = []
    for h in range(n_heads):                        # static loop over heads
        sl = slice(h * hd, (h + 1) * hd)
        s = jnp.einsum("bqd,bkd->bqk", q[:, :, sl], k[:, :, sl],
                       preferred_element_type=jnp.float32)
        if mask is not None:
            s = jnp.where(mask, s, -1e30)           # finite mask (no inf-inf NaN)
        s = s - jnp.max(s, axis=-1, keepdims=True)
        p = jnp.exp(s)
        p = p * pl.reciprocal(jnp.sum(p, axis=-1, keepdims=True), approx=True)
        head_outs.append(jnp.einsum("bqk,bkd->bqd", p.astype(cdt), v[:, :, sl],
                                    preferred_element_type=jnp.float32))
    ho = head_outs[0] if n_heads == 1 else jnp.concatenate(head_outs, axis=-1)
    # single output projection with K = H (keeps the 256-wide MXU fed)
    att = jnp.dot(ho.reshape(TB * S, H).astype(cdt), wo_ref[...],
                  preferred_element_type=jnp.float32) + bo_ref[...]

    # ---- skip connection + attention residual -------------------------------
    if has_skip_proj:
        skip = jnp.dot(x2.astype(cdt), wskip_ref[...],
                       preferred_element_type=jnp.float32) + bskip_ref[...]
    else:
        skip = xf                                   # Identity skip (D == H)
    h1 = skip + att                                 # f32 (TB*S, H)

    # ---- MLP: LayerNorm -> Linear -> ELU -> Linear, residual ----------------
    m2 = jnp.mean(h1, axis=-1, keepdims=True)
    v2 = jnp.mean((h1 - m2) ** 2, axis=-1, keepdims=True)
    inv2 = pl.reciprocal(jnp.sqrt(v2) + eps, approx=True)
    hn = ((h1 - m2) * inv2 * ln2w_ref[...] + ln2b_ref[...]).astype(cdt)
    f = jnp.dot(hn, wm1_ref[...],
                preferred_element_type=jnp.float32) + bm1_ref[...]
    f = jnp.where(f > 0, f, jnp.exp(jnp.minimum(f, 0.0)) - 1.0)   # ELU(alpha=1)
    f = jnp.dot(f.astype(cdt), wm2_ref[...],
                preferred_element_type=jnp.float32) + bm2_ref[...]
    out = h1 + f

    if has_readout:                                 # fused linear readout
        out = jnp.dot(out.astype(cdt), wro_ref[...],
                      preferred_element_type=jnp.float32) + bro_ref[...]

    o_ref[...] = out.reshape(TB, S, -1).astype(o_ref.dtype)


# ----------------------------------------------------------------------------
# Wrappers
# ----------------------------------------------------------------------------
_LAYER_KEYS = ("ln1w", "ln1b", "wqkv", "bqkv", "wo", "bo")
_LAYER_KEYS_SKIP = ("wskip", "bskip")
_LAYER_KEYS_MLP = ("ln2w", "ln2b", "wm1", "bm1", "wm2", "bm2")


def transformer_layer(x_seq, params, *, n_heads, causal, tb, valid_s,
                      readout=None, out_dtype=None, eps=1e-5,
                      vmem_limit=None, alias_io=False):
    """x_seq: (BN, S, D) with BN % tb == 0 and S % 8 == 0 -> (BN, S, H|O_pad)."""
    BN, S, D = x_seq.shape
    H = params["wo"].shape[1]
    has_skip_proj = "wskip" in params
    has_readout = readout is not None
    out_dtype = x_seq.dtype if out_dtype is None else out_dtype

    names = list(_LAYER_KEYS)
    if has_skip_proj:
        names += list(_LAYER_KEYS_SKIP)
    names += list(_LAYER_KEYS_MLP)
    args = [params[k] for k in names]
    if has_readout:
        args += list(readout)
    out_dim = readout[0].shape[1] if has_readout else H

    def const_spec(a):
        # Constant index_map -> fetched once; single-buffer to halve weight VMEM.
        return pl.BlockSpec(a.shape, lambda i, _nd=a.ndim: (0,) * _nd,
                            pipeline_mode=pl.Buffered(1))

    kernel = functools.partial(
        _transformer_layer_kernel, n_heads=n_heads, causal=causal, eps=eps,
        has_skip_proj=has_skip_proj, has_readout=has_readout, valid_s=valid_s)

    io_alias = {}
    if alias_io and D == out_dim and x_seq.dtype == out_dtype:
        io_alias = {0: 0}            # reuse the activation buffer across layers

    cp = dict(dimension_semantics=("parallel",))
    if vmem_limit is not None:
        cp["vmem_limit_bytes"] = int(vmem_limit)

    return pl.pallas_call(
        kernel,
        out_shape=jax.ShapeDtypeStruct((BN, S, out_dim), out_dtype),
        grid=(BN // tb,),
        in_specs=[pl.BlockSpec((tb, S, D), lambda i: (i, 0, 0))]
                 + [const_spec(a) for a in args],
        out_specs=pl.BlockSpec((tb, S, out_dim), lambda i: (i, 0, 0)),
        input_output_aliases=io_alias,
        compiler_params=pltpu.CompilerParams(**cp),
    )(x_seq, *args)


def _prepare_params(layers_params, readout_params, n_heads, compute_dtype):
    """Cast matmul weights to the MXU dtype, keep LN/bias params in f32, fold
    the 1/sqrt(head_dim) attention scale into Wq/bq, pad the readout lane dim."""
    w_keys = ("wo", "wm1", "wm2", "wskip")
    f_keys = ("ln1w", "ln1b", "bo", "bm1", "bm2", "bskip", "ln2w", "ln2b")
    prepped = []
    for p in layers_params:
        q = dict(p)
        H = q["wo"].shape[1]
        scale = 1.0 / math.sqrt(H // n_heads)
        sc = jnp.concatenate([jnp.full((H,), scale, jnp.float32),
                              jnp.ones((2 * H,), jnp.float32)])
        q["wqkv"] = (q["wqkv"].astype(jnp.float32) * sc[None, :]).astype(compute_dtype)
        q["bqkv"] = q["bqkv"].astype(jnp.float32) * sc[None, :]
        for k in w_keys:
            if k in q:
                q[k] = q[k].astype(compute_dtype)
        for k in f_keys:
            if k in q:
                q[k] = q[k].astype(jnp.float32)
        prepped.append(q)

    readout, out_size = None, None
    if readout_params is not None:
        w, b = readout_params
        out_size = w.shape[1]
        o_pad = _round_up(out_size, 128)          # lane-dense readout stores
        if o_pad != out_size:
            w = jnp.pad(w, ((0, 0), (0, o_pad - out_size)))
            b = jnp.pad(b, ((0, 0), (0, o_pad - out_size)))
        readout = (w.astype(compute_dtype), b.astype(jnp.float32))
    return prepped, readout, out_size


def transformer_forward(x, layers_params, readout_params, *, n_heads, causal,
                        compute_dtype=jnp.bfloat16, seq_per_block=None):
    """x: (B, S, N, C_in) -> (B, S, N, hidden_size | output_size)."""
    B, S, N, Cin = x.shape
    BN = B * N
    out_dtype = x.dtype
    H = layers_params[0]["wo"].shape[1]
    F = layers_params[0]["wm1"].shape[1]

    prepped, readout, out_size = _prepare_params(
        layers_params, readout_params, n_heads, compute_dtype)

    # Pad steps to a sublane multiple so in-kernel reshapes are layout-free;
    # padded key positions are masked inside the kernel via valid_s.
    Sp = _round_up(S, 8)

    vmem_limit = _vmem_limit_bytes()
    w_bytes = jnp.dtype(compute_dtype).itemsize
    if seq_per_block is None:
        seq_per_block = _pick_tb(BN, Sp, max(Cin, H), H, F, n_heads,
                                 w_bytes, vmem_limit)
    tb = max(1, min(seq_per_block, BN))
    BNp = _round_up(BN, tb)

    # One layout transpose for the whole stack: (B,S,N,C) -> (B*N, S, C).
    h = jnp.transpose(x, (0, 2, 1, 3)).reshape(BN, S, Cin).astype(compute_dtype)
    if BNp != BN or Sp != S:
        h = jnp.pad(h, ((0, BNp - BN), (0, Sp - S), (0, 0)))

    n_layers = len(prepped)
    for li, p in enumerate(prepped):
        last = li == n_layers - 1
        h = transformer_layer(
            h, p, n_heads=n_heads, causal=causal, tb=tb, valid_s=S,
            readout=readout if last else None,
            out_dtype=out_dtype if last else compute_dtype,
            vmem_limit=vmem_limit, alias_io=not last)

    # Strip padding (smallest tensor) and transpose back once.
    h = h[:BN, :S]
    if out_size is not None:
        h = h[..., :out_size]
    C_out = h.shape[-1]
    return jnp.transpose(h.reshape(B, N, S, C_out), (0, 2, 1, 3))


# ----------------------------------------------------------------------------
# Deterministic parameter init (synthetic, mirrors module shapes; f32, unscaled)
# ----------------------------------------------------------------------------
def init_params(key, input_size, hidden_size, ff_size, output_size, n_layers):
    layers = []
    for li in range(n_layers):
        D = input_size if li == 0 else hidden_size
        H, F = hidden_size, ff_size
        ks = jax.random.split(jax.random.fold_in(key, li), 16)
        nrm = lambda k, shape, s=0.1: jax.random.normal(k, shape, jnp.float32) * s
        wq, bq = nrm(ks[0], (D, H)), nrm(ks[1], (1, H))
        wk, bk = nrm(ks[2], (D, H)), nrm(ks[3], (1, H))
        wv, bv = nrm(ks[4], (D, H)), nrm(ks[5], (1, H))
        p = dict(
            ln1w=jnp.ones((1, D), jnp.float32),
            ln1b=jnp.zeros((1, D), jnp.float32),
            wqkv=jnp.concatenate([wq, wk, wv], axis=1),   # fused QKV projection
            bqkv=jnp.concatenate([bq, bk, bv], axis=1),
            wo=nrm(ks[6], (H, H)), bo=nrm(ks[7], (1, H)),
            ln2w=jnp.ones((1, H), jnp.float32),
            ln2b=jnp.zeros((1, H), jnp.float32),
            wm1=nrm(ks[8], (H, F)), bm1=nrm(ks[9], (1, F)),
            wm2=nrm(ks[10], (F, H)), bm2=nrm(ks[11], (1, H)),
        )
        if D != H:  # module uses a Linear skip_conn only when sizes differ
            p["wskip"] = nrm(ks[12], (D, H))
            p["bskip"] = nrm(ks[13], (1, H))
        layers.append(p)
    readout = None
    if output_size is not None:
        kr = jax.random.fold_in(key, 10_000)
        k1, k2 = jax.random.split(kr)
        readout = (jax.random.normal(k1, (hidden_size, output_size), jnp.float32) * 0.1,
                   jax.random.normal(k2, (1, output_size), jnp.float32) * 0.1)
    return layers, readout


# ----------------------------------------------------------------------------
# Pure-JAX reference (sanity check)
# ----------------------------------------------------------------------------
def _ref_layer(x_seq, p, n_heads, causal, eps=1e-5):
    H = p["wo"].shape[1]

    def ln(x, w, b):
        m = x.mean(-1, keepdims=True)
        s = jnp.sqrt(((x - m) ** 2).mean(-1, keepdims=True))
        return (x - m) / (s + eps) * w + b

    xn = ln(x_seq, p["ln1w"], p["ln1b"])
    qkv = xn @ p["wqkv"] + p["bqkv"]
    q, k, v = qkv[..., :H], qkv[..., H:2 * H], qkv[..., 2 * H:]
    BN, S, _ = x_seq.shape
    hd = H // n_heads
    qh = q.reshape(BN, S, n_heads, hd).transpose(0, 2, 1, 3)
    kh = k.reshape(BN, S, n_heads, hd).transpose(0, 2, 1, 3)
    vh = v.reshape(BN, S, n_heads, hd).transpose(0, 2, 1, 3)
    s = jnp.einsum("bhqd,bhkd->bhqk", qh, kh) / jnp.sqrt(jnp.float32(hd))
    if causal:
        mask = jnp.tril(jnp.ones((S, S), bool))
        s = jnp.where(mask, s, -jnp.inf)
    a = jax.nn.softmax(s, axis=-1)
    o = jnp.einsum("bhqk,bhkd->bhqd", a, vh).transpose(0, 2, 1, 3).reshape(BN, S, H)
    att = o @ p["wo"] + p["bo"]
    skip = x_seq @ p["wskip"] + p["bskip"] if "wskip" in p else x_seq
    h1 = skip + att
    hn = ln(h1, p["ln2w"], p["ln2b"])
    f = hn @ p["wm1"] + p["bm1"]
    f = jnp.where(f > 0, f, jnp.exp(jnp.minimum(f, 0.0)) - 1.0)
    f = f @ p["wm2"] + p["bm2"]
    return h1 + f


def _ref_forward(x, layers_params, readout_params, n_heads, causal):
    B, S, N, _ = x.shape
    h = x
    for p in layers_params:
        D = h.shape[-1]
        seq = jnp.transpose(h, (0, 2, 1, 3)).reshape(B * N, S, D)
        out = _ref_layer(seq, p, n_heads, causal)
        H = out.shape[-1]
        h = jnp.transpose(out.reshape(B, N, S, H), (0, 2, 1, 3))
    if readout_params is not None:
        w, b = readout_params
        h = h @ w + b
    return h


# ----------------------------------------------------------------------------
if __name__ == "__main__":
    # Small shapes: batch=2, steps=8, nodes=4, input=16, hidden=32, ff=64
    B, S, N = 2, 8, 4
    input_size, hidden_size, ff_size, output_size = 16, 32, 64, 8
    n_layers, n_heads, causal = 3, 1, True

    key = jax.random.PRNGKey(0)
    kx, kp = jax.random.split(key)
    x = jax.random.normal(kx, (B, S, N, input_size), jnp.float32)
    layers_params, readout_params = init_params(
        kp, input_size, hidden_size, ff_size, output_size, n_layers)

    ref = jax.block_until_ready(
        _ref_forward(x, layers_params, readout_params, n_heads, causal))

    # f32 compute path: strict numerical check against the pure-JAX reference.
    fwd_f32 = jax.jit(functools.partial(
        transformer_forward, n_heads=n_heads, causal=causal,
        compute_dtype=jnp.float32))
    out_f32 = jax.block_until_ready(fwd_f32(x, layers_params, readout_params))
    assert out_f32.shape == (B, S, N, output_size), out_f32.shape
    assert jnp.allclose(out_f32, ref, atol=1e-2, rtol=1e-2), (
        float(jnp.max(jnp.abs(out_f32 - ref))))

    # bf16 compute path (recommended fast path on TPU): looser tolerance.
    fwd_bf16 = jax.jit(functools.partial(
        transformer_forward, n_heads=n_heads, causal=causal,
        compute_dtype=jnp.bfloat16))
    out_bf16 = jax.block_until_ready(fwd_bf16(x, layers_params, readout_params))
    assert out_bf16.shape == (B, S, N, output_size), out_bf16.shape
    assert jnp.allclose(out_bf16, ref, atol=1e-1, rtol=1e-1), (
        float(jnp.max(jnp.abs(out_bf16 - ref))))

    print("KERNEL_OK")
</pallas_src>

<mosaic_0001>
module attributes {stable_mosaic.version = 11 : i64} {
  func.func @_transformer_layer_kernel(%arg0: i32, %arg1: memref<4x8x32xf32, #tpu.memory_space<vmem>>, %arg2: memref<1x32xf32, #tpu.memory_space<vmem>>, %arg3: memref<1x32xf32, #tpu.memory_space<vmem>>, %arg4: memref<32x96xf32, #tpu.memory_space<vmem>>, %arg5: memref<1x96xf32, #tpu.memory_space<vmem>>, %arg6: memref<32x32xf32, #tpu.memory_space<vmem>>, %arg7: memref<1x32xf32, #tpu.memory_space<vmem>>, %arg8: memref<1x32xf32, #tpu.memory_space<vmem>>, %arg9: memref<1x32xf32, #tpu.memory_space<vmem>>, %arg10: memref<32x64xf32, #tpu.memory_space<vmem>>, %arg11: memref<1x64xf32, #tpu.memory_space<vmem>>, %arg12: memref<64x32xf32, #tpu.memory_space<vmem>>, %arg13: memref<1x32xf32, #tpu.memory_space<vmem>>, %arg14: memref<4x8x32xf32, #tpu.memory_space<vmem>>) attributes {dimension_semantics = [#tpu.dimension_semantics<parallel>], iteration_bounds = array<i64: 2>, scalar_prefetch = 0 : i64, scratch_operands = 0 : i64, tpu.core_type = #tpu.core_type<tc>, window_params = [{transform_indices = @transform_0, window_bounds = array<i64: 4, 8, 32>}, {pipeline_mode = #tpu.pipeline_mode<synchronous>, transform_indices = @transform_1, window_bounds = array<i64: 1, 32>}, {pipeline_mode = #tpu.pipeline_mode<synchronous>, transform_indices = @transform_2, window_bounds = array<i64: 1, 32>}, {pipeline_mode = #tpu.pipeline_mode<synchronous>, transform_indices = @transform_3, window_bounds = array<i64: 32, 96>}, {pipeline_mode = #tpu.pipeline_mode<synchronous>, transform_indices = @transform_4, window_bounds = array<i64: 1, 96>}, {pipeline_mode = #tpu.pipeline_mode<synchronous>, transform_indices = @transform_5, window_bounds = array<i64: 32, 32>}, {pipeline_mode = #tpu.pipeline_mode<synchronous>, transform_indices = @transform_6, window_bounds = array<i64: 1, 32>}, {pipeline_mode = #tpu.pipeline_mode<synchronous>, transform_indices = @transform_7, window_bounds = array<i64: 1, 32>}, {pipeline_mode = #tpu.pipeline_mode<synchronous>, transform_indices = @transform_8, window_bounds = array<i64: 1, 32>}, {pipeline_mode = #tpu.pipeline_mode<synchronous>, transform_indices = @transform_9, window_bounds = array<i64: 32, 64>}, {pipeline_mode = #tpu.pipeline_mode<synchronous>, transform_indices = @transform_10, window_bounds = array<i64: 1, 64>}, {pipeline_mode = #tpu.pipeline_mode<synchronous>, transform_indices = @transform_11, window_bounds = array<i64: 64, 32>}, {pipeline_mode = #tpu.pipeline_mode<synchronous>, transform_indices = @transform_12, window_bounds = array<i64: 1, 32>}, {transform_indices = @transform_13, window_bounds = array<i64: 4, 8, 32>}]} {
    %c0 = arith.constant 0 : index
    %c0_0 = arith.constant 0 : index
    %c0_1 = arith.constant 0 : index
    %0 = vector.load %arg1[%c0, %c0_0, %c0_1] : memref<4x8x32xf32, #tpu.memory_space<vmem>>, vector<4x8x32xf32>
    %1 = vector.shape_cast %0 : vector<4x8x32xf32> to vector<32x32xf32>
    %cst = arith.constant dense<0.000000e+00> : vector<32xf32>
    %2 = vector.multi_reduction <add>, %1, %cst [1] : vector<32x32xf32> to vector<32xf32>
    %3 = vector.shape_cast %2 : vector<32xf32> to vector<32x1xf32>
    %cst_2 = arith.constant 3.200000e+01 : f32
    %4 = vector.broadcast %cst_2 : f32 to vector<32x1xf32>
    %5 = arith.divf %3, %4 : vector<32x1xf32>
    %6 = vector.broadcast %5 : vector<32x1xf32> to vector<32x32xf32>
    %7 = arith.subf %1, %6 : vector<32x32xf32>
    %8 = arith.mulf %7, %7 : vector<32x32xf32>
    %cst_3 = arith.constant dense<0.000000e+00> : vector<32xf32>
    %9 = vector.multi_reduction <add>, %8, %cst_3 [1] : vector<32x32xf32> to vector<32xf32>
    %10 = vector.shape_cast %9 : vector<32xf32> to vector<32x1xf32>
    %cst_4 = arith.constant 3.200000e+01 : f32
    %11 = vector.broadcast %cst_4 : f32 to vector<32x1xf32>
    %12 = arith.divf %10, %11 : vector<32x1xf32>
    %13 = math.sqrt %12 : vector<32x1xf32>
    %cst_5 = arith.constant 9.99999974E-6 : f32
    %14 = vector.broadcast %cst_5 : f32 to vector<32x1xf32>
    %15 = arith.addf %13, %14 : vector<32x1xf32>
    %16 = tpu.reciprocal %15 {approx = true} : vector<32x1xf32> -> vector<32x1xf32>
    %17 = vector.broadcast %5 : vector<32x1xf32> to vector<32x32xf32>
    %18 = arith.subf %1, %17 : vector<32x32xf32>
    %19 = vector.broadcast %16 : vector<32x1xf32> to vector<32x32xf32>
    %20 = arith.mulf %18, %19 : vector<32x32xf32>
    %c0_6 = arith.constant 0 : index
    %c0_7 = arith.constant 0 : index
    %21 = vector.load %arg2[%c0_6, %c0_7] : memref<1x32xf32, #tpu.memory_space<vmem>>, vector<1x32xf32>
    %22 = vector.broadcast %21 : vector<1x32xf32> to vector<32x32xf32>
    %23 = arith.mulf %20, %22 : vector<32x32xf32>
    %c0_8 = arith.constant 0 : index
    %c0_9 = arith.constant 0 : index
    %24 = vector.load %arg3[%c0_8, %c0_9] : memref<1x32xf32, #tpu.memory_space<vmem>>, vector<1x32xf32>
    %25 = vector.broadcast %24 : vector<1x32xf32> to vector<32x32xf32>
    %26 = arith.addf %23, %25 : vector<32x32xf32>
    %c0_10 = arith.constant 0 : index
    %c0_11 = arith.constant 0 : index
    %27 = vector.load %arg4[%c0_10, %c0_11] : memref<32x96xf32, #tpu.memory_space<vmem>>, vector<32x96xf32>
    %cst_12 = arith.constant dense<0.000000e+00> : vector<32x96xf32>
    %28 = tpu.matmul %26, %27, %cst_12 {dimension_numbers = #tpu.dot_dimension_numbers<[1], [0], [0], [1], [0, 0, 1, 1], [], []>} : vector<32x32xf32>, vector<32x96xf32>, vector<32x96xf32> -> vector<32x96xf32>
    %c0_13 = arith.constant 0 : index
    %c0_14 = arith.constant 0 : index
    %29 = vector.load %arg5[%c0_13, %c0_14] : memref<1x96xf32, #tpu.memory_space<vmem>>, vector<1x96xf32>
    %30 = vector.broadcast %29 : vector<1x96xf32> to vector<32x96xf32>
    %31 = arith.addf %28, %30 : vector<32x96xf32>
    %32 = vector.extract_strided_slice %31 {offsets = [0, 0], sizes = [32, 32], strides = [1, 1]} : vector<32x96xf32> to vector<32x32xf32>
    %33 = vector.shape_cast %32 : vector<32x32xf32> to vector<4x8x32xf32>
    %34 = vector.extract_strided_slice %31 {offsets = [0, 32], sizes = [32, 32], strides = [1, 1]} : vector<32x96xf32> to vector<32x32xf32>
    %35 = vector.shape_cast %34 : vector<32x32xf32> to vector<4x8x32xf32>
    %36 = vector.extract_strided_slice %31 {offsets = [0, 64], sizes = [32, 32], strides = [1, 1]} : vector<32x96xf32> to vector<32x32xf32>
    %37 = vector.shape_cast %36 : vector<32x32xf32> to vector<4x8x32xf32>
    %38 = tpu.iota {dimensions = array<i32: 0>} : vector<8x8xi32>
    %39 = tpu.iota {dimensions = array<i32: 1>} : vector<8x8xi32>
    %40 = arith.cmpi sle, %39, %38 : vector<8x8xi32>
    "tpu.trace_start"() <{level = 10 : i32, message = "bqd,bkd->bqk"}> : () -> ()
    %cst_15 = arith.constant dense<0.000000e+00> : vector<4x8x8xf32>
    %41 = tpu.matmul %33, %35, %cst_15 {dimension_numbers = #tpu.dot_dimension_numbers<[2], [2], [1], [1], [0, 0, 0, 1, 1, 1], [0], [0]>} : vector<4x8x32xf32>, vector<4x8x32xf32>, vector<4x8x8xf32> -> vector<4x8x8xf32>
    %cst_16 = arith.constant -1.000000e+30 : f32
    "tpu.trace_stop"() : () -> ()
    %42 = vector.shape_cast %40 : vector<8x8xi1> to vector<1x8x8xi1>
    %43 = vector.broadcast %42 : vector<1x8x8xi1> to vector<4x8x8xi1>
    %44 = vector.broadcast %cst_16 : f32 to vector<4x8x8xf32>
    %45 = arith.select %43, %41, %44 : vector<4x8x8xi1>, vector<4x8x8xf32>
    %cst_17 = arith.constant dense<0xFF800000> : vector<4x8xf32>
    %46 = vector.multi_reduction <maximumf>, %45, %cst_17 [2] : vector<4x8x8xf32> to vector<4x8xf32>
    %47 = vector.shape_cast %46 : vector<4x8xf32> to vector<4x8x1xf32>
    %48 = vector.broadcast %47 : vector<4x8x1xf32> to vector<4x8x8xf32>
    %49 = arith.subf %45, %48 : vector<4x8x8xf32>
    %50 = math.exp %49 : vector<4x8x8xf32>
    %cst_18 = arith.constant dense<0.000000e+00> : vector<4x8xf32>
    %51 = vector.multi_reduction <add>, %50, %cst_18 [2] : vector<4x8x8xf32> to vector<4x8xf32>
    %52 = vector.shape_cast %51 : vector<4x8xf32> to vector<4x8x1xf32>
    %53 = tpu.reciprocal %52 {approx = true} : vector<4x8x1xf32> -> vector<4x8x1xf32>
    %54 = vector.broadcast %53 : vector<4x8x1xf32> to vector<4x8x8xf32>
    %55 = arith.mulf %50, %54 : vector<4x8x8xf32>
    "tpu.trace_start"() <{level = 10 : i32, message = "bqk,bkd->bqd"}> : () -> ()
    %cst_19 = arith.constant dense<0.000000e+00> : vector<4x8x32xf32>
    %56 = tpu.matmul %55, %37, %cst_19 {dimension_numbers = #tpu.dot_dimension_numbers<[2], [1], [1], [2], [0, 0, 0, 1, 1, 2], [0], [0]>} : vector<4x8x8xf32>, vector<4x8x32xf32>, vector<4x8x32xf32> -> vector<4x8x32xf32>
    "tpu.trace_stop"() : () -> ()
    %57 = vector.shape_cast %56 : vector<4x8x32xf32> to vector<32x32xf32>
    %c0_20 = arith.constant 0 : index
    %c0_21 = arith.constant 0 : index
    %58 = vector.load %arg6[%c0_20, %c0_21] : memref<32x32xf32, #tpu.memory_space<vmem>>, vector<32x32xf32>
    %cst_22 = arith.constant dense<0.000000e+00> : vector<32x32xf32>
    %59 = tpu.matmul %57, %58, %cst_22 {dimension_numbers = #tpu.dot_dimension_numbers<[1], [0], [0], [1], [0, 0, 1, 1], [], []>} : vector<32x32xf32>, vector<32x32xf32>, vector<32x32xf32> -> vector<32x32xf32>
    %c0_23 = arith.constant 0 : index
    %c0_24 = arith.constant 0 : index
    %60 = vector.load %arg7[%c0_23, %c0_24] : memref<1x32xf32, #tpu.memory_space<vmem>>, vector<1x32xf32>
    %61 = vector.broadcast %60 : vector<1x32xf32> to vector<32x32xf32>
    %62 = arith.addf %59, %61 : vector<32x32xf32>
    %63 = arith.addf %1, %62 : vector<32x32xf32>
    %cst_25 = arith.constant dense<0.000000e+00> : vector<32xf32>
    %64 = vector.multi_reduction <add>, %63, %cst_25 [1] : vector<32x32xf32> to vector<32xf32>
    %65 = vector.shape_cast %64 : vector<32xf32> to vector<32x1xf32>
    %cst_26 = arith.constant 3.200000e+01 : f32
    %66 = vector.broadcast %cst_26 : f32 to vector<32x1xf32>
    %67 = arith.divf %65, %66 : vector<32x1xf32>
    %68 = vector.broadcast %67 : vector<32x1xf32> to vector<32x32xf32>
    %69 = arith.subf %63, %68 : vector<32x32xf32>
    %70 = arith.mulf %69, %69 : vector<32x32xf32>
    %cst_27 = arith.constant dense<0.000000e+00> : vector<32xf32>
    %71 = vector.multi_reduction <add>, %70, %cst_27 [1] : vector<32x32xf32> to vector<32xf32>
    %72 = vector.shape_cast %71 : vector<32xf32> to vector<32x1xf32>
    %cst_28 = arith.constant 3.200000e+01 : f32
    %73 = vector.broadcast %cst_28 : f32 to vector<32x1xf32>
    %74 = arith.divf %72, %73 : vector<32x1xf32>
    %75 = math.sqrt %74 : vector<32x1xf32>
    %cst_29 = arith.constant 9.99999974E-6 : f32
    %76 = vector.broadcast %cst_29 : f32 to vector<32x1xf32>
    %77 = arith.addf %75, %76 : vector<32x1xf32>
    %78 = tpu.reciprocal %77 {approx = true} : vector<32x1xf32> -> vector<32x1xf32>
    %79 = vector.broadcast %67 : vector<32x1xf32> to vector<32x32xf32>
    %80 = arith.subf %63, %79 : vector<32x32xf32>
    %81 = vector.broadcast %78 : vector<32x1xf32> to vector<32x32xf32>
    %82 = arith.mulf %80, %81 : vector<32x32xf32>
    %c0_30 = arith.constant 0 : index
    %c0_31 = arith.constant 0 : index
    %83 = vector.load %arg8[%c0_30, %c0_31] : memref<1x32xf32, #tpu.memory_space<vmem>>, vector<1x32xf32>
    %84 = vector.broadcast %83 : vector<1x32xf32> to vector<32x32xf32>
    %85 = arith.mulf %82, %84 : vector<32x32xf32>
    %c0_32 = arith.constant 0 : index
    %c0_33 = arith.constant 0 : index
    %86 = vector.load %arg9[%c0_32, %c0_33] : memref<1x32xf32, #tpu.memory_space<vmem>>, vector<1x32xf32>
    %87 = vector.broadcast %86 : vector<1x32xf32> to vector<32x32xf32>
    %88 = arith.addf %85, %87 : vector<32x32xf32>
    %c0_34 = arith.constant 0 : index
    %c0_35 = arith.constant 0 : index
    %89 = vector.load %arg10[%c0_34, %c0_35] : memref<32x64xf32, #tpu.memory_space<vmem>>, vector<32x64xf32>
    %cst_36 = arith.constant dense<0.000000e+00> : vector<32x64xf32>
    %90 = tpu.matmul %88, %89, %cst_36 {dimension_numbers = #tpu.dot_dimension_numbers<[1], [0], [0], [1], [0, 0, 1, 1], [], []>} : vector<32x32xf32>, vector<32x64xf32>, vector<32x64xf32> -> vector<32x64xf32>
    %c0_37 = arith.constant 0 : index
    %c0_38 = arith.constant 0 : index
    %91 = vector.load %arg11[%c0_37, %c0_38] : memref<1x64xf32, #tpu.memory_space<vmem>>, vector<1x64xf32>
    %92 = vector.broadcast %91 : vector<1x64xf32> to vector<32x64xf32>
    %93 = arith.addf %90, %92 : vector<32x64xf32>
    %cst_39 = arith.constant 0.000000e+00 : f32
    %94 = vector.broadcast %cst_39 : f32 to vector<32x64xf32>
    %95 = arith.cmpf ogt, %93, %94 : vector<32x64xf32>
    %cst_40 = arith.constant 0.000000e+00 : f32
    %96 = vector.broadcast %cst_40 : f32 to vector<32x64xf32>
    %97 = arith.minimumf %93, %96 : vector<32x64xf32>
    %98 = math.exp %97 : vector<32x64xf32>
    %cst_41 = arith.constant 1.000000e+00 : f32
    %99 = vector.broadcast %cst_41 : f32 to vector<32x64xf32>
    %100 = arith.subf %98, %99 : vector<32x64xf32>
    %101 = arith.select %95, %93, %100 : vector<32x64xi1>, vector<32x64xf32>
    %c0_42 = arith.constant 0 : index
    %c0_43 = arith.constant 0 : index
    %102 = vector.load %arg12[%c0_42, %c0_43] : memref<64x32xf32, #tpu.memory_space<vmem>>, vector<64x32xf32>
    %cst_44 = arith.constant dense<0.000000e+00> : vector<32x32xf32>
    %103 = tpu.matmul %101, %102, %cst_44 {dimension_numbers = #tpu.dot_dimension_numbers<[1], [0], [0], [1], [0, 0, 1, 1], [], []>} : vector<32x64xf32>, vector<64x32xf32>, vector<32x32xf32> -> vector<32x32xf32>
    %c0_45 = arith.constant 0 : index
    %c0_46 = arith.constant 0 : index
    %104 = vector.load %arg13[%c0_45, %c0_46] : memref<1x32xf32, #tpu.memory_space<vmem>>, vector<1x32xf32>
    %105 = vector.broadcast %104 : vector<1x32xf32> to vector<32x32xf32>
    %106 = arith.addf %103, %105 : vector<32x32xf32>
    %107 = arith.addf %63, %106 : vector<32x32xf32>
    %108 = vector.shape_cast %107 : vector<32x32xf32> to vector<4x8x32xf32>
    %c0_47 = arith.constant 0 : index
    %c0_48 = arith.constant 0 : index
    %c0_49 = arith.constant 0 : index
    %109 = vector.load %arg14[%c0_47, %c0_48, %c0_49] : memref<4x8x32xf32, #tpu.memory_space<vmem>>, vector<4x8x32xf32>
    tpu.vector_store %arg14[%c0_47, %c0_48, %c0_49], %108 {strides = array<i32>} : memref<4x8x32xf32, #tpu.memory_space<vmem>>, vector<4x8x32xf32>,
    return
  }
  func.func @transform_0(%arg0: i32) -> (i32, i32, i32) {
    %c0_i32 = arith.constant 0 : i32
    %c0_i32_0 = arith.constant 0 : i32
    %c0_i32_1 = arith.constant 0 : i32
    return %arg0, %c0_i32, %c0_i32_0 : i32, i32, i32
  }
  func.func @transform_1(%arg0: i32) -> (i32, i32) {
    %c0_i32 = arith.constant 0 : i32
    %c0_i32_0 = arith.constant 0 : i32
    %c0_i32_1 = arith.constant 0 : i32
    return %c0_i32, %c0_i32_0 : i32, i32
  }
  func.func @transform_2(%arg0: i32) -> (i32, i32) {
    %c0_i32 = arith.constant 0 : i32
    %c0_i32_0 = arith.constant 0 : i32
    %c0_i32_1 = arith.constant 0 : i32
    return %c0_i32, %c0_i32_0 : i32, i32
  }
  func.func @transform_3(%arg0: i32) -> (i32, i32) {
    %c0_i32 = arith.constant 0 : i32
    %c0_i32_0 = arith.constant 0 : i32
    %c0_i32_1 = arith.constant 0 : i32
    return %c0_i32, %c0_i32_0 : i32, i32
  }
  func.func @transform_4(%arg0: i32) -> (i32, i32) {
    %c0_i32 = arith.constant 0 : i32
    %c0_i32_0 = arith.constant 0 : i32
    %c0_i32_1 = arith.constant 0 : i32
    return %c0_i32, %c0_i32_0 : i32, i32
  }
  func.func @transform_5(%arg0: i32) -> (i32, i32) {
    %c0_i32 = arith.constant 0 : i32
    %c0_i32_0 = arith.constant 0 : i32
    %c0_i32_1 = arith.constant 0 : i32
    return %c0_i32, %c0_i32_0 : i32, i32
  }
  func.func @transform_6(%arg0: i32) -> (i32, i32) {
    %c0_i32 = arith.constant 0 : i32
    %c0_i32_0 = arith.constant 0 : i32
    %c0_i32_1 = arith.constant 0 : i32
    return %c0_i32, %c0_i32_0 : i32, i32
  }
  func.func @transform_7(%arg0: i32) -> (i32, i32) {
    %c0_i32 = arith.constant 0 : i32
    %c0_i32_0 = arith.constant 0 : i32
    %c0_i32_1 = arith.constant 0 : i32
    return %c0_i32, %c0_i32_0 : i32, i32
  }
  func.func @transform_8(%arg0: i32) -> (i32, i32) {
    %c0_i32 = arith.constant 0 : i32
    %c0_i32_0 = arith.constant 0 : i32
    %c0_i32_1 = arith.constant 0 : i32
    return %c0_i32, %c0_i32_0 : i32, i32
  }
  func.func @transform_9(%arg0: i32) -> (i32, i32) {
    %c0_i32 = arith.constant 0 : i32
    %c0_i32_0 = arith.constant 0 : i32
    %c0_i32_1 = arith.constant 0 : i32
    return %c0_i32, %c0_i32_0 : i32, i32
  }
  func.func @transform_10(%arg0: i32) -> (i32, i32) {
    %c0_i32 = arith.constant 0 : i32
    %c0_i32_0 = arith.constant 0 : i32
    %c0_i32_1 = arith.constant 0 : i32
    return %c0_i32, %c0_i32_0 : i32, i32
  }
  func.func @transform_11(%arg0: i32) -> (i32, i32) {
    %c0_i32 = arith.constant 0 : i32
    %c0_i32_0 = arith.constant 0 : i32
    %c0_i32_1 = arith.constant 0 : i32
    return %c0_i32, %c0_i32_0 : i32, i32
  }
  func.func @transform_12(%arg0: i32) -> (i32, i32) {
    %c0_i32 = arith.constant 0 : i32
    %c0_i32_0 = arith.constant 0 : i32
    %c0_i32_1 = arith.constant 0 : i32
    return %c0_i32, %c0_i32_0 : i32, i32
  }
  func.func @transform_13(%arg0: i32) -> (i32, i32, i32) {
    %c0_i32 = arith.constant 0 : i32
    %c0_i32_0 = arith.constant 0 : i32
    %c0_i32_1 = arith.constant 0 : i32
    return %arg0, %c0_i32, %c0_i32_0 : i32, i32, i32
  }
}

module attributes {stable_mosaic.version = 11 : i64} {
  func.func @_transformer_layer_kernel(%arg0: i32, %arg1: memref<4x8x16xf32, #tpu.memory_space<vmem>>, %arg2: memref<1x16xf32, #tpu.memory_space<vmem>>, %arg3: memref<1x16xf32, #tpu.memory_space<vmem>>, %arg4: memref<16x96xf32, #tpu.memory_space<vmem>>, %arg5: memref<1x96xf32, #tpu.memory_space<vmem>>, %arg6: memref<32x32xf32, #tpu.memory_space<vmem>>, %arg7: memref<1x32xf32, #tpu.memory_space<vmem>>, %arg8: memref<16x32xf32, #tpu.memory_space<vmem>>, %arg9: memref<1x32xf32, #tpu.memory_space<vmem>>, %arg10: memref<1x32xf32, #tpu.memory_space<vmem>>, %arg11: memref<1x32xf32, #tpu.memory_space<vmem>>, %arg12: memref<32x64xf32, #tpu.memory_space<vmem>>, %arg13: memref<1x64xf32, #tpu.memory_space<vmem>>, %arg14: memref<64x32xf32, #tpu.memory_space<vmem>>, %arg15: memref<1x32xf32, #tpu.memory_space<vmem>>, %arg16: memref<4x8x32xf32, #tpu.memory_space<vmem>>) attributes {dimension_semantics = [#tpu.dimension_semantics<parallel>], iteration_bounds = array<i64: 2>, scalar_prefetch = 0 : i64, scratch_operands = 0 : i64, tpu.core_type = #tpu.core_type<tc>, window_params = [{transform_indices = @transform_0, window_bounds = array<i64: 4, 8, 16>}, {pipeline_mode = #tpu.pipeline_mode<synchronous>, transform_indices = @transform_1, window_bounds = array<i64: 1, 16>}, {pipeline_mode = #tpu.pipeline_mode<synchronous>, transform_indices = @transform_2, window_bounds = array<i64: 1, 16>}, {pipeline_mode = #tpu.pipeline_mode<synchronous>, transform_indices = @transform_3, window_bounds = array<i64: 16, 96>}, {pipeline_mode = #tpu.pipeline_mode<synchronous>, transform_indices = @transform_4, window_bounds = array<i64: 1, 96>}, {pipeline_mode = #tpu.pipeline_mode<synchronous>, transform_indices = @transform_5, window_bounds = array<i64: 32, 32>}, {pipeline_mode = #tpu.pipeline_mode<synchronous>, transform_indices = @transform_6, window_bounds = array<i64: 1, 32>}, {pipeline_mode = #tpu.pipeline_mode<synchronous>, transform_indices = @transform_7, window_bounds = array<i64: 16, 32>}, {pipeline_mode = #tpu.pipeline_mode<synchronous>, transform_indices = @transform_8, window_bounds = array<i64: 1, 32>}, {pipeline_mode = #tpu.pipeline_mode<synchronous>, transform_indices = @transform_9, window_bounds = array<i64: 1, 32>}, {pipeline_mode = #tpu.pipeline_mode<synchronous>, transform_indices = @transform_10, window_bounds = array<i64: 1, 32>}, {pipeline_mode = #tpu.pipeline_mode<synchronous>, transform_indices = @transform_11, window_bounds = array<i64: 32, 64>}, {pipeline_mode = #tpu.pipeline_mode<synchronous>, transform_indices = @transform_12, window_bounds = array<i64: 1, 64>}, {pipeline_mode = #tpu.pipeline_mode<synchronous>, transform_indices = @transform_13, window_bounds = array<i64: 64, 32>}, {pipeline_mode = #tpu.pipeline_mode<synchronous>, transform_indices = @transform_14, window_bounds = array<i64: 1, 32>}, {transform_indices = @transform_15, window_bounds = array<i64: 4, 8, 32>}]} {
    %c0 = arith.constant 0 : index
    %c0_0 = arith.constant 0 : index
    %c0_1 = arith.constant 0 : index
    %0 = vector.load %arg1[%c0, %c0_0, %c0_1] : memref<4x8x16xf32, #tpu.memory_space<vmem>>, vector<4x8x16xf32>
    %1 = vector.shape_cast %0 : vector<4x8x16xf32> to vector<32x16xf32>
    %cst = arith.constant dense<0.000000e+00> : vector<32xf32>
    %2 = vector.multi_reduction <add>, %1, %cst [1] : vector<32x16xf32> to vector<32xf32>
    %3 = vector.shape_cast %2 : vector<32xf32> to vector<32x1xf32>
    %cst_2 = arith.constant 1.600000e+01 : f32
    %4 = vector.broadcast %cst_2 : f32 to vector<32x1xf32>
    %5 = arith.divf %3, %4 : vector<32x1xf32>
    %6 = vector.broadcast %5 : vector<32x1xf32> to vector<32x16xf32>
    %7 = arith.subf %1, %6 : vector<32x16xf32>
    %8 = arith.mulf %7, %7 : vector<32x16xf32>
    %cst_3 = arith.constant dense<0.000000e+00> : vector<32xf32>
    %9 = vector.multi_reduction <add>, %8, %cst_3 [1] : vector<32x16xf32> to vector<32xf32>
    %10 = vector.shape_cast %9 : vector<32xf32> to vector<32x1xf32>
    %cst_4 = arith.constant 1.600000e+01 : f32
    %11 = vector.broadcast %cst_4 : f32 to vector<32x1xf32>
    %12 = arith.divf %10, %11 : vector<32x1xf32>
    %13 = math.sqrt %12 : vector<32x1xf32>
    %cst_5 = arith.constant 9.99999974E-6 : f32
    %14 = vector.broadcast %cst_5 : f32 to vector<32x1xf32>
    %15 = arith.addf %13, %14 : vector<32x1xf32>
    %16 = tpu.reciprocal %15 {approx = true} : vector<32x1xf32> -> vector<32x1xf32>
    %17 = vector.broadcast %5 : vector<32x1xf32> to vector<32x16xf32>
    %18 = arith.subf %1, %17 : vector<32x16xf32>
    %19 = vector.broadcast %16 : vector<32x1xf32> to vector<32x16xf32>
    %20 = arith.mulf %18, %19 : vector<32x16xf32>
    %c0_6 = arith.constant 0 : index
    %c0_7 = arith.constant 0 : index
    %21 = vector.load %arg2[%c0_6, %c0_7] : memref<1x16xf32, #tpu.memory_space<vmem>>, vector<1x16xf32>
    %22 = vector.broadcast %21 : vector<1x16xf32> to vector<32x16xf32>
    %23 = arith.mulf %20, %22 : vector<32x16xf32>
    %c0_8 = arith.constant 0 : index
    %c0_9 = arith.constant 0 : index
    %24 = vector.load %arg3[%c0_8, %c0_9] : memref<1x16xf32, #tpu.memory_space<vmem>>, vector<1x16xf32>
    %25 = vector.broadcast %24 : vector<1x16xf32> to vector<32x16xf32>
    %26 = arith.addf %23, %25 : vector<32x16xf32>
    %c0_10 = arith.constant 0 : index
    %c0_11 = arith.constant 0 : index
    %27 = vector.load %arg4[%c0_10, %c0_11] : memref<16x96xf32, #tpu.memory_space<vmem>>, vector<16x96xf32>
    %cst_12 = arith.constant dense<0.000000e+00> : vector<32x96xf32>
    %28 = tpu.matmul %26, %27, %cst_12 {dimension_numbers = #tpu.dot_dimension_numbers<[1], [0], [0], [1], [0, 0, 1, 1], [], []>} : vector<32x16xf32>, vector<16x96xf32>, vector<32x96xf32> -> vector<32x96xf32>
    %c0_13 = arith.constant 0 : index
    %c0_14 = arith.constant 0 : index
    %29 = vector.load %arg5[%c0_13, %c0_14] : memref<1x96xf32, #tpu.memory_space<vmem>>, vector<1x96xf32>
    %30 = vector.broadcast %29 : vector<1x96xf32> to vector<32x96xf32>
    %31 = arith.addf %28, %30 : vector<32x96xf32>
    %32 = vector.extract_strided_slice %31 {offsets = [0, 0], sizes = [32, 32], strides = [1, 1]} : vector<32x96xf32> to vector<32x32xf32>
    %33 = vector.shape_cast %32 : vector<32x32xf32> to vector<4x8x32xf32>
    %34 = vector.extract_strided_slice %31 {offsets = [0, 32], sizes = [32, 32], strides = [1, 1]} : vector<32x96xf32> to vector<32x32xf32>
    %35 = vector.shape_cast %34 : vector<32x32xf32> to vector<4x8x32xf32>
    %36 = vector.extract_strided_slice %31 {offsets = [0, 64], sizes = [32, 32], strides = [1, 1]} : vector<32x96xf32> to vector<32x32xf32>
    %37 = vector.shape_cast %36 : vector<32x32xf32> to vector<4x8x32xf32>
    %38 = tpu.iota {dimensions = array<i32: 0>} : vector<8x8xi32>
    %39 = tpu.iota {dimensions = array<i32: 1>} : vector<8x8xi32>
    %40 = arith.cmpi sle, %39, %38 : vector<8x8xi32>
    "tpu.trace_start"() <{level = 10 : i32, message = "bqd,bkd->bqk"}> : () -> ()
    %cst_15 = arith.constant dense<0.000000e+00> : vector<4x8x8xf32>
    %41 = tpu.matmul %33, %35, %cst_15 {dimension_numbers = #tpu.dot_dimension_numbers<[2], [2], [1], [1], [0, 0, 0, 1, 1, 1], [0], [0]>} : vector<4x8x32xf32>, vector<4x8x32xf32>, vector<4x8x8xf32> -> vector<4x8x8xf32>
    %cst_16 = arith.constant -1.000000e+30 : f32
    "tpu.trace_stop"() : () -> ()
    %42 = vector.shape_cast %40 : vector<8x8xi1> to vector<1x8x8xi1>
    %43 = vector.broadcast %42 : vector<1x8x8xi1> to vector<4x8x8xi1>
    %44 = vector.broadcast %cst_16 : f32 to vector<4x8x8xf32>
    %45 = arith.select %43, %41, %44 : vector<4x8x8xi1>, vector<4x8x8xf32>
    %cst_17 = arith.constant dense<0xFF800000> : vector<4x8xf32>
    %46 = vector.multi_reduction <maximumf>, %45, %cst_17 [2] : vector<4x8x8xf32> to vector<4x8xf32>
    %47 = vector.shape_cast %46 : vector<4x8xf32> to vector<4x8x1xf32>
    %48 = vector.broadcast %47 : vector<4x8x1xf32> to vector<4x8x8xf32>
    %49 = arith.subf %45, %48 : vector<4x8x8xf32>
    %50 = math.exp %49 : vector<4x8x8xf32>
    %cst_18 = arith.constant dense<0.000000e+00> : vector<4x8xf32>
    %51 = vector.multi_reduction <add>, %50, %cst_18 [2] : vector<4x8x8xf32> to vector<4x8xf32>
    %52 = vector.shape_cast %51 : vector<4x8xf32> to vector<4x8x1xf32>
    %53 = tpu.reciprocal %52 {approx = true} : vector<4x8x1xf32> -> vector<4x8x1xf32>
    %54 = vector.broadcast %53 : vector<4x8x1xf32> to vector<4x8x8xf32>
    %55 = arith.mulf %50, %54 : vector<4x8x8xf32>
    "tpu.trace_start"() <{level = 10 : i32, message = "bqk,bkd->bqd"}> : () -> ()
    %cst_19 = arith.constant dense<0.000000e+00> : vector<4x8x32xf32>
    %56 = tpu.matmul %55, %37, %cst_19 {dimension_numbers = #tpu.dot_dimension_numbers<[2], [1], [1], [2], [0, 0, 0, 1, 1, 2], [0], [0]>} : vector<4x8x8xf32>, vector<4x8x32xf32>, vector<4x8x32xf32> -> vector<4x8x32xf32>
    "tpu.trace_stop"() : () -> ()
    %57 = vector.shape_cast %56 : vector<4x8x32xf32> to vector<32x32xf32>
    %c0_20 = arith.constant 0 : index
    %c0_21 = arith.constant 0 : index
    %58 = vector.load %arg6[%c0_20, %c0_21] : memref<32x32xf32, #tpu.memory_space<vmem>>, vector<32x32xf32>
    %cst_22 = arith.constant dense<0.000000e+00> : vector<32x32xf32>
    %59 = tpu.matmul %57, %58, %cst_22 {dimension_numbers = #tpu.dot_dimension_numbers<[1], [0], [0], [1], [0, 0, 1, 1], [], []>} : vector<32x32xf32>, vector<32x32xf32>, vector<32x32xf32> -> vector<32x32xf32>
    %c0_23 = arith.constant 0 : index
    %c0_24 = arith.constant 0 : index
    %60 = vector.load %arg7[%c0_23, %c0_24] : memref<1x32xf32, #tpu.memory_space<vmem>>, vector<1x32xf32>
    %61 = vector.broadcast %60 : vector<1x32xf32> to vector<32x32xf32>
    %62 = arith.addf %59, %61 : vector<32x32xf32>
    %c0_25 = arith.constant 0 : index
    %c0_26 = arith.constant 0 : index
    %63 = vector.load %arg8[%c0_25, %c0_26] : memref<16x32xf32, #tpu.memory_space<vmem>>, vector<16x32xf32>
    %cst_27 = arith.constant dense<0.000000e+00> : vector<32x32xf32>
    %64 = tpu.matmul %1, %63, %cst_27 {dimension_numbers = #tpu.dot_dimension_numbers<[1], [0], [0], [1], [0, 0, 1, 1], [], []>} : vector<32x16xf32>, vector<16x32xf32>, vector<32x32xf32> -> vector<32x32xf32>
    %c0_28 = arith.constant 0 : index
    %c0_29 = arith.constant 0 : index
    %65 = vector.load %arg9[%c0_28, %c0_29] : memref<1x32xf32, #tpu.memory_space<vmem>>, vector<1x32xf32>
    %66 = vector.broadcast %65 : vector<1x32xf32> to vector<32x32xf32>
    %67 = arith.addf %64, %66 : vector<32x32xf32>
    %68 = arith.addf %67, %62 : vector<32x32xf32>
    %cst_30 = arith.constant dense<0.000000e+00> : vector<32xf32>
    %69 = vector.multi_reduction <add>, %68, %cst_30 [1] : vector<32x32xf32> to vector<32xf32>
    %70 = vector.shape_cast %69 : vector<32xf32> to vector<32x1xf32>
    %cst_31 = arith.constant 3.200000e+01 : f32
    %71 = vector.broadcast %cst_31 : f32 to vector<32x1xf32>
    %72 = arith.divf %70, %71 : vector<32x1xf32>
    %73 = vector.broadcast %72 : vector<32x1xf32> to vector<32x32xf32>
    %74 = arith.subf %68, %73 : vector<32x32xf32>
    %75 = arith.mulf %74, %74 : vector<32x32xf32>
    %cst_32 = arith.constant dense<0.000000e+00> : vector<32xf32>
    %76 = vector.multi_reduction <add>, %75, %cst_32 [1] : vector<32x32xf32> to vector<32xf32>
    %77 = vector.shape_cast %76 : vector<32xf32> to vector<32x1xf32>
    %cst_33 = arith.constant 3.200000e+01 : f32
    %78 = vector.broadcast %cst_33 : f32 to vector<32x1xf32>
    %79 = arith.divf %77, %78 : vector<32x1xf32>
    %80 = math.sqrt %79 : vector<32x1xf32>
    %cst_34 = arith.constant 9.99999974E-6 : f32
    %81 = vector.broadcast %cst_34 : f32 to vector<32x1xf32>
    %82 = arith.addf %80, %81 : vector<32x1xf32>
    %83 = tpu.reciprocal %82 {approx = true} : vector<32x1xf32> -> vector<32x1xf32>
    %84 = vector.broadcast %72 : vector<32x1xf32> to vector<32x32xf32>
    %85 = arith.subf %68, %84 : vector<32x32xf32>
    %86 = vector.broadcast %83 : vector<32x1xf32> to vector<32x32xf32>
    %87 = arith.mulf %85, %86 : vector<32x32xf32>
    %c0_35 = arith.constant 0 : index
    %c0_36 = arith.constant 0 : index
    %88 = vector.load %arg10[%c0_35, %c0_36] : memref<1x32xf32, #tpu.memory_space<vmem>>, vector<1x32xf32>
    %89 = vector.broadcast %88 : vector<1x32xf32> to vector<32x32xf32>
    %90 = arith.mulf %87, %89 : vector<32x32xf32>
    %c0_37 = arith.constant 0 : index
    %c0_38 = arith.constant 0 : index
    %91 = vector.load %arg11[%c0_37, %c0_38] : memref<1x32xf32, #tpu.memory_space<vmem>>, vector<1x32xf32>
    %92 = vector.broadcast %91 : vector<1x32xf32> to vector<32x32xf32>
    %93 = arith.addf %90, %92 : vector<32x32xf32>
    %c0_39 = arith.constant 0 : index
    %c0_40 = arith.constant 0 : index
    %94 = vector.load %arg12[%c0_39, %c0_40] : memref<32x64xf32, #tpu.memory_space<vmem>>, vector<32x64xf32>
    %cst_41 = arith.constant dense<0.000000e+00> : vector<32x64xf32>
    %95 = tpu.matmul %93, %94, %cst_41 {dimension_numbers = #tpu.dot_dimension_numbers<[1], [0], [0], [1], [0, 0, 1, 1], [], []>} : vector<32x32xf32>, vector<32x64xf32>, vector<32x64xf32> -> vector<32x64xf32>
    %c0_42 = arith.constant 0 : index
    %c0_43 = arith.constant 0 : index
    %96 = vector.load %arg13[%c0_42, %c0_43] : memref<1x64xf32, #tpu.memory_space<vmem>>, vector<1x64xf32>
    %97 = vector.broadcast %96 : vector<1x64xf32> to vector<32x64xf32>
    %98 = arith.addf %95, %97 : vector<32x64xf32>
    %cst_44 = arith.constant 0.000000e+00 : f32
    %99 = vector.broadcast %cst_44 : f32 to vector<32x64xf32>
    %100 = arith.cmpf ogt, %98, %99 : vector<32x64xf32>
    %cst_45 = arith.constant 0.000000e+00 : f32
    %101 = vector.broadcast %cst_45 : f32 to vector<32x64xf32>
    %102 = arith.minimumf %98, %101 : vector<32x64xf32>
    %103 = math.exp %102 : vector<32x64xf32>
    %cst_46 = arith.constant 1.000000e+00 : f32
    %104 = vector.broadcast %cst_46 : f32 to vector<32x64xf32>
    %105 = arith.subf %103, %104 : vector<32x64xf32>
    %106 = arith.select %100, %98, %105 : vector<32x64xi1>, vector<32x64xf32>
    %c0_47 = arith.constant 0 : index
    %c0_48 = arith.constant 0 : index
    %107 = vector.load %arg14[%c0_47, %c0_48] : memref<64x32xf32, #tpu.memory_space<vmem>>, vector<64x32xf32>
    %cst_49 = arith.constant dense<0.000000e+00> : vector<32x32xf32>
    %108 = tpu.matmul %106, %107, %cst_49 {dimension_numbers = #tpu.dot_dimension_numbers<[1], [0], [0], [1], [0, 0, 1, 1], [], []>} : vector<32x64xf32>, vector<64x32xf32>, vector<32x32xf32> -> vector<32x32xf32>
    %c0_50 = arith.constant 0 : index
    %c0_51 = arith.constant 0 : index
    %109 = vector.load %arg15[%c0_50, %c0_51] : memref<1x32xf32, #tpu.memory_space<vmem>>, vector<1x32xf32>
    %110 = vector.broadcast %109 : vector<1x32xf32> to vector<32x32xf32>
    %111 = arith.addf %108, %110 : vector<32x32xf32>
    %112 = arith.addf %68, %111 : vector<32x32xf32>
    %113 = vector.shape_cast %112 : vector<32x32xf32> to vector<4x8x32xf32>
    %c0_52 = arith.constant 0 : index
    %c0_53 = arith.constant 0 : index
    %c0_54 = arith.constant 0 : index
    %114 = vector.load %arg16[%c0_52, %c0_53, %c0_54] : memref<4x8x32xf32, #tpu.memory_space<vmem>>, vector<4x8x32xf32>
    tpu.vector_store %arg16[%c0_52, %c0_53, %c0_54], %113 {strides = array<i32>} : memref<4x8x32xf32, #tpu.memory_space<vmem>>, vector<4x8x32xf32>,
    return
  }
  func.func @transform_0(%arg0: i32) -> (i32, i32, i32) {
    %c0_i32 = arith.constant 0 : i32
    %c0_i32_0 = arith.constant 0 : i32
    %c0_i32_1 = arith.constant 0 : i32
    return %arg0, %c0_i32, %c0_i32_0 : i32, i32, i32
  }
  func.func @transform_1(%arg0: i32) -> (i32, i32) {
    %c0_i32 = arith.constant 0 : i32
    %c0_i32_0 = arith.constant 0 : i32
    %c0_i32_1 = arith.constant 0 : i32
    return %c0_i32, %c0_i32_0 : i32, i32
  }
  func.func @transform_2(%arg0: i32) -> (i32, i32) {
    %c0_i32 = arith.constant 0 : i32
    %c0_i32_0 = arith.constant 0 : i32
    %c0_i32_1 = arith.constant 0 : i32
    return %c0_i32, %c0_i32_0 : i32, i32
  }
  func.func @transform_3(%arg0: i32) -> (i32, i32) {
    %c0_i32 = arith.constant 0 : i32
    %c0_i32_0 = arith.constant 0 : i32
    %c0_i32_1 = arith.constant 0 : i32
    return %c0_i32, %c0_i32_0 : i32, i32
  }
  func.func @transform_4(%arg0: i32) -> (i32, i32) {
    %c0_i32 = arith.constant 0 : i32
    %c0_i32_0 = arith.constant 0 : i32
    %c0_i32_1 = arith.constant 0 : i32
    return %c0_i32, %c0_i32_0 : i32, i32
  }
  func.func @transform_5(%arg0: i32) -> (i32, i32) {
    %c0_i32 = arith.constant 0 : i32
    %c0_i32_0 = arith.constant 0 : i32
    %c0_i32_1 = arith.constant 0 : i32
    return %c0_i32, %c0_i32_0 : i32, i32
  }
  func.func @transform_6(%arg0: i32) -> (i32, i32) {
    %c0_i32 = arith.constant 0 : i32
    %c0_i32_0 = arith.constant 0 : i32
    %c0_i32_1 = arith.constant 0 : i32
    return %c0_i32, %c0_i32_0 : i32, i32
  }
  func.func @transform_7(%arg0: i32) -> (i32, i32) {
    %c0_i32 = arith.constant 0 : i32
    %c0_i32_0 = arith.constant 0 : i32
    %c0_i32_1 = arith.constant 0 : i32
    return %c0_i32, %c0_i32_0 : i32, i32
  }
  func.func @transform_8(%arg0: i32) -> (i32, i32) {
    %c0_i32 = arith.constant 0 : i32
    %c0_i32_0 = arith.constant 0 : i32
    %c0_i32_1 = arith.constant 0 : i32
    return %c0_i32, %c0_i32_0 : i32, i32
  }
  func.func @transform_9(%arg0: i32) -> (i32, i32) {
    %c0_i32 = arith.constant 0 : i32
    %c0_i32_0 = arith.constant 0 : i32
    %c0_i32_1 = arith.constant 0 : i32
    return %c0_i32, %c0_i32_0 : i32, i32
  }
  func.func @transform_10(%arg0: i32) -> (i32, i32) {
    %c0_i32 = arith.constant 0 : i32
    %c0_i32_0 = arith.constant 0 : i32
    %c0_i32_1 = arith.constant 0 : i32
    return %c0_i32, %c0_i32_0 : i32, i32
  }
  func.func @transform_11(%arg0: i32) -> (i32, i32) {
    %c0_i32 = arith.constant 0 : i32
    %c0_i32_0 = arith.constant 0 : i32
    %c0_i32_1 = arith.constant 0 : i32
    return %c0_i32, %c0_i32_0 : i32, i32
  }
  func.func @transform_12(%arg0: i32) -> (i32, i32) {
    %c0_i32 = arith.constant 0 : i32
    %c0_i32_0 = arith.constant 0 : i32
    %c0_i32_1 = arith.constant 0 : i32
    return %c0_i32, %c0_i32_0 : i32, i32
  }
  func.func @transform_13(%arg0: i32) -> (i32, i32) {
    %c0_i32 = arith.constant 0 : i32
    %c0_i32_0 = arith.constant 0 : i32
    %c0_i32_1 = arith.constant 0 : i32
    return %c0_i32, %c0_i32_0 : i32, i32
  }
  func.func @transform_14(%arg0: i32) -> (i32, i32) {
    %c0_i32 = arith.constant 0 : i32
    %c0_i32_0 = arith.constant 0 : i32
    %c0_i32_1 = arith.constant 0 : i32
    return %c0_i32, %c0_i32_0 : i32, i32
  }
  func.func @transform_15(%arg0: i32) -> (i32, i32, i32) {
    %c0_i32 = arith.constant 0 : i32
    %c0_i32_0 = arith.constant 0 : i32
    %c0_i32_1 = arith.constant 0 : i32
    return %arg0, %c0_i32, %c0_i32_0 : i32, i32, i32
  }
}

module attributes {stable_mosaic.version = 11 : i64} {
  func.func @_transformer_layer_kernel(%arg0: i32, %arg1: memref<4x8x32xf32, #tpu.memory_space<vmem>>, %arg2: memref<1x32xf32, #tpu.memory_space<vmem>>, %arg3: memref<1x32xf32, #tpu.memory_space<vmem>>, %arg4: memref<32x96xf32, #tpu.memory_space<vmem>>, %arg5: memref<1x96xf32, #tpu.memory_space<vmem>>, %arg6: memref<32x32xf32, #tpu.memory_space<vmem>>, %arg7: memref<1x32xf32, #tpu.memory_space<vmem>>, %arg8: memref<1x32xf32, #tpu.memory_space<vmem>>, %arg9: memref<1x32xf32, #tpu.memory_space<vmem>>, %arg10: memref<32x64xf32, #tpu.memory_space<vmem>>, %arg11: memref<1x64xf32, #tpu.memory_space<vmem>>, %arg12: memref<64x32xf32, #tpu.memory_space<vmem>>, %arg13: memref<1x32xf32, #tpu.memory_space<vmem>>, %arg14: memref<32x128xf32, #tpu.memory_space<vmem>>, %arg15: memref<1x128xf32, #tpu.memory_space<vmem>>, %arg16: memref<4x8x128xf32, #tpu.memory_space<vmem>>) attributes {dimension_semantics = [#tpu.dimension_semantics<parallel>], iteration_bounds = array<i64: 2>, scalar_prefetch = 0 : i64, scratch_operands = 0 : i64, tpu.core_type = #tpu.core_type<tc>, window_params = [{transform_indices = @transform_0, window_bounds = array<i64: 4, 8, 32>}, {pipeline_mode = #tpu.pipeline_mode<synchronous>, transform_indices = @transform_1, window_bounds = array<i64: 1, 32>}, {pipeline_mode = #tpu.pipeline_mode<synchronous>, transform_indices = @transform_2, window_bounds = array<i64: 1, 32>}, {pipeline_mode = #tpu.pipeline_mode<synchronous>, transform_indices = @transform_3, window_bounds = array<i64: 32, 96>}, {pipeline_mode = #tpu.pipeline_mode<synchronous>, transform_indices = @transform_4, window_bounds = array<i64: 1, 96>}, {pipeline_mode = #tpu.pipeline_mode<synchronous>, transform_indices = @transform_5, window_bounds = array<i64: 32, 32>}, {pipeline_mode = #tpu.pipeline_mode<synchronous>, transform_indices = @transform_6, window_bounds = array<i64: 1, 32>}, {pipeline_mode = #tpu.pipeline_mode<synchronous>, transform_indices = @transform_7, window_bounds = array<i64: 1, 32>}, {pipeline_mode = #tpu.pipeline_mode<synchronous>, transform_indices = @transform_8, window_bounds = array<i64: 1, 32>}, {pipeline_mode = #tpu.pipeline_mode<synchronous>, transform_indices = @transform_9, window_bounds = array<i64: 32, 64>}, {pipeline_mode = #tpu.pipeline_mode<synchronous>, transform_indices = @transform_10, window_bounds = array<i64: 1, 64>}, {pipeline_mode = #tpu.pipeline_mode<synchronous>, transform_indices = @transform_11, window_bounds = array<i64: 64, 32>}, {pipeline_mode = #tpu.pipeline_mode<synchronous>, transform_indices = @transform_12, window_bounds = array<i64: 1, 32>}, {pipeline_mode = #tpu.pipeline_mode<synchronous>, transform_indices = @transform_13, window_bounds = array<i64: 32, 128>}, {pipeline_mode = #tpu.pipeline_mode<synchronous>, transform_indices = @transform_14, window_bounds = array<i64: 1, 128>}, {transform_indices = @transform_15, window_bounds = array<i64: 4, 8, 128>}]} {
    %c0 = arith.constant 0 : index
    %c0_0 = arith.constant 0 : index
    %c0_1 = arith.constant 0 : index
    %0 = vector.load %arg1[%c0, %c0_0, %c0_1] : memref<4x8x32xf32, #tpu.memory_space<vmem>>, vector<4x8x32xf32>
    %1 = vector.shape_cast %0 : vector<4x8x32xf32> to vector<32x32xf32>
    %cst = arith.constant dense<0.000000e+00> : vector<32xf32>
    %2 = vector.multi_reduction <add>, %1, %cst [1] : vector<32x32xf32> to vector<32xf32>
    %3 = vector.shape_cast %2 : vector<32xf32> to vector<32x1xf32>
    %cst_2 = arith.constant 3.200000e+01 : f32
    %4 = vector.broadcast %cst_2 : f32 to vector<32x1xf32>
    %5 = arith.divf %3, %4 : vector<32x1xf32>
    %6 = vector.broadcast %5 : vector<32x1xf32> to vector<32x32xf32>
    %7 = arith.subf %1, %6 : vector<32x32xf32>
    %8 = arith.mulf %7, %7 : vector<32x32xf32>
    %cst_3 = arith.constant dense<0.000000e+00> : vector<32xf32>
    %9 = vector.multi_reduction <add>, %8, %cst_3 [1] : vector<32x32xf32> to vector<32xf32>
    %10 = vector.shape_cast %9 : vector<32xf32> to vector<32x1xf32>
    %cst_4 = arith.constant 3.200000e+01 : f32
    %11 = vector.broadcast %cst_4 : f32 to vector<32x1xf32>
    %12 = arith.divf %10, %11 : vector<32x1xf32>
    %13 = math.sqrt %12 : vector<32x1xf32>
    %cst_5 = arith.constant 9.99999974E-6 : f32
    %14 = vector.broadcast %cst_5 : f32 to vector<32x1xf32>
    %15 = arith.addf %13, %14 : vector<32x1xf32>
    %16 = tpu.reciprocal %15 {approx = true} : vector<32x1xf32> -> vector<32x1xf32>
    %17 = vector.broadcast %5 : vector<32x1xf32> to vector<32x32xf32>
    %18 = arith.subf %1, %17 : vector<32x32xf32>
    %19 = vector.broadcast %16 : vector<32x1xf32> to vector<32x32xf32>
    %20 = arith.mulf %18, %19 : vector<32x32xf32>
    %c0_6 = arith.constant 0 : index
    %c0_7 = arith.constant 0 : index
    %21 = vector.load %arg2[%c0_6, %c0_7] : memref<1x32xf32, #tpu.memory_space<vmem>>, vector<1x32xf32>
    %22 = vector.broadcast %21 : vector<1x32xf32> to vector<32x32xf32>
    %23 = arith.mulf %20, %22 : vector<32x32xf32>
    %c0_8 = arith.constant 0 : index
    %c0_9 = arith.constant 0 : index
    %24 = vector.load %arg3[%c0_8, %c0_9] : memref<1x32xf32, #tpu.memory_space<vmem>>, vector<1x32xf32>
    %25 = vector.broadcast %24 : vector<1x32xf32> to vector<32x32xf32>
    %26 = arith.addf %23, %25 : vector<32x32xf32>
    %c0_10 = arith.constant 0 : index
    %c0_11 = arith.constant 0 : index
    %27 = vector.load %arg4[%c0_10, %c0_11] : memref<32x96xf32, #tpu.memory_space<vmem>>, vector<32x96xf32>
    %cst_12 = arith.constant dense<0.000000e+00> : vector<32x96xf32>
    %28 = tpu.matmul %26, %27, %cst_12 {dimension_numbers = #tpu.dot_dimension_numbers<[1], [0], [0], [1], [0, 0, 1, 1], [], []>} : vector<32x32xf32>, vector<32x96xf32>, vector<32x96xf32> -> vector<32x96xf32>
    %c0_13 = arith.constant 0 : index
    %c0_14 = arith.constant 0 : index
    %29 = vector.load %arg5[%c0_13, %c0_14] : memref<1x96xf32, #tpu.memory_space<vmem>>, vector<1x96xf32>
    %30 = vector.broadcast %29 : vector<1x96xf32> to vector<32x96xf32>
    %31 = arith.addf %28, %30 : vector<32x96xf32>
    %32 = vector.extract_strided_slice %31 {offsets = [0, 0], sizes = [32, 32], strides = [1, 1]} : vector<32x96xf32> to vector<32x32xf32>
    %33 = vector.shape_cast %32 : vector<32x32xf32> to vector<4x8x32xf32>
    %34 = vector.extract_strided_slice %31 {offsets = [0, 32], sizes = [32, 32], strides = [1, 1]} : vector<32x96xf32> to vector<32x32xf32>
    %35 = vector.shape_cast %34 : vector<32x32xf32> to vector<4x8x32xf32>
    %36 = vector.extract_strided_slice %31 {offsets = [0, 64], sizes = [32, 32], strides = [1, 1]} : vector<32x96xf32> to vector<32x32xf32>
    %37 = vector.shape_cast %36 : vector<32x32xf32> to vector<4x8x32xf32>
    %38 = tpu.iota {dimensions = array<i32: 0>} : vector<8x8xi32>
    %39 = tpu.iota {dimensions = array<i32: 1>} : vector<8x8xi32>
    %40 = arith.cmpi sle, %39, %38 : vector<8x8xi32>
    "tpu.trace_start"() <{level = 10 : i32, message = "bqd,bkd->bqk"}> : () -> ()
    %cst_15 = arith.constant dense<0.000000e+00> : vector<4x8x8xf32>
    %41 = tpu.matmul %33, %35, %cst_15 {dimension_numbers = #tpu.dot_dimension_numbers<[2], [2], [1], [1], [0, 0, 0, 1, 1, 1], [0], [0]>} : vector<4x8x32xf32>, vector<4x8x32xf32>, vector<4x8x8xf32> -> vector<4x8x8xf32>
    %cst_16 = arith.constant -1.000000e+30 : f32
    "tpu.trace_stop"() : () -> ()
    %42 = vector.shape_cast %40 : vector<8x8xi1> to vector<1x8x8xi1>
    %43 = vector.broadcast %42 : vector<1x8x8xi1> to vector<4x8x8xi1>
    %44 = vector.broadcast %cst_16 : f32 to vector<4x8x8xf32>
    %45 = arith.select %43, %41, %44 : vector<4x8x8xi1>, vector<4x8x8xf32>
    %cst_17 = arith.constant dense<0xFF800000> : vector<4x8xf32>
    %46 = vector.multi_reduction <maximumf>, %45, %cst_17 [2] : vector<4x8x8xf32> to vector<4x8xf32>
    %47 = vector.shape_cast %46 : vector<4x8xf32> to vector<4x8x1xf32>
    %48 = vector.broadcast %47 : vector<4x8x1xf32> to vector<4x8x8xf32>
    %49 = arith.subf %45, %48 : vector<4x8x8xf32>
    %50 = math.exp %49 : vector<4x8x8xf32>
    %cst_18 = arith.constant dense<0.000000e+00> : vector<4x8xf32>
    %51 = vector.multi_reduction <add>, %50, %cst_18 [2] : vector<4x8x8xf32> to vector<4x8xf32>
    %52 = vector.shape_cast %51 : vector<4x8xf32> to vector<4x8x1xf32>
    %53 = tpu.reciprocal %52 {approx = true} : vector<4x8x1xf32> -> vector<4x8x1xf32>
    %54 = vector.broadcast %53 : vector<4x8x1xf32> to vector<4x8x8xf32>
    %55 = arith.mulf %50, %54 : vector<4x8x8xf32>
    "tpu.trace_start"() <{level = 10 : i32, message = "bqk,bkd->bqd"}> : () -> ()
    %cst_19 = arith.constant dense<0.000000e+00> : vector<4x8x32xf32>
    %56 = tpu.matmul %55, %37, %cst_19 {dimension_numbers = #tpu.dot_dimension_numbers<[2], [1], [1], [2], [0, 0, 0, 1, 1, 2], [0], [0]>} : vector<4x8x8xf32>, vector<4x8x32xf32>, vector<4x8x32xf32> -> vector<4x8x32xf32>
    "tpu.trace_stop"() : () -> ()
    %57 = vector.shape_cast %56 : vector<4x8x32xf32> to vector<32x32xf32>
    %c0_20 = arith.constant 0 : index
    %c0_21 = arith.constant 0 : index
    %58 = vector.load %arg6[%c0_20, %c0_21] : memref<32x32xf32, #tpu.memory_space<vmem>>, vector<32x32xf32>
    %cst_22 = arith.constant dense<0.000000e+00> : vector<32x32xf32>
    %59 = tpu.matmul %57, %58, %cst_22 {dimension_numbers = #tpu.dot_dimension_numbers<[1], [0], [0], [1], [0, 0, 1, 1], [], []>} : vector<32x32xf32>, vector<32x32xf32>, vector<32x32xf32> -> vector<32x32xf32>
    %c0_23 = arith.constant 0 : index
    %c0_24 = arith.constant 0 : index
    %60 = vector.load %arg7[%c0_23, %c0_24] : memref<1x32xf32, #tpu.memory_space<vmem>>, vector<1x32xf32>
    %61 = vector.broadcast %60 : vector<1x32xf32> to vector<32x32xf32>
    %62 = arith.addf %59, %61 : vector<32x32xf32>
    %63 = arith.addf %1, %62 : vector<32x32xf32>
    %cst_25 = arith.constant dense<0.000000e+00> : vector<32xf32>
    %64 = vector.multi_reduction <add>, %63, %cst_25 [1] : vector<32x32xf32> to vector<32xf32>
    %65 = vector.shape_cast %64 : vector<32xf32> to vector<32x1xf32>
    %cst_26 = arith.constant 3.200000e+01 : f32
    %66 = vector.broadcast %cst_26 : f32 to vector<32x1xf32>
    %67 = arith.divf %65, %66 : vector<32x1xf32>
    %68 = vector.broadcast %67 : vector<32x1xf32> to vector<32x32xf32>
    %69 = arith.subf %63, %68 : vector<32x32xf32>
    %70 = arith.mulf %69, %69 : vector<32x32xf32>
    %cst_27 = arith.constant dense<0.000000e+00> : vector<32xf32>
    %71 = vector.multi_reduction <add>, %70, %cst_27 [1] : vector<32x32xf32> to vector<32xf32>
    %72 = vector.shape_cast %71 : vector<32xf32> to vector<32x1xf32>
    %cst_28 = arith.constant 3.200000e+01 : f32
    %73 = vector.broadcast %cst_28 : f32 to vector<32x1xf32>
    %74 = arith.divf %72, %73 : vector<32x1xf32>
    %75 = math.sqrt %74 : vector<32x1xf32>
    %cst_29 = arith.constant 9.99999974E-6 : f32
    %76 = vector.broadcast %cst_29 : f32 to vector<32x1xf32>
    %77 = arith.addf %75, %76 : vector<32x1xf32>
    %78 = tpu.reciprocal %77 {approx = true} : vector<32x1xf32> -> vector<32x1xf32>
    %79 = vector.broadcast %67 : vector<32x1xf32> to vector<32x32xf32>
    %80 = arith.subf %63, %79 : vector<32x32xf32>
    %81 = vector.broadcast %78 : vector<32x1xf32> to vector<32x32xf32>
    %82 = arith.mulf %80, %81 : vector<32x32xf32>
    %c0_30 = arith.constant 0 : index
    %c0_31 = arith.constant 0 : index
    %83 = vector.load %arg8[%c0_30, %c0_31] : memref<1x32xf32, #tpu.memory_space<vmem>>, vector<1x32xf32>
    %84 = vector.broadcast %83 : vector<1x32xf32> to vector<32x32xf32>
    %85 = arith.mulf %82, %84 : vector<32x32xf32>
    %c0_32 = arith.constant 0 : index
    %c0_33 = arith.constant 0 : index
    %86 = vector.load %arg9[%c0_32, %c0_33] : memref<1x32xf32, #tpu.memory_space<vmem>>, vector<1x32xf32>
    %87 = vector.broadcast %86 : vector<1x32xf32> to vector<32x32xf32>
    %88 = arith.addf %85, %87 : vector<32x32xf32>
    %c0_34 = arith.constant 0 : index
    %c0_35 = arith.constant 0 : index
    %89 = vector.load %arg10[%c0_34, %c0_35] : memref<32x64xf32, #tpu.memory_space<vmem>>, vector<32x64xf32>
    %cst_36 = arith.constant dense<0.000000e+00> : vector<32x64xf32>
    %90 = tpu.matmul %88, %89, %cst_36 {dimension_numbers = #tpu.dot_dimension_numbers<[1], [0], [0], [1], [0, 0, 1, 1], [], []>} : vector<32x32xf32>, vector<32x64xf32>, vector<32x64xf32> -> vector<32x64xf32>
    %c0_37 = arith.constant 0 : index
    %c0_38 = arith.constant 0 : index
    %91 = vector.load %arg11[%c0_37, %c0_38] : memref<1x64xf32, #tpu.memory_space<vmem>>, vector<1x64xf32>
    %92 = vector.broadcast %91 : vector<1x64xf32> to vector<32x64xf32>
    %93 = arith.addf %90, %92 : vector<32x64xf32>
    %cst_39 = arith.constant 0.000000e+00 : f32
    %94 = vector.broadcast %cst_39 : f32 to vector<32x64xf32>
    %95 = arith.cmpf ogt, %93, %94 : vector<32x64xf32>
    %cst_40 = arith.constant 0.000000e+00 : f32
    %96 = vector.broadcast %cst_40 : f32 to vector<32x64xf32>
    %97 = arith.minimumf %93, %96 : vector<32x64xf32>
    %98 = math.exp %97 : vector<32x64xf32>
    %cst_41 = arith.constant 1.000000e+00 : f32
    %99 = vector.broadcast %cst_41 : f32 to vector<32x64xf32>
    %100 = arith.subf %98, %99 : vector<32x64xf32>
    %101 = arith.select %95, %93, %100 : vector<32x64xi1>, vector<32x64xf32>
    %c0_42 = arith.constant 0 : index
    %c0_43 = arith.constant 0 : index
    %102 = vector.load %arg12[%c0_42, %c0_43] : memref<64x32xf32, #tpu.memory_space<vmem>>, vector<64x32xf32>
    %cst_44 = arith.constant dense<0.000000e+00> : vector<32x32xf32>
    %103 = tpu.matmul %101, %102, %cst_44 {dimension_numbers = #tpu.dot_dimension_numbers<[1], [0], [0], [1], [0, 0, 1, 1], [], []>} : vector<32x64xf32>, vector<64x32xf32>, vector<32x32xf32> -> vector<32x32xf32>
    %c0_45 = arith.constant 0 : index
    %c0_46 = arith.constant 0 : index
    %104 = vector.load %arg13[%c0_45, %c0_46] : memref<1x32xf32, #tpu.memory_space<vmem>>, vector<1x32xf32>
    %105 = vector.broadcast %104 : vector<1x32xf32> to vector<32x32xf32>
    %106 = arith.addf %103, %105 : vector<32x32xf32>
    %107 = arith.addf %63, %106 : vector<32x32xf32>
    %c0_47 = arith.constant 0 : index
    %c0_48 = arith.constant 0 : index
    %108 = vector.load %arg14[%c0_47, %c0_48] : memref<32x128xf32, #tpu.memory_space<vmem>>, vector<32x128xf32>
    %cst_49 = arith.constant dense<0.000000e+00> : vector<32x128xf32>
    %109 = tpu.matmul %107, %108, %cst_49 {dimension_numbers = #tpu.dot_dimension_numbers<[1], [0], [0], [1], [0, 0, 1, 1], [], []>} : vector<32x32xf32>, vector<32x128xf32>, vector<32x128xf32> -> vector<32x128xf32>
    %c0_50 = arith.constant 0 : index
    %c0_51 = arith.constant 0 : index
    %110 = vector.load %arg15[%c0_50, %c0_51] : memref<1x128xf32, #tpu.memory_space<vmem>>, vector<1x128xf32>
    %111 = vector.broadcast %110 : vector<1x128xf32> to vector<32x128xf32>
    %112 = arith.addf %109, %111 : vector<32x128xf32>
    %113 = vector.shape_cast %112 : vector<32x128xf32> to vector<4x8x128xf32>
    %c0_52 = arith.constant 0 : index
    %c0_53 = arith.constant 0 : index
    %c0_54 = arith.constant 0 : index
    %114 = vector.load %arg16[%c0_52, %c0_53, %c0_54] : memref<4x8x128xf32, #tpu.memory_space<vmem>>, vector<4x8x128xf32>
    tpu.vector_store %arg16[%c0_52, %c0_53, %c0_54], %113 {strides = array<i32>} : memref<4x8x128xf32, #tpu.memory_space<vmem>>, vector<4x8x128xf32>,
    return
  }
  func.func @transform_0(%arg0: i32) -> (i32, i32, i32) {
    %c0_i32 = arith.constant 0 : i32
    %c0_i32_0 = arith.constant 0 : i32
    %c0_i32_1 = arith.constant 0 : i32
    return %arg0, %c0_i32, %c0_i32_0 : i32, i32, i32
  }
  func.func @transform_1(%arg0: i32) -> (i32, i32) {
    %c0_i32 = arith.constant 0 : i32
    %c0_i32_0 = arith.constant 0 : i32
    %c0_i32_1 = arith.constant 0 : i32
    return %c0_i32, %c0_i32_0 : i32, i32
  }
  func.func @transform_2(%arg0: i32) -> (i32, i32) {
    %c0_i32 = arith.constant 0 : i32
    %c0_i32_0 = arith.constant 0 : i32
    %c0_i32_1 = arith.constant 0 : i32
    return %c0_i32, %c0_i32_0 : i32, i32
  }
  func.func @transform_3(%arg0: i32) -> (i32, i32) {
    %c0_i32 = arith.constant 0 : i32
    %c0_i32_0 = arith.constant 0 : i32
    %c0_i32_1 = arith.constant 0 : i32
    return %c0_i32, %c0_i32_0 : i32, i32
  }
  func.func @transform_4(%arg0: i32) -> (i32, i32) {
    %c0_i32 = arith.constant 0 : i32
    %c0_i32_0 = arith.constant 0 : i32
    %c0_i32_1 = arith.constant 0 : i32
    return %c0_i32, %c0_i32_0 : i32, i32
  }
  func.func @transform_5(%arg0: i32) -> (i32, i32) {
    %c0_i32 = arith.constant 0 : i32
    %c0_i32_0 = arith.constant 0 : i32
    %c0_i32_1 = arith.constant 0 : i32
    return %c0_i32, %c0_i32_0 : i32, i32
  }
  func.func @transform_6(%arg0: i32) -> (i32, i32) {
    %c0_i32 = arith.constant 0 : i32
    %c0_i32_0 = arith.constant 0 : i32
    %c0_i32_1 = arith.constant 0 : i32
    return %c0_i32, %c0_i32_0 : i32, i32
  }
  func.func @transform_7(%arg0: i32) -> (i32, i32) {
    %c0_i32 = arith.constant 0 : i32
    %c0_i32_0 = arith.constant 0 : i32
    %c0_i32_1 = arith.constant 0 : i32
    return %c0_i32, %c0_i32_0 : i32, i32
  }
  func.func @transform_8(%arg0: i32) -> (i32, i32) {
    %c0_i32 = arith.constant 0 : i32
    %c0_i32_0 = arith.constant 0 : i32
    %c0_i32_1 = arith.constant 0 : i32
    return %c0_i32, %c0_i32_0 : i32, i32
  }
  func.func @transform_9(%arg0: i32) -> (i32, i32) {
    %c0_i32 = arith.constant 0 : i32
    %c0_i32_0 = arith.constant 0 : i32
    %c0_i32_1 = arith.constant 0 : i32
    return %c0_i32, %c0_i32_0 : i32, i32
  }
  func.func @transform_10(%arg0: i32) -> (i32, i32) {
    %c0_i32 = arith.constant 0 : i32
    %c0_i32_0 = arith.constant 0 : i32
    %c0_i32_1 = arith.constant 0 : i32
    return %c0_i32, %c0_i32_0 : i32, i32
  }
  func.func @transform_11(%arg0: i32) -> (i32, i32) {
    %c0_i32 = arith.constant 0 : i32
    %c0_i32_0 = arith.constant 0 : i32
    %c0_i32_1 = arith.constant 0 : i32
    return %c0_i32, %c0_i32_0 : i32, i32
  }
  func.func @transform_12(%arg0: i32) -> (i32, i32) {
    %c0_i32 = arith.constant 0 : i32
    %c0_i32_0 = arith.constant 0 : i32
    %c0_i32_1 = arith.constant 0 : i32
    return %c0_i32, %c0_i32_0 : i32, i32
  }
  func.func @transform_13(%arg0: i32) -> (i32, i32) {
    %c0_i32 = arith.constant 0 : i32
    %c0_i32_0 = arith.constant 0 : i32
    %c0_i32_1 = arith.constant 0 : i32
    return %c0_i32, %c0_i32_0 : i32, i32
  }
  func.func @transform_14(%arg0: i32) -> (i32, i32) {
    %c0_i32 = arith.constant 0 : i32
    %c0_i32_0 = arith.constant 0 : i32
    %c0_i32_1 = arith.constant 0 : i32
    return %c0_i32, %c0_i32_0 : i32, i32
  }
  func.func @transform_15(%arg0: i32) -> (i32, i32, i32) {
    %c0_i32 = arith.constant 0 : i32
    %c0_i32_0 = arith.constant 0 : i32
    %c0_i32_1 = arith.constant 0 : i32
    return %arg0, %c0_i32, %c0_i32_0 : i32, i32, i32
  }
}

</mosaic_0001>

<bundles_post_ra>
// kernel: transformer_forward.3
= control target key start
LH: loop header
LB: loop body
LE: loop exit
PB: predicated region body
PF: predicated region fallthrough
CT: control target
= control target key end

     0   :  { %s2445_s18 = smov 0   ;;  %s2744_s0 = inlined_call_operand.vmem [shape: f32[8,8,16], index: 0, kind: input, shape index: {}]   ;;  %s2745_s1 = inlined_call_operand.vmem [shape: f32[1,16], index: 1, kind: input, shape index: {}]   ;;  %s2746_s2 = inlined_call_operand.vmem [shape: f32[1,16], index: 2, kind: input, shape index: {}]   ;;  %s2747_s3 = inlined_call_operand.vmem [shape: f32[16,96], index: 3, kind: input, shape index: {}]   ;;  %s2748_s4 = inlined_call_operand.vmem [shape: f32[1,96], index: 4, kind: input, shape index: {}]   ;;  %s2749_s5 = inlined_call_operand.vmem [shape: f32[32,32], index: 5, kind: input, shape index: {}]   ;;  %s2750_s6 = inlined_call_operand.vmem [shape: f32[1,32], index: 6, kind: input, shape index: {}]   ;;  %s2751_s7 = inlined_call_operand.vmem [shape: f32[16,32], index: 7, kind: input, shape index: {}]   ;;  %s2752_s8 = inlined_call_operand.vmem [shape: f32[1,32], index: 8, kind: input, shape index: {}]   ;;  %s2753_s9 = inlined_call_operand.vmem [shape: f32[1,32], index: 9, kind: input, shape index: {}]   ;;  %s2754_s10 = inlined_call_operand.vmem [shape: f32[1,32], index: 10, kind: input, shape index: {}]   ;;  %s2755_s11 = inlined_call_operand.vmem [shape: f32[32,64], index: 11, kind: input, shape index: {}]   ;;  %s2756_s12 = inlined_call_operand.vmem [shape: f32[1,64], index: 12, kind: input, shape index: {}]   ;;  %s2757_s13 = inlined_call_operand.vmem [shape: f32[64,32], index: 13, kind: input, shape index: {}]   ;;  %s2758_s14 = inlined_call_operand.vmem [shape: f32[1,32], index: 14, kind: input, shape index: {}]   ;;  %s2759_s15 = inlined_call_operand.vmem [shape: f32[8,8,32], index: 15, kind: output, shape index: {}]  }
   0x1 LB: > { %s2011_s19 = sadd.s32 4294967295, %s2359_s18   ;;  %p2015_p0 = scmp.ge.s32.totalorder %s2359_s18, 1  ;;  %s2359_s18 = sphi %s2445_s18, %s25_s18  }
   0x2   : > { %p438_p1 = scmp.lt.s32.totalorder %s2359_s18, 3 }
   0x4   : > { %p439_p2 = pnand %p2015_p0, %p438_p1 }
   0x5   : > { %s2016_s20 = sshll.u32 (!%p439_p2), %s2011_s19, 2  ;;  %vm502_vm0 = vcmask (!%p439_p2), 130048   ;;  %v606_v28 = vld [vmem:[%s2747_s3] sm:$0xff] (!%p439_p2)  ;;  %v607_v29 = vld [vmem:[%s2747_s3 + $0x8] sm:$0xff] (!%p439_p2)  ;;  %vm2362_vm9 = vmmov (!%p439_p2), 0   ;;  %s2363_s23 = smov (!%p439_p2), 96  }
   0x6   : > { %442 = sbr.rel (%p439_p2) target bundleno = 2438 (0x986), region = 80  ;;  %p487_p3 = scmp.lt.s32.totalorder (!%p439_p2), %s2016_s20, 7  ;;  %v2233_v30 = vpack.c.bf16 (!%p439_p2), %v607_v29, %v606_v28  ;;  %vm720_vm10 = vcmask (!%p439_p2), 261120   ;;  %vm1032_vm12 = vcmask (!%p439_p2), 64512  }
   0x8   : > { %2234 = vmatprep.subr.bf16.mxu0 (!%p439_p2), %v2233_v30 }
   0x9   : > { %2236 = vmatpush3.bf16.msra.mxu0 (!%p439_p2), %v2233_v30 }
   0xd   : > { %s2761_s20 = smov (!%p487_p3, %s2016_s20), 7 }
   0xe   : > { %s2017_s21 = sshll.u32 %s2761_s20, 3 }
   0xf   : > { %s490_s24 = scalar_lea.vmem %s2744_s0, %s2017_s21  ;;  %s496_s27 = scalar_lea.vmem %s2759_s15, %s2017_s21 }
  0x10   : > { %v2461_v0 = vld [vmem:[%s490_s24] sm:$0xff]  ;;  %v2463_v1 = vld [vmem:[%s490_s24 + $0x10] sm:$0xff]  ;;  %v2465_v2 = vld [vmem:[%s490_s24 + $0x8] sm:$0xff] }
  0x11   : > { %v503_v3 = vsel %vm502_vm0, %v2461_v0, 0.0  ;;  %v509_v4 = vsel %vm502_vm0, %v2463_v1, 0.0  ;;  %v2471_v5 = vld [vmem:[%s490_s24 + $0x18] sm:$0xff]  ;;  %v506_v6 = vsel %vm502_vm0, %v2465_v2, 0.0  ;;  %s2364_s24 = smov 64  }
  0x12   : > { %504 = vadd.xlane.f32.xlu0 %v503_v3  ;;  %510 = vadd.xlane.f32.xlu1 %v509_v4  ;;  %v512_v7 = vsel %vm502_vm0, %v2471_v5, 0.0  ;;  %v2020_v3 = vld [vmem:[%s2745_s1] ss:$0 sm:$0xff] }
  0x16   : > { %507 = vadd.xlane.f32.xlu0 %v506_v6  ;;  %513 = vadd.xlane.f32.xlu1 %v512_v7  ;;  %v2021_v6 = vld [vmem:[%s2746_s2] ss:$0 sm:$0xff] }
  0x9f   : > { %v505_v8 = vpop.xlane.xlu0 %504  ;;  %v511_v9 = vpop.xlane.xlu1 %510 }
  0xa0   : > { %v516_v10 = vmul.f32 0.0625, %v505_v8  ;;  %v518_v11 = vmul.f32 0.0625, %v511_v9 }
  0xa2   : > { %v2478_v12 = vsub.f32 %v2461_v0, %v516_v10  ;;  %v2481_v13 = vsub.f32 %v2463_v1, %v518_v11 }
  0xa3   : > { %v508_v14 = vpop.xlane.xlu0 %507  ;;  %v514_v15 = vpop.xlane.xlu1 %513 }
  0xa4   : > { %v517_v16 = vmul.f32 0.0625, %v508_v14  ;;  %v519_v17 = vmul.f32 0.0625, %v514_v15  ;;  %v524_v18 = vmul.f32 %v2478_v12, %v2478_v12  ;;  %v526_v19 = vmul.f32 %v2481_v13, %v2481_v13 }
  0xa6   : > { %v2488_v20 = vsub.f32 %v2465_v2, %v517_v16  ;;  %v2491_v21 = vsub.f32 %v2471_v5, %v519_v17  ;;  %v528_v22 = vsel %vm502_vm0, %v524_v18, 0.0  ;;  %v534_v23 = vsel %vm502_vm0, %v526_v19, 0.0 }
  0xa7   : > { %529 = vadd.xlane.f32.xlu0 %v528_v22 }
  0xa8   : > { %v525_v24 = vmul.f32 %v2488_v20, %v2488_v20  ;;  %v527_v25 = vmul.f32 %v2491_v21, %v2491_v21 }
  0xaa   : > { %v531_v26 = vsel %vm502_vm0, %v525_v24, 0.0  ;;  %v537_v27 = vsel %vm502_vm0, %v527_v25, 0.0 }
  0xab   : > { %535 = vadd.xlane.f32.xlu0 %v534_v23  ;;  %532 = vadd.xlane.f32.xlu1 %v531_v26 }
  0xaf   : > { %538 = vadd.xlane.f32.xlu1 %v537_v27 }
 0x134   : > { %v530_v31 = vpop.xlane.xlu0 %529 }
 0x135   : > { %v540_v32 = vmul.f32 0.0625, %v530_v31 }
 0x137   : > { %2297 = vrsqrt.f32 %v540_v32  ;;  %vm546_vm1 = vcmp.eq.f32.partialorder %v540_v32, inf  ;;  %v549_v41 = vand.u32 2147483648, %v540_v32  ;;  %vm548_vm2 = vcmp.eq.f32.partialorder %v540_v32, 0.0 }
 0x138   : > { %v533_v33 = vpop.xlane.xlu1 %532  ;;  %v536_v34 = vpop.xlane.xlu0 %535 }
 0x139   : > { %v541_v35 = vmul.f32 0.0625, %v533_v33  ;;  %v542_v36 = vmul.f32 0.0625, %v536_v34 }
 0x13b   : > { %2299 = vrsqrt.f32 %v541_v35  ;;  %vm553_vm3 = vcmp.eq.f32.partialorder %v541_v35, inf  ;;  %vm555_vm4 = vcmp.eq.f32.partialorder %v541_v35, 0.0  ;;  %v556_v48 = vand.u32 2147483648, %v541_v35 }
 0x13c   : > { %2301 = vrsqrt.f32 %v542_v36  ;;  %v539_v37 = vpop.xlane.xlu1 %538  ;;  %vm560_vm5 = vcmp.eq.f32.partialorder %v542_v36, inf  ;;  %v563_v51 = vand.u32 2147483648, %v542_v36  ;;  %vm562_vm6 = vcmp.eq.f32.partialorder %v542_v36, 0.0 }
 0x13d   : > { %v543_v38 = vmul.f32 0.0625, %v539_v37 }
 0x13f   : > { %2303 = vrsqrt.f32 %v543_v38  ;;  %vm567_vm7 = vcmp.eq.f32.partialorder %v543_v38, inf  ;;  %v570_v59 = vand.u32 2147483648, %v543_v38  ;;  %vm569_vm8 = vcmp.eq.f32.partialorder %v543_v38, 0.0 }
 0x141   : > { %v2298_v39 = vpop.eup %2297 }
 0x142   : > { %v545_v40 = vmul.f32 %v2298_v39, %v540_v32 }
 0x144   : > { %v547_v42 = vsel %vm546_vm1, %v540_v32, %v545_v40 }
 0x145   : > { %v2300_v43 = vpop.eup %2299  ;;  %v550_v44 = vsel %vm548_vm2, %v549_v41, %v547_v42 }
 0x146   : > { %v2302_v45 = vpop.eup %2301  ;;  %v552_v46 = vmul.f32 %v2300_v43, %v541_v35  ;;  %v572_v47 = vadd.f32 1e-05, %v550_v44 }
 0x147   : > { %v559_v49 = vmul.f32 %v2302_v45, %v542_v36 }
 0x148   : > { %v554_v50 = vsel %vm553_vm3, %v541_v35, %v552_v46  ;;  %2305 = vrcp.f32 %v572_v47  ;;  %v712_v35 = vlaneseq }
 0x149   : > { %v2304_v52 = vpop.eup %2303  ;;  %v557_v53 = vsel %vm555_vm4, %v556_v48, %v554_v50  ;;  %v561_v54 = vsel %vm560_vm5, %v542_v36, %v559_v49  ;;  %vm1849_vm5 = vcmask 523264  }
 0x14a   : > { %v573_v55 = vadd.f32 1e-05, %v557_v53  ;;  %v564_v56 = vsel %vm562_vm6, %v563_v51, %v561_v54  ;;  %v566_v57 = vmul.f32 %v2304_v52, %v543_v38  ;;  %v713_v36 = vshrl.u32 %v712_v35, 7 }
 0x14b   : > { %v574_v58 = vadd.f32 1e-05, %v564_v56  ;;  %v715_v37 = vand.u32 127, %v712_v35 }
 0x14c   : > { %2307 = vrcp.f32 %v573_v55  ;;  %v568_v60 = vsel %vm567_vm7, %v543_v38, %v566_v57 }
 0x14d   : > { %2309 = vrcp.f32 %v574_v58  ;;  %v571_v61 = vsel %vm569_vm8, %v570_v59, %v568_v60  ;;  %vm716_vm11 = vcmp.le.s32.totalorder %v715_v37, %v713_v36  ;;  %v1489_v37 = vld [vmem:[%s2751_s7] sm:$0xff] }
 0x14e   : > { %v575_v62 = vadd.f32 1e-05, %v571_v61 }
 0x150   : > { %2311 = vrcp.f32 %v575_v62 }
 0x152   : > { %v2306_v63 = vpop.eup %2305 }
 0x153   : > { %v580_v4 = vmul.f32 %v2306_v63, %v2478_v12 }
 0x155   : > { %v591_v7 = vmul.f32 %v2020_v3, %v580_v4 }
 0x156   : > { %v2308_v8 = vpop.eup %2307 }
 0x157   : > { %v2310_v9 = vpop.eup %2309  ;;  %v602_v10 = vadd.f32 %v2021_v6, %v591_v7  ;;  %v581_v11 = vmul.f32 %v2308_v8, %v2488_v20  ;;  %v2361_v20 = vmov 0.0  }
 0x158   : > { %v582_v14 = vmul.f32 %v2310_v9, %v2481_v13  ;;  %2138 = vmatprep.subr.mxu1 %v2361_v20  ;;  %2133 = vmatprep.subr.mxu0 %v2361_v20  ;;  %v2022_v13 = vld [vmem:[%s2748_s4] ss:$0 sm:$0xff] }
 0x159   : > { %2127 = vmatprep.mubr.msk.f32.mxu0 %vm502_vm0, %v602_v10  ;;  %v592_v15 = vmul.f32 %v2020_v3, %v581_v11  ;;  %2140 = vmatprep.mubr.msk.f32.mxu1 %vm2362_vm9, %v2361_v20 }
 0x15a   : > { %v2312_v16 = vpop.eup %2311  ;;  %v593_v17 = vmul.f32 %v2020_v3, %v582_v14 }
 0x15b   : > { %v603_v18 = vadd.f32 %v2021_v6, %v592_v15  ;;  %v583_v12 = vmul.f32 %v2312_v16, %v2491_v21 }
 0x15c   : > { %v604_v19 = vadd.f32 %v2021_v6, %v593_v17 }
 0x15d   : > { %2128 = vmatmul.mubr.msk.f32.vlgmr.msra.gmra.mrb[0].mxu0 %vm502_vm0, %v603_v18  ;;  %v594_v22 = vmul.f32 %v2020_v3, %v583_v12 }
 0x15e   : > { %2130 = vmatprep.mubr.msk.f32.mxu0 %vm502_vm0, %v604_v19 }
 0x15f   : > { %v605_v23 = vadd.f32 %v2021_v6, %v594_v22 }
 0x161   : > { %2131 = vmatmul.mubr.msk.f32.gmra.mrb[2].mxu0 %vm502_vm0, %v605_v23 }
 0x162   : > { %2135 = vmatprep.mubr.msk.f32.mxu0 %vm2362_vm9, %v2361_v20 }
 0x230   : > { %v2129_v21 = vpop.f32.mrb[0].mxu0 }
 0x231   : > { %v2530_v24 = vadd.f32 %v2129_v21, %v2022_v13  ;;  %v693_v25 = vpop.f32.mrb[1].mxu0  ;;  %v1381_v21 = vld [vmem:[%s2749_s5] sm:$0xff] }
 0x232   : > { %v2532_v26 = vadd.f32 %v2022_v13, %v693_v25 }
 0x233   : > { %796 = vrot.lane.b32.xlu1 %v2530_v24, %s2363_s23 }
 0x234   : > { %718 = vrot.lane.b32.xlu0 %v2532_v26, %s2363_s23  ;;  %v2132_v27 = vpop.f32.mrb[2].mxu0 }
 0x235   : > { %v703_v28 = vpop.f32.mrb[3].mxu0  ;;  %v2539_v30 = vadd.f32 %v2132_v27, %v2022_v13  ;;  %v1383_v27 = vld [vmem:[%s2749_s5 + $0x10] sm:$0xff] }
 0x236   : > { %v2536_v29 = vadd.f32 %v2022_v13, %v703_v28  ;;  %v1384_v28 = vld [vmem:[%s2749_s5 + $0x18] sm:$0xff] }
 0x238   : > { %873 = vrot.lane.b32.xlu1 %v2536_v29, %s2363_s23 }
 0x23c   : > { %950 = vrot.lane.b32.xlu1 %v2539_v30, %s2363_s23 }
 0x2a5   : > { %v797_v31 = vpop.permute.xlu1 %796 }
 0x2a6   : > { %2139 = vmatpush3.xpose.msk.msra.mxu1 %vm720_vm10, %v797_v31  ;;  %v719_v32 = vpop.permute.xlu0 %718 }
 0x2a7   : > { %2134 = vmatpush3.xpose.msk.msra.mxu0 %vm720_vm10, %v719_v32  ;;  %2148 = vmatprep.subr.mxu1 %v2361_v20 }
 0x2a8   : > { %2143 = vmatprep.subr.mxu0 %v2361_v20 }
 0x2a9   : > { %2141 = vmatmul.mubr.msk.f32.vlgmr.msra.gmra.mrb[0].mxu1 %vm720_vm10, %v2530_v24 }
 0x2aa   : > { %v874_v33 = vpop.permute.xlu1 %873  ;;  %2136 = vmatmul.mubr.msk.f32.vlgmr.msra.gmra.mrb[4].mxu0 %vm720_vm10, %v2532_v26  ;;  %2150 = vmatprep.mubr.msk.f32.mxu1 %vm2362_vm9, %v2361_v20 }
 0x2ab   : > { %2144 = vmatpush3.xpose.msk.msra.mxu0 %vm720_vm10, %v874_v33  ;;  %2145 = vmatprep.mubr.msk.f32.mxu0 %vm2362_vm9, %v2361_v20  ;;  %v2241_v33 = vpack.c.bf16 %v1384_v28, %v1383_v27 }
 0x2ac   : > { %2153 = vmatprep.subr.mxu0 %v2361_v20 }
 0x2ae   : > { %v951_v34 = vpop.permute.xlu1 %950  ;;  %2146 = vmatmul.mubr.msk.f32.vlgmr.msra.gmra.mrb[6].mxu0 %vm720_vm10, %v2536_v29 }
 0x2af   : > { %2149 = vmatpush3.xpose.msk.msra.mxu1 %vm720_vm10, %v951_v34  ;;  %2155 = vmatprep.mubr.msk.f32.mxu0 %vm2362_vm9, %v2361_v20 }
 0x2b0   : > { %2158 = vmatprep.subr.mxu1 %v2361_v20 }
 0x2b2   : > { %2151 = vmatmul.mubr.msk.f32.vlgmr.msra.gmra.mrb[2].mxu1 %vm720_vm10, %v2539_v30 }
 0x2b3   : > { %2160 = vmatprep.mubr.msk.f32.mxu1 %vm2362_vm9, %v2361_v20 }
 0x37c   : > { %v868_v38 = vpop.f32.mrb[0].mxu1 }
 0x37d   : > { %v1029_v39 = vsel %vm716_vm11, %v868_v38, -1e+30  ;;  %v791_v40 = vpop.f32.mrb[4].mxu0  ;;  %v2142_v41 = vpop.f32.mrb[1].mxu1 }
 0x37e   : > { %v1028_v42 = vsel %vm716_vm11, %v791_v40, -1e+30  ;;  %v2137_v43 = vpop.f32.mrb[5].mxu0  ;;  %v1036_v44 = vsel %vm1032_vm12, %v1029_v39, -inf }
 0x37f   : > { %1037 = vmax.xlane.f32.xlu1 %v1036_v44  ;;  %v1033_v45 = vsel %vm1032_vm12, %v1028_v42, -inf }
 0x380   : > { %1034 = vmax.xlane.f32.xlu0 %v1033_v45 }
 0x381   : > { %v945_v46 = vpop.f32.mrb[6].mxu0 }
 0x382   : > { %v1030_v47 = vsel %vm716_vm11, %v945_v46, -1e+30  ;;  %v2147_v48 = vpop.f32.mrb[7].mxu0 }
 0x383   : > { %v1039_v49 = vsel %vm1032_vm12, %v1030_v47, -inf  ;;  %v2044_v48 = vld [vmem:[%s2752_s8] ss:$0 sm:$0xff] }
 0x384   : > { %1040 = vmax.xlane.f32.xlu0 %v1039_v49 }
 0x385   : > { %v1022_v50 = vpop.f32.mrb[2].mxu1 }
 0x386   : > { %v1031_v51 = vsel %vm716_vm11, %v1022_v50, -1e+30  ;;  %v2152_v52 = vpop.f32.mrb[3].mxu1 }
 0x387   : > { %v1042_v53 = vsel %vm1032_vm12, %v1031_v51, -inf }
 0x388   : > { %1043 = vmax.xlane.f32.xlu0 %v1042_v53 }
 0x40c   : > { %v1038_v54 = vpop.xlane.xlu1 %1037 }
 0x40d   : > { %v1046_v55 = vsub.f32 %v1029_v39, %v1038_v54  ;;  %v1035_v56 = vpop.xlane.xlu0 %1034 }
 0x40e   : > { %v1045_v57 = vsub.f32 %v1028_v42, %v1035_v56 }
 0x40f   : > { %v1051_v58 = vmul.f32 1.442695, %v1046_v55 }
 0x410   : > { %v1049_v59 = vmul.f32 1.442695, %v1045_v57 }
 0x411   : > { %2313 = vpow2.f32 %v1051_v58  ;;  %v1041_v60 = vpop.xlane.xlu0 %1040 }
 0x412   : > { %2315 = vpow2.f32 %v1049_v59  ;;  %v1047_v61 = vsub.f32 %v1030_v47, %v1041_v60  ;;  %v2039_v47 = vld [vmem:[%s2750_s6] ss:$0 sm:$0xff] }
 0x413   : > { %v2279_v52 = vadd.f32 %v2044_v48, %v2039_v47 }
 0x414   : > { %v1053_v62 = vmul.f32 1.442695, %v1047_v61 }
 0x415   : > { %v1044_v63 = vpop.xlane.xlu0 %1043 }
 0x416   : > { %2317 = vpow2.f32 %v1053_v62  ;;  %v1048_v3 = vsub.f32 %v1031_v51, %v1044_v63 }
 0x418   : > { %v1055_v4 = vmul.f32 1.442695, %v1048_v3 }
 0x41a   : > { %2319 = vpow2.f32 %v1055_v4 }
 0x41b   : > { %v2314_v6 = vpop.eup %2313 }
 0x41c   : > { %v2316_v7 = vpop.eup %2315  ;;  %v1060_v8 = vsel %vm1032_vm12, %v2314_v6, 0.0 }
 0x41d   : > { %1061 = vadd.xlane.f32.xlu1 %v1060_v8  ;;  %v1057_v9 = vsel %vm1032_vm12, %v2316_v7, 0.0 }
 0x41e   : > { %1058 = vadd.xlane.f32.xlu0 %v1057_v9 }
 0x420   : > { %v2318_v10 = vpop.eup %2317 }
 0x421   : > { %v1063_v11 = vsel %vm1032_vm12, %v2318_v10, 0.0 }
 0x422   : > { %1064 = vadd.xlane.f32.xlu0 %v1063_v11 }
 0x424   : > { %v2320_v14 = vpop.eup %2319 }
 0x425   : > { %v1066_v15 = vsel %vm1032_vm12, %v2320_v14, 0.0 }
 0x426   : > { %1067 = vadd.xlane.f32.xlu1 %v1066_v15 }
 0x437   : > { %1153 = vrot.lane.b32.xlu1 %v2530_v24, %s2364_s24  ;;  %v1382_v24 = vld [vmem:[%s2749_s5 + $0x8] sm:$0xff] }
 0x438   : > { %1077 = vrot.lane.b32.xlu0 %v2532_v26, %s2364_s24 }
 0x43b   : > { %1229 = vrot.lane.b32.xlu1 %v2536_v29, %s2364_s24  ;;  %v2237_v29 = vpack.c.bf16 %v1382_v24, %v1381_v21  ;;  %v1704_v21 = vld [vmem:[%s2755_s11 + $0x10] sm:$0xff] }
 0x43f   : > { %1305 = vrot.lane.b32.xlu1 %v2539_v30, %s2364_s24 }
 0x4aa   : > { %v1062_v16 = vpop.xlane.xlu1 %1061 }
 0x4ab   : > { %2321 = vrcp.f32 %v1062_v16  ;;  %v1059_v17 = vpop.xlane.xlu0 %1058 }
 0x4ac   : > { %2323 = vrcp.f32 %v1059_v17 }
 0x4af   : > { %v1065_v18 = vpop.xlane.xlu0 %1064 }
 0x4b0   : > { %2325 = vrcp.f32 %v1065_v18 }
 0x4b3   : > { %v1068_v12 = vpop.xlane.xlu1 %1067  ;;  %v1078_v19 = vpop.permute.xlu0 %1077 }
 0x4b4   : > { %2327 = vrcp.f32 %v1068_v12  ;;  %2154 = vmatpush3.msra.mxu0 %v1078_v19 }
 0x4b5   : > { %v2322_v22 = vpop.eup %2321  ;;  %2163 = vmatprep.subr.mxu0 %v2361_v20 }
 0x4b6   : > { %v2324_v23 = vpop.eup %2323  ;;  %v1074_v13 = vmul.f32 %v2322_v22, %v2314_v6 }
 0x4b7   : > { %v1073_v25 = vmul.f32 %v2324_v23, %v2316_v7  ;;  %v1154_v26 = vpop.permute.xlu1 %1153  ;;  %v1702_v23 = vld [vmem:[%s2755_s11] sm:$0xff] }
 0x4b8   : > { %2159 = vmatpush3.msra.mxu1 %v1154_v26 }
 0x4b9   : > { %2156 = vmatmul.mubr.msk.f32.vlgmr.msra.gmra.mrb[8].mxu0 %vm1032_vm12, %v1073_v25  ;;  %2161 = vmatmul.mubr.msk.f32.vlgmr.msra.gmra.mrb[4].mxu1 %vm1032_vm12, %v1074_v13  ;;  %v1703_v13 = vld [vmem:[%s2755_s11 + $0x8] sm:$0xff]  ;;  %v1705_v25 = vld [vmem:[%s2755_s11 + $0x18] sm:$0xff] }
 0x4ba   : > { %v2326_v30 = vpop.eup %2325  ;;  %2165 = vmatprep.mubr.msk.f32.mxu0 %vm2362_vm9, %v2361_v20  ;;  %2168 = vmatprep.subr.mxu1 %v2361_v20  ;;  %v2249_v24 = vpack.c.bf16 %v1703_v13, %v1702_v23  ;;  %v2253_v26 = vpack.c.bf16 %v1705_v25, %v1704_v21  ;;  %v1837_v23 = vld [vmem:[%s2757_s13 + $0x18] sm:$0xff]  ;;  %v1838_v21 = vld [vmem:[%s2757_s13 + $0x20] sm:$0xff] }
 0x4bb   : > { %v1075_v31 = vmul.f32 %v2326_v30, %v2318_v10  ;;  %v1230_v32 = vpop.permute.xlu1 %1229  ;;  %2170 = vmatprep.mubr.msk.f32.mxu1 %vm2362_vm9, %v2361_v20  ;;  %v1490_v20 = vld [vmem:[%s2751_s7 + $0x8] sm:$0xff] }
 0x4bc   : > { %2164 = vmatpush3.msra.mxu0 %v1230_v32  ;;  %v2245_v38 = vpack.c.bf16 %v1490_v20, %v1489_v37 }
 0x4bd   : > { %2166 = vmatmul.mubr.msk.f32.vlgmr.msra.gmra.mrb[10].mxu0 %vm1032_vm12, %v1075_v31  ;;  %2238 = vmatprep.subr.bf16.mxu0 %v2237_v29 }
 0x4be   : > { %v2328_v34 = vpop.eup %2327  ;;  %2240 = vmatpush3.bf16.msra.mxu0 %v2237_v29 }
 0x4bf   : > { %v1076_v35 = vmul.f32 %v2328_v34, %v2320_v14  ;;  %v1306_v36 = vpop.permute.xlu1 %1305  ;;  %2242 = vmatprep.subr.bf16.mxu0 %v2241_v33 }
 0x4c0   : > { %2169 = vmatpush3.msra.mxu1 %v1306_v36 }
 0x4c1   : > { %2171 = vmatmul.mubr.msk.f32.vlgmr.msra.gmra.mrb[6].mxu1 %vm1032_vm12, %v1076_v35  ;;  %2250 = vmatprep.subr.bf16.mxu1 %v2249_v24 }
 0x4c2   : > { %2244 = vmatpush3.bf16.msra.mxu0 %v2241_v33  ;;  %2252 = vmatpush3.bf16.msra.mxu1 %v2249_v24  ;;  %v1839_v24 = vld [vmem:[%s2757_s13 + $0x28] sm:$0xff] }
 0x4c3   : > { %2246 = vmatprep.subr.bf16.mxu0 %v2245_v38  ;;  %2254 = vmatprep.subr.bf16.mxu1 %v2253_v26  ;;  %v2265_v25 = vpack.c.bf16 %v1839_v24, %v1838_v21 }
 0x4c6   : > { %2256 = vmatpush3.bf16.msra.mxu1 %v2253_v26  ;;  %v1840_v26 = vld [vmem:[%s2757_s13 + $0x30] sm:$0xff] }
 0x58c   : > { %v1149_v39 = vpop.f32.mrb[8].mxu0  ;;  %v1225_v40 = vpop.f32.mrb[4].mxu1 }
 0x58d   : > { %v2157_v41 = vpop.f32.mrb[9].mxu0  ;;  %v2162_v42 = vpop.f32.mrb[5].mxu1  ;;  %2181 = vmatprep.mubr.msk.f32.mxu0 %vm720_vm10, %v1149_v39 }
 0x58e   : > { %2182 = vmatmul.mubr.msk.f32.vlgmr.msra.gmra.mrb[12].mxu0 %vm720_vm10, %v1225_v40 }
 0x58f   : > { %2248 = vmatpush3.bf16.msra.mxu0 %v2245_v38 }
 0x590   : > { %v1301_v43 = vpop.f32.mrb[10].mxu0 }
 0x591   : > { %v2167_v44 = vpop.f32.mrb[11].mxu0  ;;  %2184 = vmatprep.mubr.msk.f32.mxu0 %vm720_vm10, %v1301_v43 }
 0x594   : > { %v1377_v45 = vpop.f32.mrb[6].mxu1 }
 0x595   : > { %v2172_v46 = vpop.f32.mrb[7].mxu1  ;;  %2185 = vmatmul.mubr.msk.f32.gmra.mrb[14].mxu0 %vm720_vm10, %v1377_v45 }
 0x596   : > { %2191 = vmatprep.mubr.msk.f32.mxu0 %vm502_vm0, %v2461_v0 }
 0x599   : > { %2192 = vmatmul.mubr.msk.f32.vlgmr.msra.gmra.mrb[12].mxu0 %vm502_vm0, %v2465_v2 }
 0x59a   : > { %2194 = vmatprep.mubr.msk.f32.mxu0 %vm502_vm0, %v2463_v1 }
 0x59d   : > { %2195 = vmatmul.mubr.msk.f32.gmra.mrb[14].mxu0 %vm502_vm0, %v2471_v5 }
 0x66c   : > { %v2193_v49 = vpop.f32.mrb[12].mxu0 }
 0x66d   : > { %v2273_v50 = vadd.f32 %v2193_v49, %v2039_v47  ;;  %v1576_v0 = vpop.f32.mrb[13].mxu0 }
 0x66e   : > { %v2275_v51 = vadd.f32 %v2039_v47, %v1576_v0 }
 0x66f   : > { %v2628_v2 = vadd.f32 %v2273_v50, %v2044_v48 }
 0x670   : > { %v2630_v53 = vadd.f32 %v2275_v51, %v2044_v48  ;;  %v2196_v1 = vpop.f32.mrb[14].mxu0 }
 0x671   : > { %v1586_v54 = vpop.f32.mrb[15].mxu0  ;;  %v1602_v5 = vsel %vm720_vm10, %v2628_v2, 0.0  ;;  %v2638_v57 = vadd.f32 %v2279_v52, %v2196_v1 }
 0x672   : > { %v2634_v55 = vadd.f32 %v2279_v52, %v1586_v54  ;;  %1603 = vadd.xlane.f32.xlu1 %v1602_v5  ;;  %v1599_v56 = vsel %vm720_vm10, %v2630_v53, 0.0 }
 0x673   : > { %1600 = vadd.xlane.f32.xlu0 %v1599_v56  ;;  %v1608_v59 = vsel %vm720_vm10, %v2638_v57, 0.0 }
 0x674   : > { %v1605_v58 = vsel %vm720_vm10, %v2634_v55, 0.0 }
 0x677   : > { %1606 = vadd.xlane.f32.xlu0 %v1605_v58 }
 0x67b   : > { %1609 = vadd.xlane.f32.xlu0 %v1608_v59  ;;  %v2049_v59 = vld [vmem:[%s2753_s9] ss:$0 sm:$0xff] }
 0x6ff   : > { %v1604_v60 = vpop.xlane.xlu1 %1603 }
 0x700   : > { %v1613_v61 = vmul.f32 0.03125, %v1604_v60  ;;  %v1601_v62 = vpop.xlane.xlu0 %1600 }
 0x701   : > { %v1612_v63 = vmul.f32 0.03125, %v1601_v62 }
 0x702   : > { %v2645_v3 = vsub.f32 %v2628_v2, %v1613_v61 }
 0x703   : > { %v2648_v4 = vsub.f32 %v2630_v53, %v1612_v63  ;;  %v2050_v63 = vld [vmem:[%s2754_s10] ss:$0 sm:$0xff] }
 0x704   : > { %v1607_v6 = vpop.xlane.xlu0 %1606  ;;  %v1621_v7 = vmul.f32 %v2645_v3, %v2645_v3 }
 0x705   : > { %v1614_v8 = vmul.f32 0.03125, %v1607_v6  ;;  %v1620_v9 = vmul.f32 %v2648_v4, %v2648_v4 }
 0x706   : > { %v1627_v10 = vsel %vm720_vm10, %v1621_v7, 0.0 }
 0x707   : > { %v2656_v11 = vsub.f32 %v2634_v55, %v1614_v8  ;;  %1628 = vadd.xlane.f32.xlu1 %v1627_v10  ;;  %v1624_v14 = vsel %vm720_vm10, %v1620_v9, 0.0 }
 0x708   : > { %1625 = vadd.xlane.f32.xlu0 %v1624_v14  ;;  %v1610_v15 = vpop.xlane.xlu0 %1609 }
 0x709   : > { %v1615_v16 = vmul.f32 0.03125, %v1610_v15  ;;  %v1622_v17 = vmul.f32 %v2656_v11, %v2656_v11 }
 0x70b   : > { %v2662_v18 = vsub.f32 %v2638_v57, %v1615_v16  ;;  %v1630_v12 = vsel %vm720_vm10, %v1622_v17, 0.0 }
 0x70c   : > { %1631 = vadd.xlane.f32.xlu0 %v1630_v12 }
 0x70d   : > { %v1623_v19 = vmul.f32 %v2662_v18, %v2662_v18 }
 0x70f   : > { %v1633_v22 = vsel %vm720_vm10, %v1623_v19, 0.0  ;;  %v1835_v19 = vld [vmem:[%s2757_s13 + $0x8] sm:$0xff] }
 0x710   : > { %1634 = vadd.xlane.f32.xlu1 %v1633_v22 }
 0x794   : > { %v1629_v27 = vpop.xlane.xlu1 %1628 }
 0x795   : > { %v1637_v28 = vmul.f32 0.03125, %v1629_v27  ;;  %v1626_v29 = vpop.xlane.xlu0 %1625  ;;  %v1841_v27 = vld [vmem:[%s2757_s13 + $0x38] sm:$0xff] }
 0x796   : > { %v1636_v30 = vmul.f32 0.03125, %v1626_v29  ;;  %v2051_v29 = vld [vmem:[%s2756_s12] ss:$0 sm:$0xff] }
 0x797   : > { %2329 = vrsqrt.f32 %v1637_v28  ;;  %vm1649_vm13 = vcmp.eq.f32.partialorder %v1637_v28, inf  ;;  %v1652_v20 = vand.u32 2147483648, %v1637_v28  ;;  %vm1651_vm14 = vcmp.eq.f32.partialorder %v1637_v28, 0.0 }
 0x798   : > { %2331 = vrsqrt.f32 %v1636_v30  ;;  %vm1642_vm15 = vcmp.eq.f32.partialorder %v1636_v30, inf  ;;  %v1645_v40 = vand.u32 2147483648, %v1636_v30  ;;  %vm1644_vm0 = vcmp.eq.f32.partialorder %v1636_v30, 0.0 }
 0x799   : > { %v1632_v31 = vpop.xlane.xlu0 %1631 }
 0x79a   : > { %v1638_v32 = vmul.f32 0.03125, %v1632_v31 }
 0x79c   : > { %2333 = vrsqrt.f32 %v1638_v32  ;;  %vm1656_vm1 = vcmp.eq.f32.partialorder %v1638_v32, inf  ;;  %v1659_v48 = vand.u32 2147483648, %v1638_v32  ;;  %vm1658_vm2 = vcmp.eq.f32.partialorder %v1638_v32, 0.0 }
 0x79d   : > { %v1635_v33 = vpop.xlane.xlu1 %1634 }
 0x79e   : > { %v1639_v34 = vmul.f32 0.03125, %v1635_v33 }
 0x7a0   : > { %2335 = vrsqrt.f32 %v1639_v34  ;;  %vm1663_vm3 = vcmp.eq.f32.partialorder %v1639_v34, inf  ;;  %v1666_v1 = vand.u32 2147483648, %v1639_v34  ;;  %vm1665_vm4 = vcmp.eq.f32.partialorder %v1639_v34, 0.0 }
 0x7a1   : > { %v2330_v35 = vpop.eup %2329 }
 0x7a2   : > { %v2332_v36 = vpop.eup %2331  ;;  %v1648_v37 = vmul.f32 %v2330_v35, %v1637_v28 }
 0x7a3   : > { %v1641_v38 = vmul.f32 %v2332_v36, %v1636_v30 }
 0x7a4   : > { %v1650_v39 = vsel %vm1649_vm13, %v1637_v28, %v1648_v37  ;;  %v2269_v28 = vpack.c.bf16 %v1841_v27, %v1840_v26 }
 0x7a5   : > { %v1653_v41 = vsel %vm1651_vm14, %v1652_v20, %v1650_v39  ;;  %v1643_v42 = vsel %vm1642_vm15, %v1636_v30, %v1641_v38 }
 0x7a6   : > { %v2334_v43 = vpop.eup %2333  ;;  %v1669_v44 = vadd.f32 1e-05, %v1653_v41  ;;  %v1646_v45 = vsel %vm1644_vm0, %v1645_v40, %v1643_v42 }
 0x7a7   : > { %v1668_v46 = vadd.f32 1e-05, %v1646_v45  ;;  %v1655_v47 = vmul.f32 %v2334_v43, %v1638_v32 }
 0x7a8   : > { %2337 = vrcp.f32 %v1669_v44 }
 0x7a9   : > { %2339 = vrcp.f32 %v1668_v46  ;;  %v1657_v49 = vsel %vm1656_vm1, %v1638_v32, %v1655_v47 }
 0x7aa   : > { %v2336_v50 = vpop.eup %2335  ;;  %v1660_v0 = vsel %vm1658_vm2, %v1659_v48, %v1657_v49 }
 0x7ab   : > { %v1670_v51 = vadd.f32 1e-05, %v1660_v0  ;;  %v1662_v52 = vmul.f32 %v2336_v50, %v1639_v34 }
 0x7ad   : > { %2341 = vrcp.f32 %v1670_v51  ;;  %v1664_v54 = vsel %vm1663_vm3, %v1639_v34, %v1662_v52 }
 0x7ae   : > { %v1667_v5 = vsel %vm1665_vm4, %v1666_v1, %v1664_v54 }
 0x7af   : > { %v1671_v56 = vadd.f32 1e-05, %v1667_v5 }
 0x7b1   : > { %2343 = vrcp.f32 %v1671_v56  ;;  %v2060_v56 = vld [vmem:[%s2758_s14] ss:$0 sm:$0xff] }
 0x7b2   : > { %v2338_v58 = vpop.eup %2337 }
 0x7b3   : > { %v2340_v60 = vpop.eup %2339  ;;  %v1677_v61 = vmul.f32 %v2338_v58, %v2645_v3 }
 0x7b4   : > { %v1676_v62 = vmul.f32 %v2340_v60, %v2648_v4 }
 0x7b5   : > { %v1688_v6 = vmul.f32 %v2049_v59, %v1677_v61 }
 0x7b6   : > { %v1687_v7 = vmul.f32 %v2049_v59, %v1676_v62 }
 0x7b7   : > { %v2342_v8 = vpop.eup %2341  ;;  %v1699_v14 = vadd.f32 %v2050_v63, %v1688_v6 }
 0x7b8   : > { %v1698_v9 = vadd.f32 %v2050_v63, %v1687_v7  ;;  %v1678_v10 = vmul.f32 %v2342_v8, %v2656_v11  ;;  %v1834_v11 = vld [vmem:[%s2757_s13] sm:$0xff] }
 0x7b9   : > { %v2257_v22 = vpack.c.bf16 %v1835_v19, %v1834_v11 }
 0x7ba   : > { %2205 = vmatprep.mubr.msk.f32.mxu1 %vm720_vm10, %v1698_v9  ;;  %v1689_v15 = vmul.f32 %v2049_v59, %v1678_v10 }
 0x7bb   : > { %v2344_v16 = vpop.eup %2343  ;;  %2206 = vmatmul.mubr.msk.f32.vlgmr.msra.gmra.mrb[8].mxu1 %vm720_vm10, %v1699_v14  ;;  %2258 = vmatprep.subr.bf16.mxu1 %v2257_v22 }
 0x7bc   : > { %v1700_v3 = vadd.f32 %v2050_v63, %v1689_v15  ;;  %v1679_v4 = vmul.f32 %v2344_v16, %v2662_v18  ;;  %2260 = vmatpush3.bf16.msra.mxu1 %v2257_v22  ;;  %v1836_v18 = vld [vmem:[%s2757_s13 + $0x10] sm:$0xff] }
 0x7bd   : > { %v2261_v13 = vpack.c.bf16 %v1837_v23, %v1836_v18 }
 0x7be   : > { %2208 = vmatprep.mubr.msk.f32.mxu1 %vm720_vm10, %v1700_v3  ;;  %v1690_v17 = vmul.f32 %v2049_v59, %v1679_v4 }
 0x7bf   : > { %2262 = vmatprep.subr.bf16.mxu1 %v2261_v13 }
 0x7c0   : > { %v1701_v12 = vadd.f32 %v2050_v63, %v1690_v17  ;;  %2264 = vmatpush3.bf16.msra.mxu1 %v2261_v13 }
 0x7c1   : > { %2266 = vmatprep.subr.bf16.mxu1 %v2265_v25 }
 0x7c2   : > { %2209 = vmatmul.mubr.msk.f32.gmra.mrb[10].mxu1 %vm720_vm10, %v1701_v12 }
 0x7c4   : > { %2268 = vmatpush3.bf16.msra.mxu1 %v2265_v25 }
 0x7c5   : > { %2270 = vmatprep.subr.bf16.mxu1 %v2269_v28 }
 0x7c8   : > { %2272 = vmatpush3.bf16.msra.mxu1 %v2269_v28 }
 0x88e   : > { %v2207_v30 = vpop.f32.mrb[8].mxu1 }
 0x88f   : > { %v1797_v31 = vadd.f32 %v2207_v30, %v2051_v29  ;;  %v1791_v32 = vpop.f32.mrb[9].mxu1 }
 0x890   : > { %v1792_v33 = vadd.f32 %v2051_v29, %v1791_v32 }
 0x891   : > { %v1815_v34 = vmin.f32 %v1797_v31, 0.0  ;;  %vm1811_vm7 = vcmp.gt.f32.partialorder %v1797_v31, 0.0 }
 0x892   : > { %v1814_v35 = vmin.f32 %v1792_v33, 0.0  ;;  %vm1810_vm6 = vcmp.gt.f32.partialorder %v1792_v33, 0.0 }
 0x893   : > { %v1820_v36 = vmul.f32 1.442695, %v1815_v34 }
 0x894   : > { %v1818_v37 = vmul.f32 1.442695, %v1814_v35 }
 0x895   : > { %2345 = vpow2.f32 %v1820_v36  ;;  %v2210_v20 = vpop.f32.mrb[10].mxu1 }
 0x896   : > { %2347 = vpow2.f32 %v1818_v37  ;;  %v1807_v38 = vadd.f32 %v2210_v20, %v2051_v29  ;;  %v1801_v39 = vpop.f32.mrb[11].mxu1 }
 0x897   : > { %v1802_v40 = vadd.f32 %v2051_v29, %v1801_v39 }
 0x898   : > { %v1817_v41 = vmin.f32 %v1807_v38, 0.0  ;;  %vm1813_vm9 = vcmp.gt.f32.partialorder %v1807_v38, 0.0 }
 0x899   : > { %v1816_v42 = vmin.f32 %v1802_v40, 0.0  ;;  %vm1812_vm8 = vcmp.gt.f32.partialorder %v1802_v40, 0.0 }
 0x89a   : > { %v1824_v43 = vmul.f32 1.442695, %v1817_v41 }
 0x89b   : > { %v1822_v44 = vmul.f32 1.442695, %v1816_v42 }
 0x89c   : > { %2349 = vpow2.f32 %v1824_v43 }
 0x89d   : > { %2351 = vpow2.f32 %v1822_v44 }
 0x89f   : > { %v2346_v45 = vpop.eup %2345 }
 0x8a0   : > { %v2348_v46 = vpop.eup %2347  ;;  %v2057_v47 = vadd.f32 -1.0, %v2346_v45 }
 0x8a1   : > { %v2056_v48 = vadd.f32 -1.0, %v2348_v46 }
 0x8a2   : > { %v1831_v50 = vsel %vm1811_vm7, %v1797_v31, %v2057_v47 }
 0x8a3   : > { %v1830_v49 = vsel %vm1810_vm6, %v1792_v33, %v2056_v48 }
 0x8a4   : > { %2227 = vmatprep.mubr.msk.f32.mxu1 %vm1849_vm5, %v1830_v49 }
 0x8a5   : > { %2228 = vmatmul.mubr.msk.f32.vlgmr.msra.gmra.mrb[12].mxu1 %vm1849_vm5, %v1831_v50 }
 0x8a6   : > { %v2350_v0 = vpop.eup %2349 }
 0x8a7   : > { %v2352_v51 = vpop.eup %2351  ;;  %v2059_v52 = vadd.f32 -1.0, %v2350_v0 }
 0x8a8   : > { %v2058_v1 = vadd.f32 -1.0, %v2352_v51 }
 0x8a9   : > { %v1833_v5 = vsel %vm1813_vm9, %v1807_v38, %v2059_v52 }
 0x8aa   : > { %v1832_v54 = vsel %vm1812_vm8, %v1802_v40, %v2058_v1 }
 0x8ab   : > { %2230 = vmatprep.mubr.msk.f32.mxu1 %vm1849_vm5, %v1832_v54 }
 0x8ac   : > { %2231 = vmatmul.mubr.msk.f32.gmra.mrb[14].mxu1 %vm1849_vm5, %v1833_v5 }
 0x978   : > { %v2229_v58 = vpop.f32.mrb[12].mxu1 }
 0x979   : > { %v1934_v59 = vadd.f32 %v2229_v58, %v2060_v56  ;;  %v1928_v60 = vpop.f32.mrb[13].mxu1 }
 0x97a   : > { %v1929_v61 = vadd.f32 %v2060_v56, %v1928_v60 }
 0x97b   : > { %v1948_v63 = vadd.f32 %v2628_v2, %v1934_v59 }
 0x97c   : > { %v1947_v62 = vadd.f32 %v2630_v53, %v1929_v61 }
 0x97d   : > { %1952 = vst.msk [vmem:[%s496_s27 + $0x8] sm:$0xff] %vm720_vm10, %v1948_v63 }
 0x97e   : > { %1951 = vst.msk [vmem:[%s496_s27] sm:$0xff] %vm720_vm10, %v1947_v62 }
 0x97f   : > { %v2232_v6 = vpop.f32.mrb[14].mxu1 }
 0x980   : > { %v1944_v7 = vadd.f32 %v2232_v6, %v2060_v56  ;;  %v1938_v8 = vpop.f32.mrb[15].mxu1 }
 0x981   : > { %v1939_v9 = vadd.f32 %v2060_v56, %v1938_v8 }
 0x982   : > { %v1950_v14 = vadd.f32 %v2638_v57, %v1944_v7 }
 0x983   : > { %v1949_v10 = vadd.f32 %v2634_v55, %v1939_v9 }
 0x984   : > { %1954 = vst.msk [vmem:[%s496_s27 + $0x18] sm:$0xff] %vm720_vm10, %v1950_v14 }
 0x985   : > { %1953 = vst.msk [vmem:[%s496_s27 + $0x10] sm:$0xff] %vm720_vm10, %v1949_v10 }
 0x986 PF: > { %s25_s18 = sadd.s32 1, %s2359_s18  }
 0x987   : > { %p22_p4 = scmp.ge.s32.totalorder %s25_s18, 4  }
 0x989   :  { %24 = sbr.rel (!%p22_p4) target bundleno = 1 (0x1), region = 110 }

// kernel: transformer_forward.4
= control target key start
LH: loop header
LB: loop body
LE: loop exit
PB: predicated region body
PF: predicated region fallthrough
CT: control target
= control target key end

     0   :  { %s2248_s25 = smov 0   ;;  %s2530_s0 = inlined_call_operand.vmem [shape: f32[8,8,32], index: 0, kind: input, shape index: {}, may-alias: {0,13}]   ;;  %s2531_s1 = inlined_call_operand.vmem [shape: f32[1,32], index: 1, kind: input, shape index: {}]   ;;  %s2532_s2 = inlined_call_operand.vmem [shape: f32[1,32], index: 2, kind: input, shape index: {}]   ;;  %s2533_s3 = inlined_call_operand.vmem [shape: f32[32,96], index: 3, kind: input, shape index: {}]   ;;  %s2534_s4 = inlined_call_operand.vmem [shape: f32[1,96], index: 4, kind: input, shape index: {}]   ;;  %s2535_s5 = inlined_call_operand.vmem [shape: f32[32,32], index: 5, kind: input, shape index: {}]   ;;  %s2536_s6 = inlined_call_operand.vmem [shape: f32[1,32], index: 6, kind: input, shape index: {}]   ;;  %s2537_s7 = inlined_call_operand.vmem [shape: f32[1,32], index: 7, kind: input, shape index: {}]   ;;  %s2538_s8 = inlined_call_operand.vmem [shape: f32[1,32], index: 8, kind: input, shape index: {}]   ;;  %s2539_s9 = inlined_call_operand.vmem [shape: f32[32,64], index: 9, kind: input, shape index: {}]   ;;  %s2540_s10 = inlined_call_operand.vmem [shape: f32[1,64], index: 10, kind: input, shape index: {}]   ;;  %s2541_s11 = inlined_call_operand.vmem [shape: f32[64,32], index: 11, kind: input, shape index: {}]   ;;  %s2542_s12 = inlined_call_operand.vmem [shape: f32[1,32], index: 12, kind: input, shape index: {}]   ;;  %s2543_s13 = inlined_call_operand.vmem [shape: f32[8,8,32], index: 13, kind: output, shape index: {}, may-alias: {0,13}]  }
   0x1 LB: > { %s1851_s26 = sadd.s32 4294967295, %s2172_s25   ;;  %p1855_p0 = scmp.ge.s32.totalorder %s2172_s25, 1  ;;  %s2172_s25 = sphi %s2248_s25, %s23_s25  }
   0x2   : > { %p388_p1 = scmp.lt.s32.totalorder %s2172_s25, 3 }
   0x4   : > { %p389_p2 = pnand %p1855_p0, %p388_p1 }
   0x5   : > { %s1856_s27 = sshll.u32 (!%p389_p2), %s1851_s26, 2  ;;  %vm448_vm0 = vcmask (!%p389_p2), 261120   ;;  %v552_v28 = vld [vmem:[%s2533_s3] sm:$0xff] (!%p389_p2)  ;;  %v553_v29 = vld [vmem:[%s2533_s3 + $0x8] sm:$0xff] (!%p389_p2)  ;;  %v554_v30 = vld [vmem:[%s2533_s3 + $0x10] sm:$0xff] (!%p389_p2)  ;;  %vm2175_vm9 = vmmov (!%p389_p2), 0  }
   0x6   : > { %392 = sbr.rel (%p389_p2) target bundleno = 2478 (0x9ae), region = 72  ;;  %p433_p3 = scmp.lt.s32.totalorder (!%p389_p2), %s1856_s27, 7  ;;  %v2058_v31 = vpack.c.bf16 (!%p389_p2), %v553_v29, %v552_v28  ;;  %v555_v32 = vld [vmem:[%s2533_s3 + $0x18] sm:$0xff] (!%p389_p2)  ;;  %vm979_vm11 = vcmask (!%p389_p2), 64512  }
   0x7   : > { %v2062_v33 = vpack.c.bf16 (!%p389_p2), %v555_v32, %v554_v30  ;;  %s2176_s15 = smov (!%p389_p2), 96   ;;  %s2177_s16 = smov (!%p389_p2), 64  }
   0x8   : > { %2059 = vmatprep.subr.bf16.mxu0 (!%p389_p2), %v2058_v31 }
   0x9   : > { %2061 = vmatpush3.bf16.msra.mxu0 (!%p389_p2), %v2058_v31 }
   0xa   : > { %2063 = vmatprep.subr.bf16.mxu0 (!%p389_p2), %v2062_v33 }
   0xd   : > { %s2545_s27 = smov (!%p433_p3, %s1856_s27), 7  ;;  %2065 = vmatpush3.bf16.msra.mxu0 %v2062_v33 }
   0xe   : > { %s1857_s28 = sshll.u32 %s2545_s27, 3 }
   0xf   : > { %s436_s14 = scalar_lea.vmem %s2530_s0, %s1857_s28  ;;  %s442_s19 = scalar_lea.vmem %s2543_s13, %s1857_s28 }
  0x10   : > { %v2264_v0 = vld [vmem:[%s436_s14] sm:$0xff]  ;;  %v2266_v1 = vld [vmem:[%s436_s14 + $0x18] sm:$0xff]  ;;  %v2268_v2 = vld [vmem:[%s436_s14 + $0x10] sm:$0xff] }
  0x11   : > { %v449_v3 = vsel %vm448_vm0, %v2264_v0, 0.0  ;;  %v455_v4 = vsel %vm448_vm0, %v2268_v2, 0.0  ;;  %v2274_v5 = vld [vmem:[%s436_s14 + $0x8] sm:$0xff]  ;;  %v458_v7 = vsel %vm448_vm0, %v2266_v1, 0.0 }
  0x12   : > { %450 = vadd.xlane.f32.xlu0 %v449_v3  ;;  %456 = vadd.xlane.f32.xlu1 %v455_v4  ;;  %v452_v6 = vsel %vm448_vm0, %v2274_v5, 0.0 }
  0x16   : > { %453 = vadd.xlane.f32.xlu0 %v452_v6  ;;  %459 = vadd.xlane.f32.xlu1 %v458_v7  ;;  %v1860_v7 = vld [vmem:[%s2531_s1] ss:$0 sm:$0xff] }
  0x9f   : > { %v451_v8 = vpop.xlane.xlu0 %450  ;;  %v457_v9 = vpop.xlane.xlu1 %456 }
  0xa0   : > { %v462_v10 = vmul.f32 0.03125, %v451_v8  ;;  %v464_v11 = vmul.f32 0.03125, %v457_v9  ;;  %v1861_v9 = vld [vmem:[%s2532_s2] ss:$0 sm:$0xff] }
  0xa2   : > { %v2281_v12 = vsub.f32 %v2264_v0, %v462_v10  ;;  %v2284_v13 = vsub.f32 %v2268_v2, %v464_v11 }
  0xa3   : > { %v454_v14 = vpop.xlane.xlu0 %453  ;;  %v460_v15 = vpop.xlane.xlu1 %459 }
  0xa4   : > { %v463_v16 = vmul.f32 0.03125, %v454_v14  ;;  %v465_v17 = vmul.f32 0.03125, %v460_v15  ;;  %v470_v18 = vmul.f32 %v2281_v12, %v2281_v12  ;;  %v472_v19 = vmul.f32 %v2284_v13, %v2284_v13 }
  0xa6   : > { %v2291_v20 = vsub.f32 %v2274_v5, %v463_v16  ;;  %v2294_v21 = vsub.f32 %v2266_v1, %v465_v17  ;;  %v474_v22 = vsel %vm448_vm0, %v470_v18, 0.0  ;;  %v480_v23 = vsel %vm448_vm0, %v472_v19, 0.0 }
  0xa7   : > { %475 = vadd.xlane.f32.xlu0 %v474_v22 }
  0xa8   : > { %v471_v24 = vmul.f32 %v2291_v20, %v2291_v20  ;;  %v473_v25 = vmul.f32 %v2294_v21, %v2294_v21 }
  0xaa   : > { %v477_v26 = vsel %vm448_vm0, %v471_v24, 0.0  ;;  %v483_v27 = vsel %vm448_vm0, %v473_v25, 0.0 }
  0xab   : > { %481 = vadd.xlane.f32.xlu0 %v480_v23  ;;  %478 = vadd.xlane.f32.xlu1 %v477_v26 }
  0xaf   : > { %484 = vadd.xlane.f32.xlu1 %v483_v27 }
 0x134   : > { %v476_v34 = vpop.xlane.xlu0 %475 }
 0x135   : > { %v486_v35 = vmul.f32 0.03125, %v476_v34 }
 0x137   : > { %2110 = vrsqrt.f32 %v486_v35  ;;  %vm492_vm1 = vcmp.eq.f32.partialorder %v486_v35, inf  ;;  %v495_v44 = vand.u32 2147483648, %v486_v35  ;;  %vm494_vm2 = vcmp.eq.f32.partialorder %v486_v35, 0.0 }
 0x138   : > { %v479_v36 = vpop.xlane.xlu1 %478  ;;  %v482_v37 = vpop.xlane.xlu0 %481 }
 0x139   : > { %v487_v38 = vmul.f32 0.03125, %v479_v36  ;;  %v488_v39 = vmul.f32 0.03125, %v482_v37 }
 0x13b   : > { %2112 = vrsqrt.f32 %v487_v38  ;;  %vm506_vm3 = vcmp.eq.f32.partialorder %v488_v39, inf  ;;  %v509_v50 = vand.u32 2147483648, %v488_v39  ;;  %vm499_vm4 = vcmp.eq.f32.partialorder %v487_v38, inf }
 0x13c   : > { %2114 = vrsqrt.f32 %v488_v39  ;;  %v485_v40 = vpop.xlane.xlu1 %484  ;;  %v502_v52 = vand.u32 2147483648, %v487_v38  ;;  %vm508_vm5 = vcmp.eq.f32.partialorder %v488_v39, 0.0  ;;  %vm501_vm6 = vcmp.eq.f32.partialorder %v487_v38, 0.0 }
 0x13d   : > { %v489_v41 = vmul.f32 0.03125, %v485_v40 }
 0x13f   : > { %2116 = vrsqrt.f32 %v489_v41  ;;  %vm513_vm7 = vcmp.eq.f32.partialorder %v489_v41, inf  ;;  %v516_v58 = vand.u32 2147483648, %v489_v41  ;;  %vm515_vm8 = vcmp.eq.f32.partialorder %v489_v41, 0.0 }
 0x141   : > { %v2111_v42 = vpop.eup %2110 }
 0x142   : > { %v491_v43 = vmul.f32 %v2111_v42, %v486_v35 }
 0x144   : > { %v493_v45 = vsel %vm492_vm1, %v486_v35, %v491_v43 }
 0x145   : > { %v2113_v46 = vpop.eup %2112  ;;  %v496_v47 = vsel %vm494_vm2, %v495_v44, %v493_v45 }
 0x146   : > { %v2115_v48 = vpop.eup %2114  ;;  %v498_v49 = vmul.f32 %v2113_v46, %v487_v38  ;;  %v518_v51 = vadd.f32 1e-05, %v496_v47 }
 0x147   : > { %v505_v53 = vmul.f32 %v2115_v48, %v488_v39 }
 0x148   : > { %v500_v54 = vsel %vm499_vm4, %v487_v38, %v498_v49  ;;  %2118 = vrcp.f32 %v518_v51  ;;  %v660_v38 = vlaneseq }
 0x149   : > { %v2117_v55 = vpop.eup %2116  ;;  %v503_v56 = vsel %vm501_vm6, %v502_v52, %v500_v54  ;;  %v507_v57 = vsel %vm506_vm3, %v488_v39, %v505_v53 }
 0x14a   : > { %v519_v59 = vadd.f32 1e-05, %v503_v56  ;;  %v510_v60 = vsel %vm508_vm5, %v509_v50, %v507_v57  ;;  %v512_v61 = vmul.f32 %v2117_v55, %v489_v41  ;;  %v661_v39 = vshrl.u32 %v660_v38, 7 }
 0x14b   : > { %v520_v62 = vadd.f32 1e-05, %v510_v60  ;;  %v663_v40 = vand.u32 127, %v660_v38  ;;  %vm1689_vm5 = vcmask 523264  }
 0x14c   : > { %2120 = vrcp.f32 %v519_v59  ;;  %v514_v63 = vsel %vm513_vm7, %v489_v41, %v512_v61 }
 0x14d   : > { %2122 = vrcp.f32 %v520_v62  ;;  %v517_v3 = vsel %vm515_vm8, %v516_v58, %v514_v63  ;;  %vm664_vm10 = vcmp.le.s32.totalorder %v663_v40, %v661_v39 }
 0x14e   : > { %v521_v4 = vadd.f32 1e-05, %v517_v3 }
 0x150   : > { %2124 = vrcp.f32 %v521_v4 }
 0x152   : > { %v2119_v6 = vpop.eup %2118 }
 0x153   : > { %v526_v8 = vmul.f32 %v2119_v6, %v2281_v12 }
 0x155   : > { %v537_v10 = vmul.f32 %v1860_v7, %v526_v8 }
 0x156   : > { %v2121_v11 = vpop.eup %2120 }
 0x157   : > { %v2123_v14 = vpop.eup %2122  ;;  %v548_v15 = vadd.f32 %v1861_v9, %v537_v10  ;;  %v527_v16 = vmul.f32 %v2121_v11, %v2291_v20  ;;  %v2174_v20 = vmov 0.0  }
 0x158   : > { %v528_v17 = vmul.f32 %v2123_v14, %v2284_v13  ;;  %1973 = vmatprep.subr.mxu1 %v2174_v20  ;;  %1968 = vmatprep.subr.mxu0 %v2174_v20  ;;  %v1862_v13 = vld [vmem:[%s2534_s4] ss:$0 sm:$0xff] }
 0x159   : > { %1962 = vmatprep.mubr.msk.f32.mxu0 %vm448_vm0, %v548_v15  ;;  %v538_v18 = vmul.f32 %v1860_v7, %v527_v16  ;;  %1975 = vmatprep.mubr.msk.f32.mxu1 %vm2175_vm9, %v2174_v20 }
 0x15a   : > { %v2125_v19 = vpop.eup %2124  ;;  %v539_v22 = vmul.f32 %v1860_v7, %v528_v17 }
 0x15b   : > { %v549_v23 = vadd.f32 %v1861_v9, %v538_v18  ;;  %v529_v12 = vmul.f32 %v2125_v19, %v2294_v21 }
 0x15c   : > { %v550_v24 = vadd.f32 %v1861_v9, %v539_v22 }
 0x15d   : > { %1963 = vmatmul.mubr.msk.f32.vlgmr.msra.gmra.mrb[0].mxu0 %vm448_vm0, %v549_v23  ;;  %v540_v25 = vmul.f32 %v1860_v7, %v529_v12 }
 0x15e   : > { %1965 = vmatprep.mubr.msk.f32.mxu0 %vm448_vm0, %v550_v24 }
 0x15f   : > { %v551_v26 = vadd.f32 %v1861_v9, %v540_v25  ;;  %v1328_v25 = vld [vmem:[%s2535_s5] sm:$0xff] }
 0x161   : > { %1966 = vmatmul.mubr.msk.f32.gmra.mrb[2].mxu0 %vm448_vm0, %v551_v26  ;;  %v1329_v26 = vld [vmem:[%s2535_s5 + $0x8] sm:$0xff] }
 0x162   : > { %1970 = vmatprep.mubr.msk.f32.mxu0 %vm2175_vm9, %v2174_v20 }
 0x230   : > { %v1964_v21 = vpop.f32.mrb[0].mxu0 }
 0x231   : > { %v2339_v27 = vadd.f32 %v1964_v21, %v1862_v13  ;;  %v641_v28 = vpop.f32.mrb[1].mxu0 }
 0x232   : > { %v2341_v29 = vadd.f32 %v1862_v13, %v641_v28 }
 0x233   : > { %743 = vrot.lane.b32.xlu1 %v2339_v27, %s2176_s15 }
 0x234   : > { %666 = vrot.lane.b32.xlu0 %v2341_v29, %s2176_s15  ;;  %v1967_v30 = vpop.f32.mrb[2].mxu0 }
 0x235   : > { %v651_v31 = vpop.f32.mrb[3].mxu0  ;;  %v2348_v33 = vadd.f32 %v1967_v30, %v1862_v13  ;;  %v1330_v30 = vld [vmem:[%s2535_s5 + $0x10] sm:$0xff] }
 0x236   : > { %v2345_v32 = vadd.f32 %v1862_v13, %v651_v31  ;;  %v1331_v31 = vld [vmem:[%s2535_s5 + $0x18] sm:$0xff] }
 0x238   : > { %820 = vrot.lane.b32.xlu1 %v2345_v32, %s2176_s15 }
 0x23c   : > { %897 = vrot.lane.b32.xlu1 %v2348_v33, %s2176_s15 }
 0x2a5   : > { %v744_v34 = vpop.permute.xlu1 %743 }
 0x2a6   : > { %1974 = vmatpush3.xpose.msk.msra.mxu1 %vm448_vm0, %v744_v34  ;;  %v667_v35 = vpop.permute.xlu0 %666 }
 0x2a7   : > { %1969 = vmatpush3.xpose.msk.msra.mxu0 %vm448_vm0, %v667_v35  ;;  %1978 = vmatprep.subr.mxu1 %v2174_v20  ;;  %v2070_v35 = vpack.c.bf16 %v1331_v31, %v1330_v30 }
 0x2a8   : > { %1983 = vmatprep.subr.mxu0 %v2174_v20 }
 0x2a9   : > { %1976 = vmatmul.mubr.msk.f32.vlgmr.msra.gmra.mrb[0].mxu1 %vm448_vm0, %v2339_v27 }
 0x2aa   : > { %v821_v36 = vpop.permute.xlu1 %820  ;;  %1971 = vmatmul.mubr.msk.f32.vlgmr.msra.gmra.mrb[4].mxu0 %vm448_vm0, %v2341_v29  ;;  %1980 = vmatprep.mubr.msk.f32.mxu1 %vm2175_vm9, %v2174_v20 }
 0x2ab   : > { %1979 = vmatpush3.xpose.msk.msra.mxu1 %vm448_vm0, %v821_v36  ;;  %1985 = vmatprep.mubr.msk.f32.mxu0 %vm2175_vm9, %v2174_v20 }
 0x2ac   : > { %1988 = vmatprep.subr.mxu1 %v2174_v20 }
 0x2ae   : > { %1981 = vmatmul.mubr.msk.f32.vlgmr.msra.gmra.mrb[2].mxu1 %vm448_vm0, %v2345_v32  ;;  %v898_v37 = vpop.permute.xlu1 %897 }
 0x2af   : > { %1984 = vmatpush3.xpose.msk.msra.mxu0 %vm448_vm0, %v898_v37  ;;  %1990 = vmatprep.mubr.msk.f32.mxu1 %vm2175_vm9, %v2174_v20 }
 0x2b0   : > { %1993 = vmatprep.subr.mxu0 %v2174_v20 }
 0x2b2   : > { %1986 = vmatmul.mubr.msk.f32.vlgmr.msra.gmra.mrb[6].mxu0 %vm448_vm0, %v2348_v33 }
 0x2b3   : > { %1995 = vmatprep.mubr.msk.f32.mxu0 %vm2175_vm9, %v2174_v20 }
 0x37c   : > { %v815_v41 = vpop.f32.mrb[0].mxu1 }
 0x37d   : > { %v976_v42 = vsel %vm664_vm10, %v815_v41, -1e+30  ;;  %v738_v43 = vpop.f32.mrb[4].mxu0  ;;  %v1977_v44 = vpop.f32.mrb[1].mxu1 }
 0x37e   : > { %v975_v45 = vsel %vm664_vm10, %v738_v43, -1e+30  ;;  %v1972_v46 = vpop.f32.mrb[5].mxu0  ;;  %v983_v47 = vsel %vm979_vm11, %v976_v42, -inf }
 0x37f   : > { %984 = vmax.xlane.f32.xlu1 %v983_v47  ;;  %v980_v48 = vsel %vm979_vm11, %v975_v45, -inf  ;;  %v1879_v47 = vld [vmem:[%s2536_s6] ss:$0 sm:$0xff] }
 0x380   : > { %981 = vmax.xlane.f32.xlu0 %v980_v48 }
 0x381   : > { %v892_v49 = vpop.f32.mrb[2].mxu1 }
 0x382   : > { %v977_v50 = vsel %vm664_vm10, %v892_v49, -1e+30  ;;  %v1982_v51 = vpop.f32.mrb[3].mxu1 }
 0x383   : > { %v986_v52 = vsel %vm979_vm11, %v977_v50, -inf }
 0x384   : > { %987 = vmax.xlane.f32.xlu0 %v986_v52 }
 0x385   : > { %v969_v53 = vpop.f32.mrb[6].mxu0 }
 0x386   : > { %v978_v54 = vsel %vm664_vm10, %v969_v53, -1e+30  ;;  %v1987_v55 = vpop.f32.mrb[7].mxu0 }
 0x387   : > { %v989_v56 = vsel %vm979_vm11, %v978_v54, -inf }
 0x388   : > { %990 = vmax.xlane.f32.xlu0 %v989_v56 }
 0x40c   : > { %v985_v57 = vpop.xlane.xlu1 %984 }
 0x40d   : > { %v993_v58 = vsub.f32 %v976_v42, %v985_v57  ;;  %v982_v59 = vpop.xlane.xlu0 %981 }
 0x40e   : > { %v992_v60 = vsub.f32 %v975_v45, %v982_v59 }
 0x40f   : > { %v998_v61 = vmul.f32 1.442695, %v993_v58 }
 0x410   : > { %v996_v62 = vmul.f32 1.442695, %v992_v60 }
 0x411   : > { %2126 = vpow2.f32 %v998_v61  ;;  %v988_v63 = vpop.xlane.xlu0 %987 }
 0x412   : > { %2128 = vpow2.f32 %v996_v62  ;;  %v994_v3 = vsub.f32 %v977_v50, %v988_v63 }
 0x414   : > { %v1000_v4 = vmul.f32 1.442695, %v994_v3 }
 0x415   : > { %v991_v14 = vpop.xlane.xlu0 %990 }
 0x416   : > { %2130 = vpow2.f32 %v1000_v4  ;;  %v995_v15 = vsub.f32 %v978_v54, %v991_v14  ;;  %v1544_v14 = vld [vmem:[%s2539_s9 + $0x10] sm:$0xff] }
 0x418   : > { %v1002_v16 = vmul.f32 1.442695, %v995_v15 }
 0x41a   : > { %2132 = vpow2.f32 %v1002_v16  ;;  %v1545_v16 = vld [vmem:[%s2539_s9 + $0x18] sm:$0xff] }
 0x41b   : > { %v2127_v6 = vpop.eup %2126 }
 0x41c   : > { %v2129_v7 = vpop.eup %2128  ;;  %v1007_v8 = vsel %vm979_vm11, %v2127_v6, 0.0 }
 0x41d   : > { %1008 = vadd.xlane.f32.xlu1 %v1007_v8  ;;  %v1004_v9 = vsel %vm979_vm11, %v2129_v7, 0.0 }
 0x41e   : > { %1005 = vadd.xlane.f32.xlu0 %v1004_v9 }
 0x420   : > { %v2131_v10 = vpop.eup %2130 }
 0x421   : > { %v1010_v11 = vsel %vm979_vm11, %v2131_v10, 0.0 }
 0x422   : > { %1011 = vadd.xlane.f32.xlu0 %v1010_v11  ;;  %v1543_v11 = vld [vmem:[%s2539_s9 + $0x8] sm:$0xff] }
 0x424   : > { %v2133_v17 = vpop.eup %2132 }
 0x425   : > { %v1013_v18 = vsel %vm979_vm11, %v2133_v17, 0.0 }
 0x42e   : > { %1100 = vrot.lane.b32.xlu1 %v2339_v27, %s2177_s16 }
 0x432   : > { %1176 = vrot.lane.b32.xlu1 %v2345_v32, %s2177_s16 }
 0x438   : > { %1024 = vrot.lane.b32.xlu0 %v2341_v29, %s2177_s16  ;;  %v2066_v29 = vpack.c.bf16 %v1329_v26, %v1328_v25 }
 0x456   : > { %1014 = vadd.xlane.f32.xlu1 %v1013_v18 }
 0x467   : > { %1252 = vrot.lane.b32.xlu1 %v2348_v33, %s2177_s16 }
 0x4aa   : > { %v1009_v19 = vpop.xlane.xlu1 %1008 }
 0x4ab   : > { %2134 = vrcp.f32 %v1009_v19  ;;  %v1006_v22 = vpop.xlane.xlu0 %1005 }
 0x4ac   : > { %2136 = vrcp.f32 %v1006_v22 }
 0x4ae   : > { %v1101_v23 = vpop.permute.xlu1 %1100 }
 0x4af   : > { %1994 = vmatpush3.msra.mxu0 %v1101_v23  ;;  %v1012_v12 = vpop.xlane.xlu0 %1011 }
 0x4b0   : > { %2138 = vrcp.f32 %v1012_v12  ;;  %2003 = vmatprep.subr.mxu0 %v2174_v20 }
 0x4b2   : > { %v1177_v32 = vpop.permute.xlu1 %1176 }
 0x4b3   : > { %v1025_v24 = vpop.permute.xlu0 %1024 }
 0x4b4   : > { %1989 = vmatpush3.msra.mxu1 %v1025_v24 }
 0x4b5   : > { %v2135_v13 = vpop.eup %2134  ;;  %1998 = vmatprep.subr.mxu1 %v2174_v20 }
 0x4b6   : > { %v2137_v21 = vpop.eup %2136  ;;  %v1021_v27 = vmul.f32 %v2135_v13, %v2127_v6 }
 0x4b7   : > { %v1020_v28 = vmul.f32 %v2137_v21, %v2129_v7 }
 0x4b8   : > { %1996 = vmatmul.mubr.msk.f32.vlgmr.msra.gmra.mrb[8].mxu0 %vm979_vm11, %v1021_v27 }
 0x4b9   : > { %1991 = vmatmul.mubr.msk.f32.vlgmr.msra.gmra.mrb[4].mxu1 %vm979_vm11, %v1020_v28  ;;  %2005 = vmatprep.mubr.msk.f32.mxu0 %vm2175_vm9, %v2174_v20 }
 0x4ba   : > { %v2139_v33 = vpop.eup %2138  ;;  %1999 = vmatpush3.msra.mxu1 %v1177_v32  ;;  %2000 = vmatprep.mubr.msk.f32.mxu1 %vm2175_vm9, %v2174_v20 }
 0x4bb   : > { %v1022_v34 = vmul.f32 %v2139_v33, %v2131_v10  ;;  %2067 = vmatprep.subr.bf16.mxu1 %v2066_v29  ;;  %v1542_v10 = vld [vmem:[%s2539_s9] sm:$0xff] }
 0x4bc   : > { %v2074_v15 = vpack.c.bf16 %v1543_v11, %v1542_v10 }
 0x4bd   : > { %2001 = vmatmul.mubr.msk.f32.vlgmr.msra.gmra.mrb[6].mxu1 %vm979_vm11, %v1022_v34 }
 0x4be   : > { %2069 = vmatpush3.bf16.msra.mxu1 %v2066_v29 }
 0x4bf   : > { %2071 = vmatprep.subr.bf16.mxu1 %v2070_v35 }
 0x4c2   : > { %2073 = vmatpush3.bf16.msra.mxu1 %v2070_v35 }
 0x4e3   : > { %v1015_v36 = vpop.xlane.xlu1 %1014 }
 0x4e4   : > { %2140 = vrcp.f32 %v1015_v36 }
 0x4e7   : > { %v1253_v37 = vpop.permute.xlu1 %1252 }
 0x4e8   : > { %2004 = vmatpush3.msra.mxu0 %v1253_v37 }
 0x4e9   : > { %2075 = vmatprep.subr.bf16.mxu0 %v2074_v15 }
 0x4ee   : > { %v2141_v38 = vpop.eup %2140 }
 0x4ef   : > { %v1023_v39 = vmul.f32 %v2141_v38, %v2133_v17  ;;  %v2078_v17 = vpack.c.bf16 %v1545_v16, %v1544_v14 }
 0x4f1   : > { %2006 = vmatmul.mubr.msk.f32.vlgmr.msra.gmra.mrb[10].mxu0 %vm979_vm11, %v1023_v39 }
 0x4f2   : > { %2077 = vmatpush3.bf16.msra.mxu0 %v2074_v15 }
 0x4f3   : > { %2079 = vmatprep.subr.bf16.mxu0 %v2078_v17 }
 0x4f6   : > { %2081 = vmatpush3.bf16.msra.mxu0 %v2078_v17 }
 0x58b   : > { %v1172_v40 = vpop.f32.mrb[8].mxu0 }
 0x58c   : > { %v1096_v41 = vpop.f32.mrb[4].mxu1  ;;  %v1997_v42 = vpop.f32.mrb[9].mxu0 }
 0x58d   : > { %v1992_v20 = vpop.f32.mrb[5].mxu1  ;;  %2016 = vmatprep.mubr.msk.f32.mxu1 %vm448_vm0, %v1096_v41 }
 0x58e   : > { %2017 = vmatmul.mubr.msk.f32.vlgmr.msra.gmra.mrb[8].mxu1 %vm448_vm0, %v1172_v40 }
 0x590   : > { %v1248_v43 = vpop.f32.mrb[6].mxu1 }
 0x591   : > { %v2002_v44 = vpop.f32.mrb[7].mxu1  ;;  %2019 = vmatprep.mubr.msk.f32.mxu1 %vm448_vm0, %v1248_v43  ;;  %v1884_v43 = vld [vmem:[%s2537_s7] ss:$0 sm:$0xff] }
 0x5c4   : > { %v1324_v45 = vpop.f32.mrb[10].mxu0 }
 0x5c5   : > { %v2007_v46 = vpop.f32.mrb[11].mxu0  ;;  %2020 = vmatmul.mubr.msk.f32.gmra.mrb[10].mxu1 %vm448_vm0, %v1324_v45 }
 0x661   : > { %v2018_v48 = vpop.f32.mrb[8].mxu1 }
 0x662   : > { %v1423_v49 = vadd.f32 %v2018_v48, %v1879_v47  ;;  %v1417_v50 = vpop.f32.mrb[9].mxu1 }
 0x663   : > { %v1418_v51 = vadd.f32 %v1879_v47, %v1417_v50 }
 0x664   : > { %v2421_v52 = vadd.f32 %v1423_v49, %v2274_v5 }
 0x665   : > { %v2424_v53 = vadd.f32 %v1418_v51, %v2264_v0 }
 0x666   : > { %v1443_v54 = vsel %vm448_vm0, %v2421_v52, 0.0 }
 0x667   : > { %1444 = vadd.xlane.f32.xlu1 %v1443_v54  ;;  %v1440_v55 = vsel %vm448_vm0, %v2424_v53, 0.0 }
 0x668   : > { %1441 = vadd.xlane.f32.xlu0 %v1440_v55 }
 0x698   : > { %v2021_v56 = vpop.f32.mrb[10].mxu1 }
 0x699   : > { %v1427_v57 = vpop.f32.mrb[11].mxu1  ;;  %v1433_v58 = vadd.f32 %v2021_v56, %v1879_v47 }
 0x69a   : > { %v1428_v59 = vadd.f32 %v1879_v47, %v1427_v57  ;;  %v1885_v47 = vld [vmem:[%s2538_s8] ss:$0 sm:$0xff] }
 0x69b   : > { %v2434_v5 = vadd.f32 %v1433_v58, %v2266_v1 }
 0x69c   : > { %v2431_v60 = vadd.f32 %v1428_v59, %v2268_v2 }
 0x69d   : > { %v1449_v61 = vsel %vm448_vm0, %v2434_v5, 0.0 }
 0x69e   : > { %v1446_v0 = vsel %vm448_vm0, %v2431_v60, 0.0 }
 0x69f   : > { %1447 = vadd.xlane.f32.xlu0 %v1446_v0 }
 0x6a3   : > { %1450 = vadd.xlane.f32.xlu0 %v1449_v61 }
 0x6f4   : > { %v1445_v62 = vpop.xlane.xlu1 %1444 }
 0x6f5   : > { %v1453_v63 = vmul.f32 0.03125, %v1445_v62  ;;  %v1442_v3 = vpop.xlane.xlu0 %1441 }
 0x6f6   : > { %v1452_v4 = vmul.f32 0.03125, %v1442_v3 }
 0x6f7   : > { %v1457_v6 = vsub.f32 %v2421_v52, %v1453_v63 }
 0x6f8   : > { %v1456_v2 = vsub.f32 %v2424_v53, %v1452_v4 }
 0x6f9   : > { %v1461_v7 = vmul.f32 %v1457_v6, %v1457_v6 }
 0x6fa   : > { %v1460_v8 = vmul.f32 %v1456_v2, %v1456_v2 }
 0x6fb   : > { %v1467_v1 = vsel %vm448_vm0, %v1461_v7, 0.0 }
 0x6fc   : > { %1468 = vadd.xlane.f32.xlu1 %v1467_v1  ;;  %v1464_v9 = vsel %vm448_vm0, %v1460_v8, 0.0 }
 0x6fd   : > { %1465 = vadd.xlane.f32.xlu0 %v1464_v9 }
 0x72c   : > { %v1448_v18 = vpop.xlane.xlu0 %1447 }
 0x72d   : > { %v1454_v19 = vmul.f32 0.03125, %v1448_v18  ;;  %v1674_v18 = vld [vmem:[%s2541_s11] sm:$0xff] }
 0x72f   : > { %v2457_v22 = vsub.f32 %v2431_v60, %v1454_v19  ;;  %v1675_v19 = vld [vmem:[%s2541_s11 + $0x8] sm:$0xff] }
 0x730   : > { %v1451_v23 = vpop.xlane.xlu0 %1450 }
 0x731   : > { %v1455_v12 = vmul.f32 0.03125, %v1451_v23  ;;  %v1462_v24 = vmul.f32 %v2457_v22, %v2457_v22  ;;  %v1676_v23 = vld [vmem:[%s2541_s11 + $0x10] sm:$0xff] }
 0x733   : > { %v2462_v25 = vsub.f32 %v2434_v5, %v1455_v12  ;;  %v1470_v26 = vsel %vm448_vm0, %v1462_v24, 0.0  ;;  %v1677_v12 = vld [vmem:[%s2541_s11 + $0x18] sm:$0xff] }
 0x734   : > { %1471 = vadd.xlane.f32.xlu0 %v1470_v26  ;;  %v2086_v24 = vpack.c.bf16 %v1677_v12, %v1676_v23  ;;  %v1679_v26 = vld [vmem:[%s2541_s11 + $0x28] sm:$0xff] }
 0x735   : > { %v1463_v13 = vmul.f32 %v2462_v25, %v2462_v25 }
 0x737   : > { %v1473_v21 = vsel %vm448_vm0, %v1463_v13, 0.0 }
 0x738   : > { %1474 = vadd.xlane.f32.xlu1 %v1473_v21  ;;  %v1680_v21 = vld [vmem:[%s2541_s11 + $0x30] sm:$0xff] }
 0x789   : > { %v1469_v27 = vpop.xlane.xlu1 %1468 }
 0x78a   : > { %v1477_v28 = vmul.f32 0.03125, %v1469_v27  ;;  %v1466_v29 = vpop.xlane.xlu0 %1465  ;;  %v1681_v27 = vld [vmem:[%s2541_s11 + $0x38] sm:$0xff] }
 0x78b   : > { %v1476_v30 = vmul.f32 0.03125, %v1466_v29  ;;  %v1886_v29 = vld [vmem:[%s2540_s10] ss:$0 sm:$0xff] }
 0x78c   : > { %2142 = vrsqrt.f32 %v1477_v28  ;;  %vm1489_vm12 = vcmp.eq.f32.partialorder %v1477_v28, inf  ;;  %v1492_v34 = vand.u32 2147483648, %v1477_v28  ;;  %vm1491_vm13 = vcmp.eq.f32.partialorder %v1477_v28, 0.0 }
 0x78d   : > { %2144 = vrsqrt.f32 %v1476_v30  ;;  %vm1482_vm14 = vcmp.eq.f32.partialorder %v1476_v30, inf  ;;  %v1485_v37 = vand.u32 2147483648, %v1476_v30  ;;  %vm1484_vm15 = vcmp.eq.f32.partialorder %v1476_v30, 0.0 }
 0x796   : > { %v2143_v31 = vpop.eup %2142 }
 0x797   : > { %v2145_v32 = vpop.eup %2144  ;;  %v1488_v33 = vmul.f32 %v2143_v31, %v1477_v28 }
 0x798   : > { %v1481_v35 = vmul.f32 %v2145_v32, %v1476_v30 }
 0x799   : > { %v1490_v36 = vsel %vm1489_vm12, %v1477_v28, %v1488_v33  ;;  %v2094_v28 = vpack.c.bf16 %v1681_v27, %v1680_v21 }
 0x79a   : > { %v1493_v38 = vsel %vm1491_vm13, %v1492_v34, %v1490_v36  ;;  %v1483_v39 = vsel %vm1482_vm14, %v1476_v30, %v1481_v35 }
 0x79b   : > { %v1509_v40 = vadd.f32 1e-05, %v1493_v38  ;;  %v1486_v41 = vsel %vm1484_vm15, %v1485_v37, %v1483_v39 }
 0x79c   : > { %v1508_v42 = vadd.f32 1e-05, %v1486_v41 }
 0x79d   : > { %2146 = vrcp.f32 %v1509_v40 }
 0x79e   : > { %2148 = vrcp.f32 %v1508_v42 }
 0x7a7   : > { %v2147_v20 = vpop.eup %2146 }
 0x7a8   : > { %v2149_v44 = vpop.eup %2148  ;;  %v1517_v45 = vmul.f32 %v2147_v20, %v1457_v6 }
 0x7a9   : > { %v1516_v46 = vmul.f32 %v2149_v44, %v1456_v2 }
 0x7aa   : > { %v1528_v48 = vmul.f32 %v1884_v43, %v1517_v45 }
 0x7ab   : > { %v1527_v49 = vmul.f32 %v1884_v43, %v1516_v46 }
 0x7ac   : > { %v1539_v51 = vadd.f32 %v1885_v47, %v1528_v48 }
 0x7ad   : > { %v1538_v50 = vadd.f32 %v1885_v47, %v1527_v49 }
 0x7af   : > { %2030 = vmatprep.mubr.msk.f32.mxu0 %vm448_vm0, %v1538_v50 }
 0x7b0   : > { %2031 = vmatmul.mubr.msk.f32.vlgmr.msra.gmra.mrb[12].mxu0 %vm448_vm0, %v1539_v51 }
 0x7c1   : > { %v1472_v54 = vpop.xlane.xlu0 %1471 }
 0x7c2   : > { %v1478_v55 = vmul.f32 0.03125, %v1472_v54 }
 0x7c4   : > { %2150 = vrsqrt.f32 %v1478_v55  ;;  %vm1496_vm1 = vcmp.eq.f32.partialorder %v1478_v55, inf  ;;  %v1499_v0 = vand.u32 2147483648, %v1478_v55  ;;  %vm1498_vm2 = vcmp.eq.f32.partialorder %v1478_v55, 0.0 }
 0x7c5   : > { %v1475_v56 = vpop.xlane.xlu1 %1474 }
 0x7c6   : > { %v1479_v57 = vmul.f32 0.03125, %v1475_v56 }
 0x7c8   : > { %2152 = vrsqrt.f32 %v1479_v57  ;;  %vm1503_vm3 = vcmp.eq.f32.partialorder %v1479_v57, inf  ;;  %v1506_v6 = vand.u32 2147483648, %v1479_v57  ;;  %vm1505_vm4 = vcmp.eq.f32.partialorder %v1479_v57, 0.0 }
 0x7ce   : > { %v2151_v58 = vpop.eup %2150 }
 0x7cf   : > { %v1495_v59 = vmul.f32 %v2151_v58, %v1478_v55 }
 0x7d1   : > { %v1497_v61 = vsel %vm1496_vm1, %v1478_v55, %v1495_v59  ;;  %v1895_v59 = vld [vmem:[%s2542_s12] ss:$0 sm:$0xff] }
 0x7d2   : > { %v2153_v62 = vpop.eup %2152  ;;  %v1500_v63 = vsel %vm1498_vm2, %v1499_v0, %v1497_v61 }
 0x7d3   : > { %v1510_v3 = vadd.f32 1e-05, %v1500_v63  ;;  %v1502_v4 = vmul.f32 %v2153_v62, %v1479_v57 }
 0x7d5   : > { %2154 = vrcp.f32 %v1510_v3  ;;  %v1504_v2 = vsel %vm1503_vm3, %v1479_v57, %v1502_v4 }
 0x7d6   : > { %v1507_v7 = vsel %vm1505_vm4, %v1506_v6, %v1504_v2 }
 0x7d7   : > { %v1511_v8 = vadd.f32 1e-05, %v1507_v7 }
 0x7d9   : > { %2156 = vrcp.f32 %v1511_v8 }
 0x7df   : > { %v2155_v1 = vpop.eup %2154 }
 0x7e0   : > { %v1518_v9 = vmul.f32 %v2155_v1, %v2457_v22  ;;  %v2082_v22 = vpack.c.bf16 %v1675_v19, %v1674_v18 }
 0x7e2   : > { %v1529_v10 = vmul.f32 %v1884_v43, %v1518_v9  ;;  %2083 = vmatprep.subr.bf16.mxu1 %v2082_v22 }
 0x7e3   : > { %v2157_v11 = vpop.eup %2156  ;;  %2085 = vmatpush3.bf16.msra.mxu1 %v2082_v22 }
 0x7e4   : > { %v1540_v14 = vadd.f32 %v1885_v47, %v1529_v10  ;;  %v1519_v15 = vmul.f32 %v2157_v11, %v2462_v25  ;;  %2087 = vmatprep.subr.bf16.mxu1 %v2086_v24  ;;  %v1678_v25 = vld [vmem:[%s2541_s11 + $0x20] sm:$0xff] }
 0x7e5   : > { %v2090_v13 = vpack.c.bf16 %v1679_v26, %v1678_v25 }
 0x7e6   : > { %2033 = vmatprep.mubr.msk.f32.mxu0 %vm448_vm0, %v1540_v14  ;;  %v1530_v16 = vmul.f32 %v1884_v43, %v1519_v15 }
 0x7e7   : > { %2089 = vmatpush3.bf16.msra.mxu1 %v2086_v24 }
 0x7e8   : > { %v1541_v17 = vadd.f32 %v1885_v47, %v1530_v16  ;;  %2091 = vmatprep.subr.bf16.mxu1 %v2090_v13 }
 0x7ea   : > { %2034 = vmatmul.mubr.msk.f32.gmra.mrb[14].mxu0 %vm448_vm0, %v1541_v17 }
 0x7eb   : > { %2093 = vmatpush3.bf16.msra.mxu1 %v2090_v13 }
 0x7ec   : > { %2095 = vmatprep.subr.bf16.mxu1 %v2094_v28 }
 0x7ef   : > { %2097 = vmatpush3.bf16.msra.mxu1 %v2094_v28 }
 0x883   : > { %v2032_v30 = vpop.f32.mrb[12].mxu0 }
 0x884   : > { %v1637_v31 = vadd.f32 %v2032_v30, %v1886_v29  ;;  %v1631_v32 = vpop.f32.mrb[13].mxu0 }
 0x885   : > { %v1632_v33 = vadd.f32 %v1886_v29, %v1631_v32 }
 0x886   : > { %v1655_v34 = vmin.f32 %v1637_v31, 0.0  ;;  %vm1651_vm7 = vcmp.gt.f32.partialorder %v1637_v31, 0.0 }
 0x887   : > { %v1654_v35 = vmin.f32 %v1632_v33, 0.0  ;;  %vm1650_vm6 = vcmp.gt.f32.partialorder %v1632_v33, 0.0 }
 0x888   : > { %v1660_v36 = vmul.f32 1.442695, %v1655_v34 }
 0x889   : > { %v1658_v37 = vmul.f32 1.442695, %v1654_v35 }
 0x88a   : > { %2158 = vpow2.f32 %v1660_v36 }
 0x88b   : > { %2160 = vpow2.f32 %v1658_v37 }
 0x894   : > { %v2159_v38 = vpop.eup %2158 }
 0x895   : > { %v2161_v39 = vpop.eup %2160  ;;  %v1892_v40 = vadd.f32 -1.0, %v2159_v38 }
 0x896   : > { %v1891_v41 = vadd.f32 -1.0, %v2161_v39 }
 0x897   : > { %v1671_v20 = vsel %vm1651_vm7, %v1637_v31, %v1892_v40 }
 0x898   : > { %v1670_v42 = vsel %vm1650_vm6, %v1632_v33, %v1891_v41 }
 0x899   : > { %2052 = vmatprep.mubr.msk.f32.mxu1 %vm1689_vm5, %v1670_v42 }
 0x89a   : > { %2053 = vmatmul.mubr.msk.f32.vlgmr.msra.gmra.mrb[12].mxu1 %vm1689_vm5, %v1671_v20 }
 0x8bd   : > { %v2035_v43 = vpop.f32.mrb[14].mxu0 }
 0x8be   : > { %v1647_v44 = vadd.f32 %v2035_v43, %v1886_v29  ;;  %v1641_v45 = vpop.f32.mrb[15].mxu0 }
 0x8bf   : > { %v1642_v46 = vadd.f32 %v1886_v29, %v1641_v45 }
 0x8c0   : > { %v1657_v47 = vmin.f32 %v1647_v44, 0.0  ;;  %vm1653_vm9 = vcmp.gt.f32.partialorder %v1647_v44, 0.0 }
 0x8c1   : > { %v1656_v48 = vmin.f32 %v1642_v46, 0.0  ;;  %vm1652_vm8 = vcmp.gt.f32.partialorder %v1642_v46, 0.0 }
 0x8c2   : > { %v1664_v49 = vmul.f32 1.442695, %v1657_v47 }
 0x8c3   : > { %v1662_v50 = vmul.f32 1.442695, %v1656_v48 }
 0x8c4   : > { %2162 = vpow2.f32 %v1664_v49 }
 0x8c5   : > { %2164 = vpow2.f32 %v1662_v50 }
 0x8ce   : > { %v2163_v51 = vpop.eup %2162 }
 0x8cf   : > { %v2165_v54 = vpop.eup %2164  ;;  %v1894_v55 = vadd.f32 -1.0, %v2163_v51 }
 0x8d0   : > { %v1893_v56 = vadd.f32 -1.0, %v2165_v54 }
 0x8d1   : > { %v1673_v58 = vsel %vm1653_vm9, %v1647_v44, %v1894_v55 }
 0x8d2   : > { %v1672_v57 = vsel %vm1652_vm8, %v1642_v46, %v1893_v56 }
 0x8d3   : > { %2055 = vmatprep.mubr.msk.f32.mxu1 %vm1689_vm5, %v1672_v57 }
 0x8d4   : > { %2056 = vmatmul.mubr.msk.f32.gmra.mrb[14].mxu1 %vm1689_vm5, %v1673_v58 }
 0x96d   : > { %v2054_v0 = vpop.f32.mrb[12].mxu1 }
 0x96e   : > { %v1774_v61 = vadd.f32 %v2054_v0, %v1895_v59  ;;  %v1768_v62 = vpop.f32.mrb[13].mxu1 }
 0x96f   : > { %v1769_v63 = vadd.f32 %v1895_v59, %v1768_v62 }
 0x970   : > { %v1788_v4 = vadd.f32 %v1774_v61, %v2421_v52 }
 0x971   : > { %v1787_v3 = vadd.f32 %v1769_v63, %v2424_v53 }
 0x972   : > { %1792 = vst.msk [vmem:[%s442_s19 + $0x8] sm:$0xff] %vm448_vm0, %v1788_v4 }
 0x973   : > { %1791 = vst.msk [vmem:[%s442_s19] sm:$0xff] %vm448_vm0, %v1787_v3 }
 0x9a7   : > { %v2057_v6 = vpop.f32.mrb[14].mxu1 }
 0x9a8   : > { %v1784_v2 = vadd.f32 %v2057_v6, %v1895_v59  ;;  %v1778_v7 = vpop.f32.mrb[15].mxu1 }
 0x9a9   : > { %v1779_v8 = vadd.f32 %v1895_v59, %v1778_v7 }
 0x9aa   : > { %v1790_v9 = vadd.f32 %v1784_v2, %v2434_v5 }
 0x9ab   : > { %v1789_v1 = vadd.f32 %v1779_v8, %v2431_v60 }
 0x9ac   : > { %1794 = vst.msk [vmem:[%s442_s19 + $0x18] sm:$0xff] %vm448_vm0, %v1790_v9 }
 0x9ad   : > { %1793 = vst.msk [vmem:[%s442_s19 + $0x10] sm:$0xff] %vm448_vm0, %v1789_v1 }
 0x9ae PF: > { %s23_s25 = sadd.s32 1, %s2172_s25  }
 0x9af   : > { %p20_p4 = scmp.ge.s32.totalorder %s23_s25, 4  }
 0x9b1   :  { %22 = sbr.rel (!%p20_p4) target bundleno = 1 (0x1), region = 102 }

// kernel: transformer_forward.5
= control target key start
LH: loop header
LB: loop body
LE: loop exit
PB: predicated region body
PF: predicated region fallthrough
CT: control target
= control target key end

     0   :  { %s2455_s18 = smov 0   ;;  %s2762_s0 = inlined_call_operand.vmem [shape: f32[8,8,32], index: 0, kind: input, shape index: {}]   ;;  %s2763_s1 = inlined_call_operand.vmem [shape: f32[1,32], index: 1, kind: input, shape index: {}]   ;;  %s2764_s2 = inlined_call_operand.vmem [shape: f32[1,32], index: 2, kind: input, shape index: {}]   ;;  %s2765_s3 = inlined_call_operand.vmem [shape: f32[32,96], index: 3, kind: input, shape index: {}]   ;;  %s2766_s4 = inlined_call_operand.vmem [shape: f32[1,96], index: 4, kind: input, shape index: {}]   ;;  %s2767_s5 = inlined_call_operand.vmem [shape: f32[32,32], index: 5, kind: input, shape index: {}]   ;;  %s2768_s6 = inlined_call_operand.vmem [shape: f32[1,32], index: 6, kind: input, shape index: {}]   ;;  %s2769_s7 = inlined_call_operand.vmem [shape: f32[1,32], index: 7, kind: input, shape index: {}]   ;;  %s2770_s8 = inlined_call_operand.vmem [shape: f32[1,32], index: 8, kind: input, shape index: {}]   ;;  %s2771_s9 = inlined_call_operand.vmem [shape: f32[32,64], index: 9, kind: input, shape index: {}]   ;;  %s2772_s10 = inlined_call_operand.vmem [shape: f32[1,64], index: 10, kind: input, shape index: {}]   ;;  %s2773_s11 = inlined_call_operand.vmem [shape: f32[64,32], index: 11, kind: input, shape index: {}]   ;;  %s2774_s12 = inlined_call_operand.vmem [shape: f32[1,32], index: 12, kind: input, shape index: {}]   ;;  %s2775_s13 = inlined_call_operand.vmem [shape: f32[32,128], index: 13, kind: input, shape index: {}]   ;;  %s2776_s14 = inlined_call_operand.vmem [shape: f32[1,128], index: 14, kind: input, shape index: {}]   ;;  %s2777_s15 = inlined_call_operand.vmem [shape: f32[8,8,128], index: 15, kind: output, shape index: {}]  }
   0x1 LB: > { %s2013_s19 = sadd.s32 4294967295, %s2369_s18   ;;  %p2017_p0 = scmp.ge.s32.totalorder %s2369_s18, 1  ;;  %s2369_s18 = sphi %s2455_s18, %s25_s18  }
   0x2   : > { %p438_p1 = scmp.lt.s32.totalorder %s2369_s18, 3 }
   0x4   : > { %p439_p2 = pnand %p2017_p0, %p438_p1 }
   0x5   : > { %s2018_s20 = sshll.u32 (!%p439_p2), %s2013_s19, 2  ;;  %vm502_vm0 = vcmask (!%p439_p2), 261120   ;;  %v606_v28 = vld [vmem:[%s2765_s3] sm:$0xff] (!%p439_p2)  ;;  %v607_v29 = vld [vmem:[%s2765_s3 + $0x8] sm:$0xff] (!%p439_p2)  ;;  %v608_v30 = vld [vmem:[%s2765_s3 + $0x10] sm:$0xff] (!%p439_p2)  ;;  %vm2372_vm9 = vmmov (!%p439_p2), 0  }
   0x6   : > { %442 = sbr.rel (%p439_p2) target bundleno = 2658 (0xa62), region = 80  ;;  %p487_p3 = scmp.lt.s32.totalorder (!%p439_p2), %s2018_s20, 7  ;;  %v2247_v31 = vpack.c.bf16 (!%p439_p2), %v607_v29, %v606_v28  ;;  %v609_v32 = vld [vmem:[%s2765_s3 + $0x18] sm:$0xff] (!%p439_p2)  ;;  %vm1033_vm11 = vcmask (!%p439_p2), 64512  }
   0x7   : > { %v2251_v33 = vpack.c.bf16 (!%p439_p2), %v609_v32, %v608_v30  ;;  %s2373_s27 = smov (!%p439_p2), 96   ;;  %s2374_s28 = smov (!%p439_p2), 64  }
   0x8   : > { %2248 = vmatprep.subr.bf16.mxu0 (!%p439_p2), %v2247_v31 }
   0x9   : > { %2250 = vmatpush3.bf16.msra.mxu0 (!%p439_p2), %v2247_v31 }
   0xa   : > { %2252 = vmatprep.subr.bf16.mxu0 (!%p439_p2), %v2251_v33 }
   0xd   : > { %s2779_s20 = smov (!%p487_p3, %s2018_s20), 7  ;;  %2254 = vmatpush3.bf16.msra.mxu0 %v2251_v33 }
   0xe   : > { %s2019_s21 = sshll.u32 %s2779_s20, 3 }
   0xf   : > { %s490_s24 = scalar_lea.vmem %s2762_s0, %s2019_s21  ;;  %s496_s23 = scalar_lea.vmem %s2777_s15, %s2019_s21 }
  0x10   : > { %v2471_v0 = vld [vmem:[%s490_s24] sm:$0xff]  ;;  %v2473_v1 = vld [vmem:[%s490_s24 + $0x10] sm:$0xff]  ;;  %v2475_v2 = vld [vmem:[%s490_s24 + $0x8] sm:$0xff] }
  0x11   : > { %v503_v3 = vsel %vm502_vm0, %v2471_v0, 0.0  ;;  %v509_v4 = vsel %vm502_vm0, %v2473_v1, 0.0  ;;  %v2481_v5 = vld [vmem:[%s490_s24 + $0x18] sm:$0xff]  ;;  %v506_v6 = vsel %vm502_vm0, %v2475_v2, 0.0 }
  0x12   : > { %504 = vadd.xlane.f32.xlu0 %v503_v3  ;;  %510 = vadd.xlane.f32.xlu1 %v509_v4  ;;  %v512_v7 = vsel %vm502_vm0, %v2481_v5, 0.0 }
  0x16   : > { %507 = vadd.xlane.f32.xlu0 %v506_v6  ;;  %513 = vadd.xlane.f32.xlu1 %v512_v7  ;;  %v2022_v7 = vld [vmem:[%s2763_s1] ss:$0 sm:$0xff] }
  0x9f   : > { %v505_v8 = vpop.xlane.xlu0 %504  ;;  %v511_v9 = vpop.xlane.xlu1 %510 }
  0xa0   : > { %v516_v10 = vmul.f32 0.03125, %v505_v8  ;;  %v518_v11 = vmul.f32 0.03125, %v511_v9  ;;  %v2023_v9 = vld [vmem:[%s2764_s2] ss:$0 sm:$0xff] }
  0xa2   : > { %v2488_v12 = vsub.f32 %v2471_v0, %v516_v10  ;;  %v2491_v13 = vsub.f32 %v2473_v1, %v518_v11 }
  0xa3   : > { %v508_v14 = vpop.xlane.xlu0 %507  ;;  %v514_v15 = vpop.xlane.xlu1 %513 }
  0xa4   : > { %v517_v16 = vmul.f32 0.03125, %v508_v14  ;;  %v519_v17 = vmul.f32 0.03125, %v514_v15  ;;  %v524_v18 = vmul.f32 %v2488_v12, %v2488_v12  ;;  %v526_v19 = vmul.f32 %v2491_v13, %v2491_v13 }
  0xa6   : > { %v2498_v20 = vsub.f32 %v2475_v2, %v517_v16  ;;  %v2501_v21 = vsub.f32 %v2481_v5, %v519_v17  ;;  %v528_v22 = vsel %vm502_vm0, %v524_v18, 0.0  ;;  %v534_v23 = vsel %vm502_vm0, %v526_v19, 0.0 }
  0xa7   : > { %529 = vadd.xlane.f32.xlu0 %v528_v22 }
  0xa8   : > { %v525_v24 = vmul.f32 %v2498_v20, %v2498_v20  ;;  %v527_v25 = vmul.f32 %v2501_v21, %v2501_v21 }
  0xaa   : > { %v531_v26 = vsel %vm502_vm0, %v525_v24, 0.0  ;;  %v537_v27 = vsel %vm502_vm0, %v527_v25, 0.0 }
  0xab   : > { %535 = vadd.xlane.f32.xlu0 %v534_v23  ;;  %532 = vadd.xlane.f32.xlu1 %v531_v26 }
  0xaf   : > { %538 = vadd.xlane.f32.xlu1 %v537_v27 }
 0x134   : > { %v530_v34 = vpop.xlane.xlu0 %529 }
 0x135   : > { %v540_v35 = vmul.f32 0.03125, %v530_v34 }
 0x137   : > { %2307 = vrsqrt.f32 %v540_v35  ;;  %vm546_vm1 = vcmp.eq.f32.partialorder %v540_v35, inf  ;;  %v549_v44 = vand.u32 2147483648, %v540_v35  ;;  %vm548_vm2 = vcmp.eq.f32.partialorder %v540_v35, 0.0 }
 0x138   : > { %v533_v36 = vpop.xlane.xlu1 %532  ;;  %v536_v37 = vpop.xlane.xlu0 %535 }
 0x139   : > { %v541_v38 = vmul.f32 0.03125, %v533_v36  ;;  %v542_v39 = vmul.f32 0.03125, %v536_v37 }
 0x13b   : > { %2309 = vrsqrt.f32 %v541_v38  ;;  %vm553_vm3 = vcmp.eq.f32.partialorder %v541_v38, inf  ;;  %vm555_vm4 = vcmp.eq.f32.partialorder %v541_v38, 0.0  ;;  %v556_v51 = vand.u32 2147483648, %v541_v38 }
 0x13c   : > { %2311 = vrsqrt.f32 %v542_v39  ;;  %v539_v40 = vpop.xlane.xlu1 %538  ;;  %vm560_vm5 = vcmp.eq.f32.partialorder %v542_v39, inf  ;;  %v563_v54 = vand.u32 2147483648, %v542_v39  ;;  %vm562_vm6 = vcmp.eq.f32.partialorder %v542_v39, 0.0 }
 0x13d   : > { %v543_v41 = vmul.f32 0.03125, %v539_v40 }
 0x13f   : > { %2313 = vrsqrt.f32 %v543_v41  ;;  %vm567_vm7 = vcmp.eq.f32.partialorder %v543_v41, inf  ;;  %v570_v62 = vand.u32 2147483648, %v543_v41  ;;  %vm569_vm8 = vcmp.eq.f32.partialorder %v543_v41, 0.0 }
 0x141   : > { %v2308_v42 = vpop.eup %2307 }
 0x142   : > { %v545_v43 = vmul.f32 %v2308_v42, %v540_v35 }
 0x144   : > { %v547_v45 = vsel %vm546_vm1, %v540_v35, %v545_v43 }
 0x145   : > { %v2310_v46 = vpop.eup %2309  ;;  %v550_v47 = vsel %vm548_vm2, %v549_v44, %v547_v45 }
 0x146   : > { %v2312_v48 = vpop.eup %2311  ;;  %v552_v49 = vmul.f32 %v2310_v46, %v541_v38  ;;  %v572_v50 = vadd.f32 1e-05, %v550_v47 }
 0x147   : > { %v559_v52 = vmul.f32 %v2312_v48, %v542_v39 }
 0x148   : > { %v554_v53 = vsel %vm553_vm3, %v541_v38, %v552_v49  ;;  %2315 = vrcp.f32 %v572_v50  ;;  %v714_v38 = vlaneseq }
 0x149   : > { %v2314_v55 = vpop.eup %2313  ;;  %v557_v56 = vsel %vm555_vm4, %v556_v51, %v554_v53  ;;  %v561_v57 = vsel %vm560_vm5, %v542_v39, %v559_v52  ;;  %vm1743_vm5 = vcmask 523264  }
 0x14a   : > { %v573_v58 = vadd.f32 1e-05, %v557_v56  ;;  %v564_v59 = vsel %vm562_vm6, %v563_v54, %v561_v57  ;;  %v566_v60 = vmul.f32 %v2314_v55, %v543_v41  ;;  %v715_v39 = vshrl.u32 %v714_v38, 7 }
 0x14b   : > { %v574_v61 = vadd.f32 1e-05, %v564_v59  ;;  %v717_v40 = vand.u32 127, %v714_v38 }
 0x14c   : > { %2317 = vrcp.f32 %v573_v58  ;;  %v568_v63 = vsel %vm567_vm7, %v543_v41, %v566_v60 }
 0x14d   : > { %2319 = vrcp.f32 %v574_v61  ;;  %v571_v3 = vsel %vm569_vm8, %v570_v62, %v568_v63  ;;  %vm718_vm10 = vcmp.le.s32.totalorder %v717_v40, %v715_v39 }
 0x14e   : > { %v575_v4 = vadd.f32 1e-05, %v571_v3 }
 0x150   : > { %2321 = vrcp.f32 %v575_v4 }
 0x152   : > { %v2316_v6 = vpop.eup %2315 }
 0x153   : > { %v580_v8 = vmul.f32 %v2316_v6, %v2488_v12 }
 0x155   : > { %v591_v10 = vmul.f32 %v2022_v7, %v580_v8 }
 0x156   : > { %v2318_v11 = vpop.eup %2317 }
 0x157   : > { %v2320_v14 = vpop.eup %2319  ;;  %v602_v15 = vadd.f32 %v2023_v9, %v591_v10  ;;  %v581_v16 = vmul.f32 %v2318_v11, %v2498_v20  ;;  %v2371_v20 = vmov 0.0  }
 0x158   : > { %v582_v17 = vmul.f32 %v2320_v14, %v2491_v13  ;;  %2143 = vmatprep.subr.mxu1 %v2371_v20  ;;  %2158 = vmatprep.subr.mxu0 %v2371_v20  ;;  %v2024_v13 = vld [vmem:[%s2766_s4] ss:$0 sm:$0xff] }
 0x159   : > { %2137 = vmatprep.mubr.msk.f32.mxu0 %vm502_vm0, %v602_v15  ;;  %v592_v18 = vmul.f32 %v2022_v7, %v581_v16  ;;  %2145 = vmatprep.mubr.msk.f32.mxu1 %vm2372_vm9, %v2371_v20 }
 0x15a   : > { %v2322_v19 = vpop.eup %2321  ;;  %v593_v22 = vmul.f32 %v2022_v7, %v582_v17 }
 0x15b   : > { %v603_v23 = vadd.f32 %v2023_v9, %v592_v18  ;;  %v583_v12 = vmul.f32 %v2322_v19, %v2501_v21 }
 0x15c   : > { %v604_v24 = vadd.f32 %v2023_v9, %v593_v22 }
 0x15d   : > { %2138 = vmatmul.mubr.msk.f32.vlgmr.msra.gmra.mrb[0].mxu0 %vm502_vm0, %v603_v23  ;;  %v594_v25 = vmul.f32 %v2022_v7, %v583_v12 }
 0x15e   : > { %2140 = vmatprep.mubr.msk.f32.mxu0 %vm502_vm0, %v604_v24 }
 0x15f   : > { %v605_v26 = vadd.f32 %v2023_v9, %v594_v25 }
 0x161   : > { %2141 = vmatmul.mubr.msk.f32.gmra.mrb[2].mxu0 %vm502_vm0, %v605_v26 }
 0x162   : > { %2160 = vmatprep.mubr.msk.f32.mxu0 %vm2372_vm9, %v2371_v20 }
 0x230   : > { %v2139_v21 = vpop.f32.mrb[0].mxu0 }
 0x231   : > { %v2546_v27 = vadd.f32 %v2139_v21, %v2024_v13  ;;  %v695_v28 = vpop.f32.mrb[1].mxu0 }
 0x232   : > { %v2548_v29 = vadd.f32 %v2024_v13, %v695_v28 }
 0x233   : > { %797 = vrot.lane.b32.xlu1 %v2546_v27, %s2373_s27 }
 0x234   : > { %720 = vrot.lane.b32.xlu0 %v2548_v29, %s2373_s27  ;;  %v2142_v30 = vpop.f32.mrb[2].mxu0 }
 0x235   : > { %v705_v31 = vpop.f32.mrb[3].mxu0  ;;  %v2555_v33 = vadd.f32 %v2142_v30, %v2024_v13 }
 0x236   : > { %v2552_v32 = vadd.f32 %v2024_v13, %v705_v31 }
 0x238   : > { %874 = vrot.lane.b32.xlu1 %v2552_v32, %s2373_s27 }
 0x23c   : > { %951 = vrot.lane.b32.xlu1 %v2555_v33, %s2373_s27 }
 0x2a5   : > { %v798_v34 = vpop.permute.xlu1 %797 }
 0x2a6   : > { %v721_v35 = vpop.permute.xlu0 %720 }
 0x2a7   : > { %2144 = vmatpush3.xpose.msk.msra.mxu1 %vm502_vm0, %v721_v35  ;;  %v1383_v35 = vld [vmem:[%s2767_s5 + $0x8] sm:$0xff] }
 0x2a8   : > { %2148 = vmatprep.subr.mxu1 %v2371_v20 }
 0x2aa   : > { %v875_v36 = vpop.permute.xlu1 %874  ;;  %2146 = vmatmul.mubr.msk.f32.vlgmr.msra.gmra.mrb[0].mxu1 %vm502_vm0, %v2548_v29 }
 0x2ab   : > { %2149 = vmatpush3.xpose.msk.msra.mxu1 %vm502_vm0, %v798_v34  ;;  %2150 = vmatprep.mubr.msk.f32.mxu1 %vm2372_vm9, %v2371_v20  ;;  %v1382_v34 = vld [vmem:[%s2767_s5] sm:$0xff] }
 0x2ac   : > { %2153 = vmatprep.subr.mxu1 %v2371_v20 }
 0x2ae   : > { %v952_v37 = vpop.permute.xlu1 %951  ;;  %2151 = vmatmul.mubr.msk.f32.vlgmr.msra.gmra.mrb[2].mxu1 %vm502_vm0, %v2546_v27 }
 0x2af   : > { %2154 = vmatpush3.xpose.msk.msra.mxu1 %vm502_vm0, %v875_v36  ;;  %2159 = vmatpush3.xpose.msk.msra.mxu0 %vm502_vm0, %v952_v37  ;;  %v2255_v36 = vpack.c.bf16 %v1383_v35, %v1382_v34  ;;  %v1384_v37 = vld [vmem:[%s2767_s5 + $0x10] sm:$0xff] }
 0x2b0   : > { %2155 = vmatprep.mubr.msk.f32.mxu1 %vm2372_vm9, %v2371_v20  ;;  %2163 = vmatprep.subr.mxu1 %v2371_v20 }
 0x2b1   : > { %2168 = vmatprep.subr.mxu0 %v2371_v20 }
 0x2b2   : > { %2156 = vmatmul.mubr.msk.f32.vlgmr.msra.gmra.mrb[4].mxu1 %vm502_vm0, %v2552_v32  ;;  %2161 = vmatmul.mubr.msk.f32.vlgmr.msra.gmra.mrb[4].mxu0 %vm502_vm0, %v2555_v33 }
 0x2b3   : > { %2165 = vmatprep.mubr.msk.f32.mxu1 %vm2372_vm9, %v2371_v20  ;;  %2170 = vmatprep.mubr.msk.f32.mxu0 %vm2372_vm9, %v2371_v20 }
 0x37d   : > { %v792_v41 = vpop.f32.mrb[0].mxu1 }
 0x37e   : > { %v1029_v42 = vsel %vm718_vm10, %v792_v41, -1e+30  ;;  %v2147_v43 = vpop.f32.mrb[1].mxu1 }
 0x37f   : > { %v1034_v44 = vsel %vm1033_vm11, %v1029_v42, -inf }
 0x380   : > { %1035 = vmax.xlane.f32.xlu0 %v1034_v44 }
 0x381   : > { %v869_v45 = vpop.f32.mrb[2].mxu1 }
 0x382   : > { %v1030_v46 = vsel %vm718_vm10, %v869_v45, -1e+30  ;;  %v2152_v47 = vpop.f32.mrb[3].mxu1 }
 0x383   : > { %v1037_v48 = vsel %vm1033_vm11, %v1030_v46, -inf  ;;  %v2041_v47 = vld [vmem:[%s2768_s6] ss:$0 sm:$0xff] }
 0x384   : > { %1038 = vmax.xlane.f32.xlu1 %v1037_v48 }
 0x385   : > { %v946_v49 = vpop.f32.mrb[4].mxu1  ;;  %v1023_v50 = vpop.f32.mrb[4].mxu0 }
 0x386   : > { %v1031_v51 = vsel %vm718_vm10, %v946_v49, -1e+30  ;;  %v2157_v52 = vpop.f32.mrb[5].mxu1  ;;  %v2162_v53 = vpop.f32.mrb[5].mxu0  ;;  %v1032_v55 = vsel %vm718_vm10, %v1023_v50, -1e+30 }
 0x387   : > { %v1040_v54 = vsel %vm1033_vm11, %v1031_v51, -inf  ;;  %v1043_v56 = vsel %vm1033_vm11, %v1032_v55, -inf }
 0x388   : > { %1041 = vmax.xlane.f32.xlu0 %v1040_v54 }
 0x38c   : > { %1044 = vmax.xlane.f32.xlu0 %v1043_v56 }
 0x40d   : > { %v1036_v57 = vpop.xlane.xlu0 %1035 }
 0x40e   : > { %v1046_v58 = vsub.f32 %v1029_v42, %v1036_v57 }
 0x410   : > { %v1050_v59 = vmul.f32 1.442695, %v1046_v58 }
 0x411   : > { %v1039_v60 = vpop.xlane.xlu1 %1038 }
 0x412   : > { %2323 = vpow2.f32 %v1050_v59  ;;  %v1047_v63 = vsub.f32 %v1030_v46, %v1039_v60 }
 0x414   : > { %v1052_v8 = vmul.f32 1.442695, %v1047_v63 }
 0x415   : > { %v1042_v61 = vpop.xlane.xlu0 %1041 }
 0x416   : > { %v1048_v62 = vsub.f32 %v1031_v51, %v1042_v61 }
 0x418   : > { %v1054_v3 = vmul.f32 1.442695, %v1048_v62 }
 0x419   : > { %v1045_v4 = vpop.xlane.xlu0 %1044 }
 0x41a   : > { %2325 = vpow2.f32 %v1054_v3  ;;  %v1049_v6 = vsub.f32 %v1032_v55, %v1045_v4 }
 0x41c   : > { %v2324_v7 = vpop.eup %2323  ;;  %v1056_v9 = vmul.f32 1.442695, %v1049_v6 }
 0x41d   : > { %v1058_v10 = vsel %vm1033_vm11, %v2324_v7, 0.0 }
 0x41e   : > { %2327 = vpow2.f32 %v1056_v9  ;;  %1059 = vadd.xlane.f32.xlu0 %v1058_v10 }
 0x41f   : > { %2329 = vpow2.f32 %v1052_v8 }
 0x424   : > { %v2326_v11 = vpop.eup %2325 }
 0x425   : > { %v1064_v14 = vsel %vm1033_vm11, %v2326_v11, 0.0 }
 0x426   : > { %1065 = vadd.xlane.f32.xlu0 %v1064_v14 }
 0x428   : > { %v2328_v15 = vpop.eup %2327 }
 0x429   : > { %v1067_v16 = vsel %vm1033_vm11, %v2328_v15, 0.0  ;;  %v2330_v17 = vpop.eup %2329 }
 0x42a   : > { %1068 = vadd.xlane.f32.xlu1 %v1067_v16  ;;  %v1061_v18 = vsel %vm1033_vm11, %v2330_v17, 0.0 }
 0x42e   : > { %1062 = vadd.xlane.f32.xlu1 %v1061_v18 }
 0x43c   : > { %1078 = vrot.lane.b32.xlu0 %v2548_v29, %s2374_s28 }
 0x43f   : > { %1154 = vrot.lane.b32.xlu1 %v2546_v27, %s2374_s28 }
 0x443   : > { %1230 = vrot.lane.b32.xlu1 %v2552_v32, %s2374_s28 }
 0x447   : > { %1306 = vrot.lane.b32.xlu1 %v2555_v33, %s2374_s28 }
 0x4ab   : > { %v1060_v19 = vpop.xlane.xlu0 %1059 }
 0x4ac   : > { %2331 = vrcp.f32 %v1060_v19 }
 0x4b3   : > { %v1066_v22 = vpop.xlane.xlu0 %1065 }
 0x4b4   : > { %2333 = vrcp.f32 %v1066_v22 }
 0x4b6   : > { %v2332_v23 = vpop.eup %2331 }
 0x4b7   : > { %v1074_v12 = vmul.f32 %v2332_v23, %v2324_v7  ;;  %v1069_v24 = vpop.xlane.xlu1 %1068  ;;  %v1079_v25 = vpop.permute.xlu0 %1078 }
 0x4b8   : > { %2164 = vmatpush3.msra.mxu1 %v1079_v25  ;;  %v1598_v25 = vld [vmem:[%s2771_s9 + $0x10] sm:$0xff] }
 0x4b9   : > { %2166 = vmatmul.mubr.msk.f32.vlgmr.msra.gmra.mrb[6].mxu1 %vm1033_vm11, %v1074_v12  ;;  %2173 = vmatprep.subr.mxu1 %v2371_v20  ;;  %v1596_v12 = vld [vmem:[%s2771_s9] sm:$0xff] }
 0x4ba   : > { %2175 = vmatprep.mubr.msk.f32.mxu1 %vm2372_vm9, %v2371_v20 }
 0x4bb   : > { %v1063_v26 = vpop.xlane.xlu1 %1062 }
 0x4bc   : > { %2335 = vrcp.f32 %v1063_v26 }
 0x4bd   : > { %2337 = vrcp.f32 %v1069_v24  ;;  %v1597_v24 = vld [vmem:[%s2771_s9 + $0x8] sm:$0xff] }
 0x4be   : > { %v2334_v21 = vpop.eup %2333  ;;  %v2263_v26 = vpack.c.bf16 %v1597_v24, %v1596_v12  ;;  %v1731_v12 = vld [vmem:[%s2773_s11 + $0x18] sm:$0xff] }
 0x4bf   : > { %v1155_v13 = vpop.permute.xlu1 %1154  ;;  %v1076_v27 = vmul.f32 %v2334_v21, %v2326_v11 }
 0x4c0   : > { %2169 = vmatpush3.msra.mxu0 %v1155_v13  ;;  %v1599_v13 = vld [vmem:[%s2771_s9 + $0x18] sm:$0xff] }
 0x4c1   : > { %2178 = vmatprep.subr.mxu0 %v2371_v20  ;;  %v2267_v21 = vpack.c.bf16 %v1599_v13, %v1598_v25  ;;  %v1732_v25 = vld [vmem:[%s2773_s11 + $0x20] sm:$0xff] }
 0x4c3   : > { %v1231_v28 = vpop.permute.xlu1 %1230 }
 0x4c4   : > { %2174 = vmatpush3.msra.mxu1 %v1231_v28 }
 0x4c5   : > { %2176 = vmatmul.mubr.msk.f32.vlgmr.msra.gmra.mrb[8].mxu1 %vm1033_vm11, %v1076_v27  ;;  %2256 = vmatprep.subr.bf16.mxu1 %v2255_v36 }
 0x4c6   : > { %v2336_v29 = vpop.eup %2335  ;;  %2258 = vmatpush3.bf16.msra.mxu1 %v2255_v36 }
 0x4c7   : > { %v1075_v30 = vmul.f32 %v2336_v29, %v2330_v17  ;;  %v1307_v31 = vpop.permute.xlu1 %1306  ;;  %v2338_v32 = vpop.eup %2337 }
 0x4c8   : > { %v1077_v33 = vmul.f32 %v2338_v32, %v2328_v15 }
 0x4c9   : > { %2171 = vmatmul.mubr.msk.f32.vlgmr.msra.gmra.mrb[6].mxu0 %vm1033_vm11, %v1075_v30 }
 0x4ca   : > { %2179 = vmatpush3.msra.mxu0 %v1307_v31  ;;  %2180 = vmatprep.mubr.msk.f32.mxu0 %vm2372_vm9, %v2371_v20  ;;  %v1385_v20 = vld [vmem:[%s2767_s5 + $0x18] sm:$0xff] }
 0x4cb   : > { %v2259_v38 = vpack.c.bf16 %v1385_v20, %v1384_v37  ;;  %2264 = vmatprep.subr.bf16.mxu0 %v2263_v26 }
 0x4cd   : > { %2181 = vmatmul.mubr.msk.f32.vlgmr.msra.gmra.mrb[8].mxu0 %vm1033_vm11, %v1077_v33  ;;  %2260 = vmatprep.subr.bf16.mxu1 %v2259_v38 }
 0x4ce   : > { %2262 = vmatpush3.bf16.msra.mxu1 %v2259_v38  ;;  %2266 = vmatpush3.bf16.msra.mxu0 %v2263_v26  ;;  %v1733_v26 = vld [vmem:[%s2773_s11 + $0x28] sm:$0xff] }
 0x4cf   : > { %2268 = vmatprep.subr.bf16.mxu0 %v2267_v21  ;;  %v2279_v13 = vpack.c.bf16 %v1733_v26, %v1732_v25 }
 0x4d2   : > { %2270 = vmatpush3.bf16.msra.mxu0 %v2267_v21  ;;  %v1734_v21 = vld [vmem:[%s2773_s11 + $0x30] sm:$0xff] }
 0x58c   : > { %v1150_v39 = vpop.f32.mrb[6].mxu1 }
 0x58d   : > { %v2167_v40 = vpop.f32.mrb[7].mxu1  ;;  %2191 = vmatprep.mubr.msk.f32.mxu1 %vm502_vm0, %v1150_v39 }
 0x598   : > { %v1302_v41 = vpop.f32.mrb[8].mxu1 }
 0x599   : > { %v2177_v42 = vpop.f32.mrb[9].mxu1 }
 0x59c   : > { %v1226_v43 = vpop.f32.mrb[6].mxu0 }
 0x59d   : > { %v2172_v44 = vpop.f32.mrb[7].mxu0  ;;  %2192 = vmatmul.mubr.msk.f32.vlgmr.msra.gmra.mrb[10].mxu1 %vm502_vm0, %v1226_v43 }
 0x59e   : > { %2194 = vmatprep.mubr.msk.f32.mxu1 %vm502_vm0, %v1302_v41 }
 0x5a0   : > { %v1378_v45 = vpop.f32.mrb[8].mxu0 }
 0x5a1   : > { %v2182_v46 = vpop.f32.mrb[9].mxu0  ;;  %2195 = vmatmul.mubr.msk.f32.gmra.mrb[12].mxu1 %vm502_vm0, %v1378_v45 }
 0x670   : > { %v2193_v48 = vpop.f32.mrb[10].mxu1 }
 0x671   : > { %v1477_v49 = vadd.f32 %v2193_v48, %v2041_v47  ;;  %v1471_v50 = vpop.f32.mrb[11].mxu1 }
 0x672   : > { %v1472_v51 = vadd.f32 %v2041_v47, %v1471_v50 }
 0x673   : > { %v2628_v52 = vadd.f32 %v1477_v49, %v2475_v2 }
 0x674   : > { %v2631_v53 = vadd.f32 %v1472_v51, %v2471_v0  ;;  %v2196_v54 = vpop.f32.mrb[12].mxu1 }
 0x675   : > { %v1481_v55 = vpop.f32.mrb[13].mxu1  ;;  %v1497_v56 = vsel %vm502_vm0, %v2628_v52, 0.0  ;;  %v1487_v57 = vadd.f32 %v2196_v54, %v2041_v47 }
 0x676   : > { %v1482_v58 = vadd.f32 %v2041_v47, %v1481_v55  ;;  %1498 = vadd.xlane.f32.xlu1 %v1497_v56  ;;  %v1494_v59 = vsel %vm502_vm0, %v2631_v53, 0.0 }
 0x677   : > { %1495 = vadd.xlane.f32.xlu0 %v1494_v59  ;;  %v2641_v2 = vadd.f32 %v1487_v57, %v2481_v5 }
 0x678   : > { %v2638_v60 = vadd.f32 %v1482_v58, %v2473_v1 }
 0x679   : > { %v1503_v61 = vsel %vm502_vm0, %v2641_v2, 0.0 }
 0x67a   : > { %v1500_v0 = vsel %vm502_vm0, %v2638_v60, 0.0 }
 0x67b   : > { %1501 = vadd.xlane.f32.xlu0 %v1500_v0 }
 0x67f   : > { %1504 = vadd.xlane.f32.xlu0 %v1503_v61  ;;  %v2046_v61 = vld [vmem:[%s2769_s7] ss:$0 sm:$0xff] }
 0x703   : > { %v1499_v62 = vpop.xlane.xlu1 %1498 }
 0x704   : > { %v1507_v63 = vmul.f32 0.03125, %v1499_v62  ;;  %v1496_v3 = vpop.xlane.xlu0 %1495 }
 0x705   : > { %v1506_v4 = vmul.f32 0.03125, %v1496_v3 }
 0x706   : > { %v2648_v6 = vsub.f32 %v2628_v52, %v1507_v63 }
 0x707   : > { %v2651_v1 = vsub.f32 %v2631_v53, %v1506_v4  ;;  %v2047_v4 = vld [vmem:[%s2770_s8] ss:$0 sm:$0xff] }
 0x708   : > { %v1502_v5 = vpop.xlane.xlu0 %1501  ;;  %v1515_v7 = vmul.f32 %v2648_v6, %v2648_v6 }
 0x709   : > { %v1508_v8 = vmul.f32 0.03125, %v1502_v5  ;;  %v1514_v9 = vmul.f32 %v2651_v1, %v2651_v1 }
 0x70a   : > { %v1521_v10 = vsel %vm502_vm0, %v1515_v7, 0.0 }
 0x70b   : > { %v2659_v11 = vsub.f32 %v2638_v60, %v1508_v8  ;;  %1522 = vadd.xlane.f32.xlu1 %v1521_v10  ;;  %v1518_v14 = vsel %vm502_vm0, %v1514_v9, 0.0 }
 0x70c   : > { %1519 = vadd.xlane.f32.xlu0 %v1518_v14  ;;  %v1505_v15 = vpop.xlane.xlu0 %1504 }
 0x70d   : > { %v1509_v16 = vmul.f32 0.03125, %v1505_v15  ;;  %v1516_v17 = vmul.f32 %v2659_v11, %v2659_v11 }
 0x70f   : > { %v2665_v18 = vsub.f32 %v2641_v2, %v1509_v16  ;;  %v1524_v19 = vsel %vm502_vm0, %v1516_v17, 0.0 }
 0x710   : > { %1525 = vadd.xlane.f32.xlu0 %v1524_v19 }
 0x711   : > { %v1517_v22 = vmul.f32 %v2665_v18, %v2665_v18 }
 0x713   : > { %v1527_v23 = vsel %vm502_vm0, %v1517_v22, 0.0  ;;  %v1729_v22 = vld [vmem:[%s2773_s11 + $0x8] sm:$0xff] }
 0x714   : > { %1528 = vadd.xlane.f32.xlu1 %v1527_v23 }
 0x798   : > { %v1523_v27 = vpop.xlane.xlu1 %1522 }
 0x799   : > { %v1531_v28 = vmul.f32 0.03125, %v1523_v27  ;;  %v1520_v29 = vpop.xlane.xlu0 %1519  ;;  %v1735_v27 = vld [vmem:[%s2773_s11 + $0x38] sm:$0xff] }
 0x79a   : > { %v1530_v30 = vmul.f32 0.03125, %v1520_v29  ;;  %v1845_v29 = vld [vmem:[%s2775_s13] sm:$0xff] }
 0x79b   : > { %2339 = vrsqrt.f32 %v1531_v28  ;;  %vm1543_vm12 = vcmp.eq.f32.partialorder %v1531_v28, inf  ;;  %v1546_v20 = vand.u32 2147483648, %v1531_v28  ;;  %vm1545_vm13 = vcmp.eq.f32.partialorder %v1531_v28, 0.0 }
 0x79c   : > { %2341 = vrsqrt.f32 %v1530_v30  ;;  %vm1536_vm14 = vcmp.eq.f32.partialorder %v1530_v30, inf  ;;  %v1539_v40 = vand.u32 2147483648, %v1530_v30  ;;  %vm1538_vm15 = vcmp.eq.f32.partialorder %v1530_v30, 0.0 }
 0x79d   : > { %v1526_v31 = vpop.xlane.xlu0 %1525 }
 0x79e   : > { %v1532_v32 = vmul.f32 0.03125, %v1526_v31 }
 0x7a0   : > { %2343 = vrsqrt.f32 %v1532_v32  ;;  %vm1550_vm1 = vcmp.eq.f32.partialorder %v1532_v32, inf  ;;  %v1553_v48 = vand.u32 2147483648, %v1532_v32  ;;  %vm1552_vm2 = vcmp.eq.f32.partialorder %v1532_v32, 0.0 }
 0x7a1   : > { %v1529_v33 = vpop.xlane.xlu1 %1528 }
 0x7a2   : > { %v1533_v34 = vmul.f32 0.03125, %v1529_v33 }
 0x7a4   : > { %2345 = vrsqrt.f32 %v1533_v34  ;;  %vm1557_vm3 = vcmp.eq.f32.partialorder %v1533_v34, inf  ;;  %v1560_v56 = vand.u32 2147483648, %v1533_v34  ;;  %vm1559_vm4 = vcmp.eq.f32.partialorder %v1533_v34, 0.0 }
 0x7a5   : > { %v2340_v35 = vpop.eup %2339 }
 0x7a6   : > { %v2342_v36 = vpop.eup %2341  ;;  %v1542_v37 = vmul.f32 %v2340_v35, %v1531_v28 }
 0x7a7   : > { %v1535_v38 = vmul.f32 %v2342_v36, %v1530_v30 }
 0x7a8   : > { %v1544_v39 = vsel %vm1543_vm12, %v1531_v28, %v1542_v37  ;;  %v2283_v28 = vpack.c.bf16 %v1735_v27, %v1734_v21 }
 0x7a9   : > { %v1547_v41 = vsel %vm1545_vm13, %v1546_v20, %v1544_v39  ;;  %v1537_v42 = vsel %vm1536_vm14, %v1530_v30, %v1535_v38  ;;  %v1846_v30 = vld [vmem:[%s2775_s13 + $0x8] sm:$0xff] }
 0x7aa   : > { %v2344_v43 = vpop.eup %2343  ;;  %v1563_v44 = vadd.f32 1e-05, %v1547_v41  ;;  %v1540_v45 = vsel %vm1538_vm15, %v1539_v40, %v1537_v42  ;;  %v2287_v31 = vpack.c.bf16 %v1846_v30, %v1845_v29 }
 0x7ab   : > { %v1562_v46 = vadd.f32 1e-05, %v1540_v45  ;;  %v1549_v47 = vmul.f32 %v2344_v43, %v1532_v32 }
 0x7ac   : > { %2347 = vrcp.f32 %v1563_v44  ;;  %2288 = vmatprep.subr.bf16.mxu0 %v2287_v31 }
 0x7ad   : > { %2349 = vrcp.f32 %v1562_v46  ;;  %v1551_v49 = vsel %vm1550_vm1, %v1532_v32, %v1549_v47  ;;  %v2048_v32 = vld [vmem:[%s2772_s10] ss:$0 sm:$0xff] }
 0x7ae   : > { %v2346_v50 = vpop.eup %2345  ;;  %v1554_v51 = vsel %vm1552_vm2, %v1553_v48, %v1551_v49 }
 0x7af   : > { %v1564_v54 = vadd.f32 1e-05, %v1554_v51  ;;  %v1556_v55 = vmul.f32 %v2346_v50, %v1533_v34 }
 0x7b1   : > { %2351 = vrcp.f32 %v1564_v54  ;;  %v1558_v57 = vsel %vm1557_vm3, %v1533_v34, %v1556_v55 }
 0x7b2   : > { %v1561_v58 = vsel %vm1559_vm4, %v1560_v56, %v1558_v57 }
 0x7b3   : > { %v1565_v59 = vadd.f32 1e-05, %v1561_v58 }
 0x7b5   : > { %2353 = vrcp.f32 %v1565_v59 }
 0x7b6   : > { %v2348_v0 = vpop.eup %2347 }
 0x7b7   : > { %v2350_v62 = vpop.eup %2349  ;;  %v1571_v63 = vmul.f32 %v2348_v0, %v2648_v6 }
 0x7b8   : > { %v1570_v3 = vmul.f32 %v2350_v62, %v2651_v1  ;;  %v1847_v62 = vld [vmem:[%s2775_s13 + $0x10] sm:$0xff] }
 0x7b9   : > { %v1582_v5 = vmul.f32 %v2046_v61, %v1571_v63  ;;  %v1848_v63 = vld [vmem:[%s2775_s13 + $0x18] sm:$0xff] }
 0x7ba   : > { %v1581_v7 = vmul.f32 %v2046_v61, %v1570_v3  ;;  %v2291_v3 = vpack.c.bf16 %v1848_v63, %v1847_v62 }
 0x7bb   : > { %v2352_v8 = vpop.eup %2351  ;;  %v1593_v14 = vadd.f32 %v2047_v4, %v1582_v5 }
 0x7bc   : > { %v1592_v9 = vadd.f32 %v2047_v4, %v1581_v7  ;;  %v1572_v10 = vmul.f32 %v2352_v8, %v2659_v11  ;;  %v1728_v11 = vld [vmem:[%s2773_s11] sm:$0xff] }
 0x7bd   : > { %v2271_v23 = vpack.c.bf16 %v1729_v22, %v1728_v11 }
 0x7be   : > { %2205 = vmatprep.mubr.msk.f32.mxu0 %vm502_vm0, %v1592_v9  ;;  %v1583_v15 = vmul.f32 %v2046_v61, %v1572_v10 }
 0x7bf   : > { %v2354_v16 = vpop.eup %2353  ;;  %2206 = vmatmul.mubr.msk.f32.vlgmr.msra.gmra.mrb[10].mxu0 %vm502_vm0, %v1593_v14  ;;  %2272 = vmatprep.subr.bf16.mxu1 %v2271_v23 }
 0x7c0   : > { %v1594_v6 = vadd.f32 %v2047_v4, %v1583_v15  ;;  %v1573_v1 = vmul.f32 %v2354_v16, %v2665_v18  ;;  %2274 = vmatpush3.bf16.msra.mxu1 %v2271_v23  ;;  %v1730_v18 = vld [vmem:[%s2773_s11 + $0x10] sm:$0xff]  ;;  %2290 = vmatpush3.bf16.msra.mxu0 %v2287_v31 }
 0x7c1   : > { %v2275_v24 = vpack.c.bf16 %v1731_v12, %v1730_v18  ;;  %2292 = vmatprep.subr.bf16.mxu0 %v2291_v3 }
 0x7c2   : > { %2208 = vmatprep.mubr.msk.f32.mxu0 %vm502_vm0, %v1594_v6  ;;  %v1584_v17 = vmul.f32 %v2046_v61, %v1573_v1 }
 0x7c3   : > { %2276 = vmatprep.subr.bf16.mxu1 %v2275_v24 }
 0x7c4   : > { %v1595_v19 = vadd.f32 %v2047_v4, %v1584_v17  ;;  %2278 = vmatpush3.bf16.msra.mxu1 %v2275_v24  ;;  %2294 = vmatpush3.bf16.msra.mxu0 %v2291_v3  ;;  %v2057_v4 = vld [vmem:[%s2774_s12] ss:$0 sm:$0xff] }
 0x7c5   : > { %2280 = vmatprep.subr.bf16.mxu1 %v2279_v13 }
 0x7c6   : > { %2209 = vmatmul.mubr.msk.f32.gmra.mrb[12].mxu0 %vm502_vm0, %v1595_v19 }
 0x7c8   : > { %2282 = vmatpush3.bf16.msra.mxu1 %v2279_v13 }
 0x7c9   : > { %2284 = vmatprep.subr.bf16.mxu1 %v2283_v28 }
 0x7cc   : > { %2286 = vmatpush3.bf16.msra.mxu1 %v2283_v28 }
 0x892   : > { %v2207_v33 = vpop.f32.mrb[10].mxu0 }
 0x893   : > { %v1691_v34 = vadd.f32 %v2207_v33, %v2048_v32  ;;  %v1685_v35 = vpop.f32.mrb[11].mxu0 }
 0x894   : > { %v1686_v36 = vadd.f32 %v2048_v32, %v1685_v35 }
 0x895   : > { %v1709_v37 = vmin.f32 %v1691_v34, 0.0  ;;  %vm1705_vm7 = vcmp.gt.f32.partialorder %v1691_v34, 0.0 }
 0x896   : > { %v1708_v20 = vmin.f32 %v1686_v36, 0.0  ;;  %vm1704_vm6 = vcmp.gt.f32.partialorder %v1686_v36, 0.0 }
 0x897   : > { %v1714_v38 = vmul.f32 1.442695, %v1709_v37 }
 0x898   : > { %v1712_v39 = vmul.f32 1.442695, %v1708_v20 }
 0x899   : > { %2355 = vpow2.f32 %v1714_v38  ;;  %v2210_v40 = vpop.f32.mrb[12].mxu0 }
 0x89a   : > { %2357 = vpow2.f32 %v1712_v39  ;;  %v1701_v41 = vadd.f32 %v2210_v40, %v2048_v32  ;;  %v1695_v42 = vpop.f32.mrb[13].mxu0 }
 0x89b   : > { %v1696_v43 = vadd.f32 %v2048_v32, %v1695_v42 }
 0x89c   : > { %v1711_v44 = vmin.f32 %v1701_v41, 0.0  ;;  %vm1707_vm9 = vcmp.gt.f32.partialorder %v1701_v41, 0.0 }
 0x89d   : > { %v1710_v45 = vmin.f32 %v1696_v43, 0.0  ;;  %vm1706_vm8 = vcmp.gt.f32.partialorder %v1696_v43, 0.0 }
 0x89e   : > { %v1718_v46 = vmul.f32 1.442695, %v1711_v44 }
 0x89f   : > { %v1716_v47 = vmul.f32 1.442695, %v1710_v45 }
 0x8a0   : > { %2359 = vpow2.f32 %v1718_v46 }
 0x8a1   : > { %2361 = vpow2.f32 %v1716_v47 }
 0x8a3   : > { %v2356_v48 = vpop.eup %2355 }
 0x8a4   : > { %v2358_v49 = vpop.eup %2357  ;;  %v2054_v50 = vadd.f32 -1.0, %v2356_v48 }
 0x8a5   : > { %v2053_v51 = vadd.f32 -1.0, %v2358_v49 }
 0x8a6   : > { %v1725_v55 = vsel %vm1705_vm7, %v1691_v34, %v2054_v50 }
 0x8a7   : > { %v1724_v54 = vsel %vm1704_vm6, %v1686_v36, %v2053_v51 }
 0x8a8   : > { %2227 = vmatprep.mubr.msk.f32.mxu1 %vm1743_vm5, %v1724_v54 }
 0x8a9   : > { %2228 = vmatmul.mubr.msk.f32.vlgmr.msra.gmra.mrb[14].mxu1 %vm1743_vm5, %v1725_v55 }
 0x8aa   : > { %v2360_v56 = vpop.eup %2359 }
 0x8ab   : > { %v2362_v57 = vpop.eup %2361  ;;  %v2056_v58 = vadd.f32 -1.0, %v2360_v56 }
 0x8ac   : > { %v2055_v59 = vadd.f32 -1.0, %v2362_v57 }
 0x8ad   : > { %v1727_v61 = vsel %vm1707_vm9, %v1701_v41, %v2056_v58 }
 0x8ae   : > { %v1726_v0 = vsel %vm1706_vm8, %v1696_v43, %v2055_v59 }
 0x8af   : > { %2230 = vmatprep.mubr.msk.f32.mxu1 %vm1743_vm5, %v1726_v0 }
 0x8b0   : > { %2231 = vmatmul.mubr.msk.f32.gmra.mrb[16].mxu1 %vm1743_vm5, %v1727_v61 }
 0x97c   : > { %v2229_v5 = vpop.f32.mrb[14].mxu1 }
 0x97d   : > { %v1828_v7 = vadd.f32 %v2229_v5, %v2057_v4  ;;  %v1822_v8 = vpop.f32.mrb[15].mxu1 }
 0x97e   : > { %v1823_v9 = vadd.f32 %v2057_v4, %v1822_v8 }
 0x97f   : > { %v1842_v14 = vadd.f32 %v1828_v7, %v2628_v52  ;;  %v2062_v52 = vld [vmem:[%s2776_s14] ss:$0 sm:$0xff] }
 0x980   : > { %v1841_v10 = vadd.f32 %v1823_v9, %v2631_v53 }
 0x982   : > { %2241 = vmatprep.mubr.msk.f32.mxu0 %vm502_vm0, %v1841_v10 }
 0x983   : > { %v2232_v15 = vpop.f32.mrb[16].mxu1  ;;  %2242 = vmatmul.mubr.msk.f32.vlgmr.msra.gmra.mrb[14].mxu0 %vm502_vm0, %v1842_v14 }
 0x984   : > { %v1838_v16 = vadd.f32 %v2232_v15, %v2057_v4  ;;  %v1832_v6 = vpop.f32.mrb[17].mxu1 }
 0x985   : > { %v1833_v1 = vadd.f32 %v2057_v4, %v1832_v6 }
 0x986   : > { %v1844_v19 = vadd.f32 %v1838_v16, %v2641_v2 }
 0x987   : > { %v1843_v17 = vadd.f32 %v1833_v1, %v2638_v60 }
 0x989   : > { %2244 = vmatprep.mubr.msk.f32.mxu0 %vm502_vm0, %v1843_v17 }
 0x98a   : > { %2245 = vmatmul.mubr.msk.f32.gmra.mrb[16].mxu0 %vm502_vm0, %v1844_v19 }
 0xa56   : > { %v2243_v53 = vpop.f32.mrb[14].mxu0 }
 0xa57   : > { %v1934_v11 = vpop.f32.mrb[15].mxu0  ;;  %v1940_v23 = vadd.f32 %v2243_v53, %v2062_v52 }
 0xa58   : > { %v1935_v22 = vadd.f32 %v2062_v52, %v1934_v11 }
 0xa59   : > { %1954 = vst [vmem:[%s496_s23 + $0x8] sm:$0xff] %v1940_v23 }
 0xa5a   : > { %1953 = vst [vmem:[%s496_s23] sm:$0xff] %v1935_v22 }
 0xa5d   : > { %v2246_v60 = vpop.f32.mrb[16].mxu0 }
 0xa5e   : > { %v1944_v2 = vpop.f32.mrb[17].mxu0  ;;  %v1950_v12 = vadd.f32 %v2246_v60, %v2062_v52 }
 0xa5f   : > { %v1945_v18 = vadd.f32 %v2062_v52, %v1944_v2 }
 0xa60   : > { %1956 = vst [vmem:[%s496_s23 + $0x18] sm:$0xff] %v1950_v12 }
 0xa61   : > { %1955 = vst [vmem:[%s496_s23 + $0x10] sm:$0xff] %v1945_v18 }
 0xa62 PF: > { %s25_s18 = sadd.s32 1, %s2369_s18  }
 0xa63   : > { %p22_p4 = scmp.ge.s32.totalorder %s25_s18, 4  }
 0xa65   :  { %24 = sbr.rel (!%p22_p4) target bundleno = 1 (0x1), region = 110 }

</bundles_post_ra>
